<compile_context>
chip_gen: v6e
topology: v6e:2x2x1
jax: 0.10.0
libtpu: 0.0.40
codegen_flags: <defaults>
</compile_context>

<pallas_src>
import functools

import jax
import jax.numpy as jnp
from jax.experimental import pallas as pl
from jax.experimental.pallas import tpu as pltpu


def _round_up(x, m):
    return (x + m - 1) // m * m


# ----------------------------------------------------------------------------
# Fused kernel: one grid step == one image.  Everything stays in VMEM/vregs.
# ----------------------------------------------------------------------------
def _qnet_fused_kernel(xp_ref, w1_ref, b1_ref, w2_ref, b2_ref, w3_ref, b3_ref,
                       fw1_ref, fb1_ref, fw2_ref, fb2_ref, o_ref):
    f32 = jnp.float32
    bf16 = jnp.bfloat16

    # ---- conv1 (8x8 stride 4) as one matmul on 2x2-grouped patches -----------
    # xp: (100, 1024) rows = (oh2, ow2) blocks of 2x2 output pixels.  w1 is
    # block-diagonal so the 128 output lanes are the 4 pixels x 32 channels of a
    # block (space-to-depth-by-2 layout, fully lane-dense).  /255 is folded in.
    a1 = jnp.dot(xp_ref[0], w1_ref[...], preferred_element_type=f32)
    a1 = jnp.maximum(a1 + b1_ref[...], 0.0).astype(bf16)               # (100, 128)

    # ---- conv2 (4x4 stride 2) == 2x2 stride-1 conv on the s2d layout ----------
    # im2col = lane concat of contiguous row slices.  Rows with (r % 10 == 9) are
    # finite garbage and are never consumed by valid conv3 outputs.
    p2 = jnp.concatenate(
        [a1[d0 * 10 + d1:d0 * 10 + d1 + 89, :]
         for d0 in range(2) for d1 in range(2)], axis=1)                # (89, 512)
    a2 = jnp.dot(p2, w2_ref[...], preferred_element_type=f32)
    a2 = jnp.maximum(a2 + b2_ref[...], 0.0).astype(bf16)               # (89, 128) [64 real]

    # ---- conv3 (3x3 stride 1) --------------------------------------------------
    p3 = jnp.concatenate(
        [a2[d0 * 10 + d1:d0 * 10 + d1 + 67, :]
         for d0 in range(3) for d1 in range(3)], axis=1)                # (67, 1152)
    a3 = jnp.dot(p3, w3_ref[...], preferred_element_type=f32)
    a3 = jnp.maximum(a3 + b3_ref[...], 0.0).astype(bf16)               # (67, 128) [64 real]

    # ---- flatten the valid 7x7x64 activations in (h, w, c) order ---------------
    flat = jnp.concatenate(
        [a3[h * 10 + w:h * 10 + w + 1, 0:64]
         for h in range(7) for w in range(7)], axis=1)                  # (1, 3136)

    # ---- fc head ----------------------------------------------------------------
    h1 = jnp.dot(flat, fw1_ref[...], preferred_element_type=f32)
    h1 = jnp.maximum(h1 + fb1_ref[...], 0.0).astype(bf16)              # (1, 512)
    q = jnp.dot(h1, fw2_ref[...], preferred_element_type=f32) + fb2_ref[...]
    o_ref[0] = q                                                        # (1, N_pad)


def _fused_qnet_call(patches, params):
    """patches: (B, 100, 1024) bf16 grouped conv1 patches -> (B, 1, N_pad) f32."""
    B = patches.shape[0]
    n_out = params["fc2_w"].shape[1]

    flops = 2 * B * (100 * 1024 * 128 + 89 * 512 * 128 + 67 * 1152 * 128
                     + 3136 * 512 + 512 * n_out)
    w_keys = ("conv1_w", "conv1_b", "conv2_w", "conv2_b", "conv3_w", "conv3_b",
              "fc1_w", "fc1_b", "fc2_w", "fc2_b")
    w_bytes = sum(int(params[k].size) * params[k].dtype.itemsize for k in w_keys)
    cost = pl.CostEstimate(
        flops=flops,
        transcendentals=0,
        bytes_accessed=int(patches.size) * patches.dtype.itemsize
                       + w_bytes + B * n_out * 4)

    const2 = lambda b: (0, 0)
    return pl.pallas_call(
        _qnet_fused_kernel,
        out_shape=jax.ShapeDtypeStruct((B, 1, n_out), jnp.float32),
        grid=(B,),
        in_specs=[
            pl.BlockSpec((1, 100, 1024), lambda b: (b, 0, 0)),   # conv1 patches (per image)
            pl.BlockSpec((1024, 128), const2),                   # conv1_w (block-diag, /255 folded)
            pl.BlockSpec((1, 128), const2),                      # conv1_b
            pl.BlockSpec((512, 128), const2),                    # conv2_w
            pl.BlockSpec((1, 128), const2),                      # conv2_b
            pl.BlockSpec((1152, 128), const2),                   # conv3_w
            pl.BlockSpec((1, 128), const2),                      # conv3_b
            pl.BlockSpec((3136, 512), const2),                   # fc1_w
            pl.BlockSpec((1, 512), const2),                      # fc1_b
            pl.BlockSpec((512, n_out), const2),                  # fc2_w
            pl.BlockSpec((1, n_out), const2),                    # fc2_b
        ],
        out_specs=pl.BlockSpec((1, 1, n_out), lambda b: (b, 0, 0)),
        compiler_params=pltpu.CompilerParams(
            dimension_semantics=("parallel",),
            vmem_limit_bytes=32 * 1024 * 1024),
        cost_estimate=cost,
    )(patches,
      params["conv1_w"], params["conv1_b"],
      params["conv2_w"], params["conv2_b"],
      params["conv3_w"], params["conv3_b"],
      params["fc1_w"], params["fc1_b"],
      params["fc2_w"], params["fc2_b"])


# ----------------------------------------------------------------------------
# XLA glue: build conv1's grouped im2col patches (one small fused copy kernel).
# ----------------------------------------------------------------------------
def _conv1_grouped_patches(x_nchw):
    """x: (B, 4, 84, 84) f32 in [0, 255] -> (B, 100, 1024) bf16 grouped patches.

    Row (oh2*10 + ow2) covers the 2x2 block of conv1 outputs at
    (2*oh2 + a, 2*ow2 + b); columns are ordered (a, b, di, dj, ri, rj, ci) with
    kh = 4*di + ri, kw = 4*dj + rj, matching the conv1 weight packing below.
    """
    B = x_nchw.shape[0]
    x = x_nchw.astype(jnp.bfloat16)
    # space-to-depth by 4: (B, 21, 21, 64), channel order (ri, rj, ci)
    s = x.reshape(B, 4, 21, 4, 21, 4).transpose(0, 2, 4, 3, 5, 1).reshape(B, 21, 21, 64)
    cols = []
    for a in range(2):
        for b in range(2):
            for di in range(2):
                for dj in range(2):
                    r0, c0 = a + di, b + dj
                    cols.append(jax.lax.slice(
                        s, (0, r0, c0, 0), (B, r0 + 19, c0 + 19, 64), (1, 2, 2, 1)))
    patches = jnp.concatenate(cols, axis=-1)          # (B, 10, 10, 1024)
    return patches.reshape(B, 100, 1024)


# ----------------------------------------------------------------------------
# Parameters (PyTorch-default uniform init), packed into kernel-friendly layouts.
# ----------------------------------------------------------------------------
def init_qnetwork_params(key, action_size):
    ks = jax.random.split(key, 10)

    def u(k, shape, fan_in):
        bound = 1.0 / jnp.sqrt(jnp.float32(fan_in))
        return jax.random.uniform(k, shape, jnp.float32, -bound, bound)

    # Raw weights in the PyTorch layouts (Cout, Cin, KH, KW) / (in, out).
    w1 = u(ks[0], (32, 4, 8, 8), 4 * 8 * 8)
    b1 = u(ks[1], (32,), 4 * 8 * 8)
    w2 = u(ks[2], (64, 32, 4, 4), 32 * 4 * 4)
    b2 = u(ks[3], (64,), 32 * 4 * 4)
    w3 = u(ks[4], (64, 64, 3, 3), 64 * 3 * 3)
    b3 = u(ks[5], (64,), 64 * 3 * 3)
    fw1 = u(ks[6], (7 * 7 * 64, 512), 7 * 7 * 64)
    fb1 = u(ks[7], (512,), 7 * 7 * 64)
    fw2 = u(ks[8], (512, action_size), 512)
    fb2 = u(ks[9], (action_size,), 512)

    bf16, f32 = jnp.bfloat16, jnp.float32
    a_pad = _round_up(max(action_size, 1), 128)

    # conv1 -> block-diagonal (1024, 128); rows (di,dj,ri,rj,ci) per (a,b) block,
    # columns (a,b,co).  1/255 is folded into the weights here.
    blk = jnp.transpose(w1, (2, 3, 1, 0)).reshape(2, 4, 2, 4, 4, 32)   # (di,ri,dj,rj,ci,co)
    blk = jnp.transpose(blk, (0, 2, 1, 3, 4, 5)).reshape(256, 32) * (1.0 / 255.0)
    c1w = jnp.zeros((1024, 128), f32)
    for g in range(4):
        c1w = c1w.at[g * 256:(g + 1) * 256, g * 32:(g + 1) * 32].set(blk)
    c1b = jnp.tile(b1, 4)                                              # (128,)

    # conv2 -> (512, 128); rows (dh, dw, a, b, ci) with kh=2dh+a, kw=2dw+b.
    wt2 = jnp.transpose(w2, (2, 3, 1, 0)).reshape(2, 2, 2, 2, 32, 64)  # (dh,a,dw,b,ci,co)
    wt2 = jnp.transpose(wt2, (0, 2, 1, 3, 4, 5)).reshape(512, 64)
    c2w = jnp.pad(wt2, ((0, 0), (0, 64)))
    c2b = jnp.pad(b2, (0, 64))

    # conv3 -> (1152, 128); rows (dh, dw, c[0:128]) with zero rows for c >= 64.
    wt3 = jnp.transpose(w3, (2, 3, 1, 0))                              # (3,3,64,64)
    wt3 = jnp.pad(wt3, ((0, 0), (0, 0), (0, 64), (0, 0))).reshape(1152, 64)
    c3w = jnp.pad(wt3, ((0, 0), (0, 64)))
    c3b = jnp.pad(b3, (0, 64))

    # fc2 -> pad action columns to a lane-dense width.
    f2w = jnp.pad(fw2, ((0, 0), (0, a_pad - action_size)))
    f2b = jnp.pad(fb2, (0, a_pad - action_size))

    return {
        "conv1_w": c1w.astype(bf16), "conv1_b": c1b.reshape(1, 128).astype(f32),
        "conv2_w": c2w.astype(bf16), "conv2_b": c2b.reshape(1, 128).astype(f32),
        "conv3_w": c3w.astype(bf16), "conv3_b": c3b.reshape(1, 128).astype(f32),
        "fc1_w": fw1.astype(bf16), "fc1_b": fb1.reshape(1, 512).astype(f32),
        "fc2_w": f2w.astype(bf16), "fc2_b": f2b.reshape(1, a_pad).astype(f32),
    }


# ----------------------------------------------------------------------------
# Forward pass (matches PyTorch QNetwork.forward semantics).
# ----------------------------------------------------------------------------
@functools.partial(jax.jit, static_argnames=("action_size",))
def qnetwork_forward(params, x, *, action_size):
    """x: (B, 4, 84, 84) float32 in [0, 255] (NCHW) -> (B, action_size) f32."""
    B = x.shape[0]
    patches = _conv1_grouped_patches(x)                 # (B, 100, 1024) bf16
    q = _fused_qnet_call(patches, params)               # (B, 1, N_pad) f32
    return q.reshape(B, -1)[:, :action_size]


if __name__ == "__main__":
    key = jax.random.PRNGKey(0)
    k_param, k_input = jax.random.split(key)

    action_size = 9          # e.g. Ms. Pac-Man action space
    batch = 2
    # 84x84 spatial size is implied by fc1 expecting 7*7*64 features.
    x = jax.random.uniform(k_input, (batch, 4, 84, 84),
                           dtype=jnp.float32, minval=0.0, maxval=255.0)

    params = init_qnetwork_params(k_param, action_size)

    q_values = qnetwork_forward(params, x, action_size=action_size)
    q_values = jax.block_until_ready(q_values)

    assert q_values.shape == (batch, action_size), q_values.shape
    assert q_values.dtype == jnp.float32
    assert bool(jnp.all(jnp.isfinite(q_values)))
    print("KERNEL_OK")
</pallas_src>

<mosaic_0001>
module attributes {stable_mosaic.version = 11 : i64} {
  func.func @_qnet_fused_kernel(%arg0: i32, %arg1: memref<1x100x1024xbf16, #tpu.memory_space<vmem>>, %arg2: memref<1024x128xbf16, #tpu.memory_space<vmem>>, %arg3: memref<1x128xf32, #tpu.memory_space<vmem>>, %arg4: memref<512x128xbf16, #tpu.memory_space<vmem>>, %arg5: memref<1x128xf32, #tpu.memory_space<vmem>>, %arg6: memref<1152x128xbf16, #tpu.memory_space<vmem>>, %arg7: memref<1x128xf32, #tpu.memory_space<vmem>>, %arg8: memref<3136x512xbf16, #tpu.memory_space<vmem>>, %arg9: memref<1x512xf32, #tpu.memory_space<vmem>>, %arg10: memref<512x128xbf16, #tpu.memory_space<vmem>>, %arg11: memref<1x128xf32, #tpu.memory_space<vmem>>, %arg12: memref<1x1x128xf32, #tpu.memory_space<vmem>>) attributes {dimension_semantics = [#tpu.dimension_semantics<parallel>], iteration_bounds = array<i64: 2>, scalar_prefetch = 0 : i64, scratch_operands = 0 : i64, tpu.core_type = #tpu.core_type<tc>, window_params = [{transform_indices = @transform_0, window_bounds = array<i64: 1, 100, 1024>}, {pipeline_mode = #tpu.pipeline_mode<synchronous>, transform_indices = @transform_1, window_bounds = array<i64: 1024, 128>}, {pipeline_mode = #tpu.pipeline_mode<synchronous>, transform_indices = @transform_2, window_bounds = array<i64: 1, 128>}, {pipeline_mode = #tpu.pipeline_mode<synchronous>, transform_indices = @transform_3, window_bounds = array<i64: 512, 128>}, {pipeline_mode = #tpu.pipeline_mode<synchronous>, transform_indices = @transform_4, window_bounds = array<i64: 1, 128>}, {pipeline_mode = #tpu.pipeline_mode<synchronous>, transform_indices = @transform_5, window_bounds = array<i64: 1152, 128>}, {pipeline_mode = #tpu.pipeline_mode<synchronous>, transform_indices = @transform_6, window_bounds = array<i64: 1, 128>}, {pipeline_mode = #tpu.pipeline_mode<synchronous>, transform_indices = @transform_7, window_bounds = array<i64: 3136, 512>}, {pipeline_mode = #tpu.pipeline_mode<synchronous>, transform_indices = @transform_8, window_bounds = array<i64: 1, 512>}, {pipeline_mode = #tpu.pipeline_mode<synchronous>, transform_indices = @transform_9, window_bounds = array<i64: 512, 128>}, {pipeline_mode = #tpu.pipeline_mode<synchronous>, transform_indices = @transform_10, window_bounds = array<i64: 1, 128>}, {transform_indices = @transform_11, window_bounds = array<i64: 1, 1, 128>}]} {
    %c0 = arith.constant 0 : index
    %c0_0 = arith.constant 0 : index
    %c0_1 = arith.constant 0 : index
    %0 = vector.load %arg1[%c0, %c0_0, %c0_1] : memref<1x100x1024xbf16, #tpu.memory_space<vmem>>, vector<1x100x1024xbf16>
    %1 = vector.shape_cast %0 : vector<1x100x1024xbf16> to vector<100x1024xbf16>
    %c0_2 = arith.constant 0 : index
    %c0_3 = arith.constant 0 : index
    %2 = vector.load %arg2[%c0_2, %c0_3] : memref<1024x128xbf16, #tpu.memory_space<vmem>>, vector<1024x128xbf16>
    %cst = arith.constant dense<0.000000e+00> : vector<100x128xf32>
    %3 = tpu.matmul %1, %2, %cst {dimension_numbers = #tpu.dot_dimension_numbers<[1], [0], [0], [1], [0, 0, 1, 1], [], []>} : vector<100x1024xbf16>, vector<1024x128xbf16>, vector<100x128xf32> -> vector<100x128xf32>
    %c0_4 = arith.constant 0 : index
    %c0_5 = arith.constant 0 : index
    %4 = vector.load %arg3[%c0_4, %c0_5] : memref<1x128xf32, #tpu.memory_space<vmem>>, vector<1x128xf32>
    %5 = vector.broadcast %4 : vector<1x128xf32> to vector<100x128xf32>
    %6 = arith.addf %3, %5 : vector<100x128xf32>
    %cst_6 = arith.constant 0.000000e+00 : f32
    %7 = vector.broadcast %cst_6 : f32 to vector<100x128xf32>
    %8 = arith.maximumf %6, %7 : vector<100x128xf32>
    %9 = arith.truncf %8 : vector<100x128xf32> to vector<100x128xbf16>
    %10 = vector.extract_strided_slice %9 {offsets = [0, 0], sizes = [89, 128], strides = [1, 1]} : vector<100x128xbf16> to vector<89x128xbf16>
    %11 = vector.extract_strided_slice %9 {offsets = [1, 0], sizes = [89, 128], strides = [1, 1]} : vector<100x128xbf16> to vector<89x128xbf16>
    %12 = vector.extract_strided_slice %9 {offsets = [10, 0], sizes = [89, 128], strides = [1, 1]} : vector<100x128xbf16> to vector<89x128xbf16>
    %13 = vector.extract_strided_slice %9 {offsets = [11, 0], sizes = [89, 128], strides = [1, 1]} : vector<100x128xbf16> to vector<89x128xbf16>
    %14 = tpu.concatenate %10, %11, %12, %13 in 1 : vector<89x128xbf16>, vector<89x128xbf16>, vector<89x128xbf16>, vector<89x128xbf16> -> vector<89x512xbf16>
    %c0_7 = arith.constant 0 : index
    %c0_8 = arith.constant 0 : index
    %15 = vector.load %arg4[%c0_7, %c0_8] : memref<512x128xbf16, #tpu.memory_space<vmem>>, vector<512x128xbf16>
    %cst_9 = arith.constant dense<0.000000e+00> : vector<89x128xf32>
    %16 = tpu.matmul %14, %15, %cst_9 {dimension_numbers = #tpu.dot_dimension_numbers<[1], [0], [0], [1], [0, 0, 1, 1], [], []>} : vector<89x512xbf16>, vector<512x128xbf16>, vector<89x128xf32> -> vector<89x128xf32>
    %c0_10 = arith.constant 0 : index
    %c0_11 = arith.constant 0 : index
    %17 = vector.load %arg5[%c0_10, %c0_11] : memref<1x128xf32, #tpu.memory_space<vmem>>, vector<1x128xf32>
    %18 = vector.broadcast %17 : vector<1x128xf32> to vector<89x128xf32>
    %19 = arith.addf %16, %18 : vector<89x128xf32>
    %cst_12 = arith.constant 0.000000e+00 : f32
    %20 = vector.broadcast %cst_12 : f32 to vector<89x128xf32>
    %21 = arith.maximumf %19, %20 : vector<89x128xf32>
    %22 = arith.truncf %21 : vector<89x128xf32> to vector<89x128xbf16>
    %23 = vector.extract_strided_slice %22 {offsets = [0, 0], sizes = [67, 128], strides = [1, 1]} : vector<89x128xbf16> to vector<67x128xbf16>
    %24 = vector.extract_strided_slice %22 {offsets = [1, 0], sizes = [67, 128], strides = [1, 1]} : vector<89x128xbf16> to vector<67x128xbf16>
    %25 = vector.extract_strided_slice %22 {offsets = [2, 0], sizes = [67, 128], strides = [1, 1]} : vector<89x128xbf16> to vector<67x128xbf16>
    %26 = vector.extract_strided_slice %22 {offsets = [10, 0], sizes = [67, 128], strides = [1, 1]} : vector<89x128xbf16> to vector<67x128xbf16>
    %27 = vector.extract_strided_slice %22 {offsets = [11, 0], sizes = [67, 128], strides = [1, 1]} : vector<89x128xbf16> to vector<67x128xbf16>
    %28 = vector.extract_strided_slice %22 {offsets = [12, 0], sizes = [67, 128], strides = [1, 1]} : vector<89x128xbf16> to vector<67x128xbf16>
    %29 = vector.extract_strided_slice %22 {offsets = [20, 0], sizes = [67, 128], strides = [1, 1]} : vector<89x128xbf16> to vector<67x128xbf16>
    %30 = vector.extract_strided_slice %22 {offsets = [21, 0], sizes = [67, 128], strides = [1, 1]} : vector<89x128xbf16> to vector<67x128xbf16>
    %31 = vector.extract_strided_slice %22 {offsets = [22, 0], sizes = [67, 128], strides = [1, 1]} : vector<89x128xbf16> to vector<67x128xbf16>
    %32 = tpu.concatenate %23, %24, %25, %26, %27, %28, %29, %30, %31 in 1 : vector<67x128xbf16>, vector<67x128xbf16>, vector<67x128xbf16>, vector<67x128xbf16>, vector<67x128xbf16>, vector<67x128xbf16>, vector<67x128xbf16>, vector<67x128xbf16>, vector<67x128xbf16> -> vector<67x1152xbf16>
    %c0_13 = arith.constant 0 : index
    %c0_14 = arith.constant 0 : index
    %33 = vector.load %arg6[%c0_13, %c0_14] : memref<1152x128xbf16, #tpu.memory_space<vmem>>, vector<1152x128xbf16>
    %cst_15 = arith.constant dense<0.000000e+00> : vector<67x128xf32>
    %34 = tpu.matmul %32, %33, %cst_15 {dimension_numbers = #tpu.dot_dimension_numbers<[1], [0], [0], [1], [0, 0, 1, 1], [], []>} : vector<67x1152xbf16>, vector<1152x128xbf16>, vector<67x128xf32> -> vector<67x128xf32>
    %c0_16 = arith.constant 0 : index
    %c0_17 = arith.constant 0 : index
    %35 = vector.load %arg7[%c0_16, %c0_17] : memref<1x128xf32, #tpu.memory_space<vmem>>, vector<1x128xf32>
    %36 = vector.broadcast %35 : vector<1x128xf32> to vector<67x128xf32>
    %37 = arith.addf %34, %36 : vector<67x128xf32>
    %cst_18 = arith.constant 0.000000e+00 : f32
    %38 = vector.broadcast %cst_18 : f32 to vector<67x128xf32>
    %39 = arith.maximumf %37, %38 : vector<67x128xf32>
    %40 = arith.truncf %39 : vector<67x128xf32> to vector<67x128xbf16>
    %41 = vector.extract_strided_slice %40 {offsets = [0, 0], sizes = [1, 64], strides = [1, 1]} : vector<67x128xbf16> to vector<1x64xbf16>
    %42 = vector.extract_strided_slice %40 {offsets = [1, 0], sizes = [1, 64], strides = [1, 1]} : vector<67x128xbf16> to vector<1x64xbf16>
    %43 = vector.extract_strided_slice %40 {offsets = [2, 0], sizes = [1, 64], strides = [1, 1]} : vector<67x128xbf16> to vector<1x64xbf16>
    %44 = vector.extract_strided_slice %40 {offsets = [3, 0], sizes = [1, 64], strides = [1, 1]} : vector<67x128xbf16> to vector<1x64xbf16>
    %45 = vector.extract_strided_slice %40 {offsets = [4, 0], sizes = [1, 64], strides = [1, 1]} : vector<67x128xbf16> to vector<1x64xbf16>
    %46 = vector.extract_strided_slice %40 {offsets = [5, 0], sizes = [1, 64], strides = [1, 1]} : vector<67x128xbf16> to vector<1x64xbf16>
    %47 = vector.extract_strided_slice %40 {offsets = [6, 0], sizes = [1, 64], strides = [1, 1]} : vector<67x128xbf16> to vector<1x64xbf16>
    %48 = vector.extract_strided_slice %40 {offsets = [10, 0], sizes = [1, 64], strides = [1, 1]} : vector<67x128xbf16> to vector<1x64xbf16>
    %49 = vector.extract_strided_slice %40 {offsets = [11, 0], sizes = [1, 64], strides = [1, 1]} : vector<67x128xbf16> to vector<1x64xbf16>
    %50 = vector.extract_strided_slice %40 {offsets = [12, 0], sizes = [1, 64], strides = [1, 1]} : vector<67x128xbf16> to vector<1x64xbf16>
    %51 = vector.extract_strided_slice %40 {offsets = [13, 0], sizes = [1, 64], strides = [1, 1]} : vector<67x128xbf16> to vector<1x64xbf16>
    %52 = vector.extract_strided_slice %40 {offsets = [14, 0], sizes = [1, 64], strides = [1, 1]} : vector<67x128xbf16> to vector<1x64xbf16>
    %53 = vector.extract_strided_slice %40 {offsets = [15, 0], sizes = [1, 64], strides = [1, 1]} : vector<67x128xbf16> to vector<1x64xbf16>
    %54 = vector.extract_strided_slice %40 {offsets = [16, 0], sizes = [1, 64], strides = [1, 1]} : vector<67x128xbf16> to vector<1x64xbf16>
    %55 = vector.extract_strided_slice %40 {offsets = [20, 0], sizes = [1, 64], strides = [1, 1]} : vector<67x128xbf16> to vector<1x64xbf16>
    %56 = vector.extract_strided_slice %40 {offsets = [21, 0], sizes = [1, 64], strides = [1, 1]} : vector<67x128xbf16> to vector<1x64xbf16>
    %57 = vector.extract_strided_slice %40 {offsets = [22, 0], sizes = [1, 64], strides = [1, 1]} : vector<67x128xbf16> to vector<1x64xbf16>
    %58 = vector.extract_strided_slice %40 {offsets = [23, 0], sizes = [1, 64], strides = [1, 1]} : vector<67x128xbf16> to vector<1x64xbf16>
    %59 = vector.extract_strided_slice %40 {offsets = [24, 0], sizes = [1, 64], strides = [1, 1]} : vector<67x128xbf16> to vector<1x64xbf16>
    %60 = vector.extract_strided_slice %40 {offsets = [25, 0], sizes = [1, 64], strides = [1, 1]} : vector<67x128xbf16> to vector<1x64xbf16>
    %61 = vector.extract_strided_slice %40 {offsets = [26, 0], sizes = [1, 64], strides = [1, 1]} : vector<67x128xbf16> to vector<1x64xbf16>
    %62 = vector.extract_strided_slice %40 {offsets = [30, 0], sizes = [1, 64], strides = [1, 1]} : vector<67x128xbf16> to vector<1x64xbf16>
    %63 = vector.extract_strided_slice %40 {offsets = [31, 0], sizes = [1, 64], strides = [1, 1]} : vector<67x128xbf16> to vector<1x64xbf16>
    %64 = vector.extract_strided_slice %40 {offsets = [32, 0], sizes = [1, 64], strides = [1, 1]} : vector<67x128xbf16> to vector<1x64xbf16>
    %65 = vector.extract_strided_slice %40 {offsets = [33, 0], sizes = [1, 64], strides = [1, 1]} : vector<67x128xbf16> to vector<1x64xbf16>
    %66 = vector.extract_strided_slice %40 {offsets = [34, 0], sizes = [1, 64], strides = [1, 1]} : vector<67x128xbf16> to vector<1x64xbf16>
    %67 = vector.extract_strided_slice %40 {offsets = [35, 0], sizes = [1, 64], strides = [1, 1]} : vector<67x128xbf16> to vector<1x64xbf16>
    %68 = vector.extract_strided_slice %40 {offsets = [36, 0], sizes = [1, 64], strides = [1, 1]} : vector<67x128xbf16> to vector<1x64xbf16>
    %69 = vector.extract_strided_slice %40 {offsets = [40, 0], sizes = [1, 64], strides = [1, 1]} : vector<67x128xbf16> to vector<1x64xbf16>
    %70 = vector.extract_strided_slice %40 {offsets = [41, 0], sizes = [1, 64], strides = [1, 1]} : vector<67x128xbf16> to vector<1x64xbf16>
    %71 = vector.extract_strided_slice %40 {offsets = [42, 0], sizes = [1, 64], strides = [1, 1]} : vector<67x128xbf16> to vector<1x64xbf16>
    %72 = vector.extract_strided_slice %40 {offsets = [43, 0], sizes = [1, 64], strides = [1, 1]} : vector<67x128xbf16> to vector<1x64xbf16>
    %73 = vector.extract_strided_slice %40 {offsets = [44, 0], sizes = [1, 64], strides = [1, 1]} : vector<67x128xbf16> to vector<1x64xbf16>
    %74 = vector.extract_strided_slice %40 {offsets = [45, 0], sizes = [1, 64], strides = [1, 1]} : vector<67x128xbf16> to vector<1x64xbf16>
    %75 = vector.extract_strided_slice %40 {offsets = [46, 0], sizes = [1, 64], strides = [1, 1]} : vector<67x128xbf16> to vector<1x64xbf16>
    %76 = vector.extract_strided_slice %40 {offsets = [50, 0], sizes = [1, 64], strides = [1, 1]} : vector<67x128xbf16> to vector<1x64xbf16>
    %77 = vector.extract_strided_slice %40 {offsets = [51, 0], sizes = [1, 64], strides = [1, 1]} : vector<67x128xbf16> to vector<1x64xbf16>
    %78 = vector.extract_strided_slice %40 {offsets = [52, 0], sizes = [1, 64], strides = [1, 1]} : vector<67x128xbf16> to vector<1x64xbf16>
    %79 = vector.extract_strided_slice %40 {offsets = [53, 0], sizes = [1, 64], strides = [1, 1]} : vector<67x128xbf16> to vector<1x64xbf16>
    %80 = vector.extract_strided_slice %40 {offsets = [54, 0], sizes = [1, 64], strides = [1, 1]} : vector<67x128xbf16> to vector<1x64xbf16>
    %81 = vector.extract_strided_slice %40 {offsets = [55, 0], sizes = [1, 64], strides = [1, 1]} : vector<67x128xbf16> to vector<1x64xbf16>
    %82 = vector.extract_strided_slice %40 {offsets = [56, 0], sizes = [1, 64], strides = [1, 1]} : vector<67x128xbf16> to vector<1x64xbf16>
    %83 = vector.extract_strided_slice %40 {offsets = [60, 0], sizes = [1, 64], strides = [1, 1]} : vector<67x128xbf16> to vector<1x64xbf16>
    %84 = vector.extract_strided_slice %40 {offsets = [61, 0], sizes = [1, 64], strides = [1, 1]} : vector<67x128xbf16> to vector<1x64xbf16>
    %85 = vector.extract_strided_slice %40 {offsets = [62, 0], sizes = [1, 64], strides = [1, 1]} : vector<67x128xbf16> to vector<1x64xbf16>
    %86 = vector.extract_strided_slice %40 {offsets = [63, 0], sizes = [1, 64], strides = [1, 1]} : vector<67x128xbf16> to vector<1x64xbf16>
    %87 = vector.extract_strided_slice %40 {offsets = [64, 0], sizes = [1, 64], strides = [1, 1]} : vector<67x128xbf16> to vector<1x64xbf16>
    %88 = vector.extract_strided_slice %40 {offsets = [65, 0], sizes = [1, 64], strides = [1, 1]} : vector<67x128xbf16> to vector<1x64xbf16>
    %89 = vector.extract_strided_slice %40 {offsets = [66, 0], sizes = [1, 64], strides = [1, 1]} : vector<67x128xbf16> to vector<1x64xbf16>
    %90 = tpu.concatenate %41, %42, %43, %44, %45, %46, %47, %48, %49, %50, %51, %52, %53, %54, %55, %56 in 1 : vector<1x64xbf16>, vector<1x64xbf16>, vector<1x64xbf16>, vector<1x64xbf16>, vector<1x64xbf16>, vector<1x64xbf16>, vector<1x64xbf16>, vector<1x64xbf16>, vector<1x64xbf16>, vector<1x64xbf16>, vector<1x64xbf16>, vector<1x64xbf16>, vector<1x64xbf16>, vector<1x64xbf16>, vector<1x64xbf16>, vector<1x64xbf16> -> vector<1x1024xbf16>
    %91 = tpu.concatenate %57, %58, %59, %60, %61, %62, %63, %64, %65, %66, %67, %68, %69, %70, %71, %72 in 1 : vector<1x64xbf16>, vector<1x64xbf16>, vector<1x64xbf16>, vector<1x64xbf16>, vector<1x64xbf16>, vector<1x64xbf16>, vector<1x64xbf16>, vector<1x64xbf16>, vector<1x64xbf16>, vector<1x64xbf16>, vector<1x64xbf16>, vector<1x64xbf16>, vector<1x64xbf16>, vector<1x64xbf16>, vector<1x64xbf16>, vector<1x64xbf16> -> vector<1x1024xbf16>
    %92 = tpu.concatenate %73, %74, %75, %76, %77, %78, %79, %80, %81, %82, %83, %84, %85, %86, %87, %88 in 1 : vector<1x64xbf16>, vector<1x64xbf16>, vector<1x64xbf16>, vector<1x64xbf16>, vector<1x64xbf16>, vector<1x64xbf16>, vector<1x64xbf16>, vector<1x64xbf16>, vector<1x64xbf16>, vector<1x64xbf16>, vector<1x64xbf16>, vector<1x64xbf16>, vector<1x64xbf16>, vector<1x64xbf16>, vector<1x64xbf16>, vector<1x64xbf16> -> vector<1x1024xbf16>
    %93 = tpu.concatenate %90, %91, %92, %89 in 1 : vector<1x1024xbf16>, vector<1x1024xbf16>, vector<1x1024xbf16>, vector<1x64xbf16> -> vector<1x3136xbf16>
    %c0_19 = arith.constant 0 : index
    %c0_20 = arith.constant 0 : index
    %94 = vector.load %arg8[%c0_19, %c0_20] : memref<3136x512xbf16, #tpu.memory_space<vmem>>, vector<3136x512xbf16>
    %cst_21 = arith.constant dense<0.000000e+00> : vector<1x512xf32>
    %95 = tpu.matmul %93, %94, %cst_21 {dimension_numbers = #tpu.dot_dimension_numbers<[1], [0], [0], [1], [0, 0, 1, 1], [], []>} : vector<1x3136xbf16>, vector<3136x512xbf16>, vector<1x512xf32> -> vector<1x512xf32>
    %c0_22 = arith.constant 0 : index
    %c0_23 = arith.constant 0 : index
    %96 = vector.load %arg9[%c0_22, %c0_23] : memref<1x512xf32, #tpu.memory_space<vmem>>, vector<1x512xf32>
    %97 = arith.addf %95, %96 : vector<1x512xf32>
    %cst_24 = arith.constant 0.000000e+00 : f32
    %98 = vector.broadcast %cst_24 : f32 to vector<1x512xf32>
    %99 = arith.maximumf %97, %98 : vector<1x512xf32>
    %100 = arith.truncf %99 : vector<1x512xf32> to vector<1x512xbf16>
    %c0_25 = arith.constant 0 : index
    %c0_26 = arith.constant 0 : index
    %101 = vector.load %arg10[%c0_25, %c0_26] : memref<512x128xbf16, #tpu.memory_space<vmem>>, vector<512x128xbf16>
    %cst_27 = arith.constant dense<0.000000e+00> : vector<1x128xf32>
    %102 = tpu.matmul %100, %101, %cst_27 {dimension_numbers = #tpu.dot_dimension_numbers<[1], [0], [0], [1], [0, 0, 1, 1], [], []>} : vector<1x512xbf16>, vector<512x128xbf16>, vector<1x128xf32> -> vector<1x128xf32>
    %c0_28 = arith.constant 0 : index
    %c0_29 = arith.constant 0 : index
    %103 = vector.load %arg11[%c0_28, %c0_29] : memref<1x128xf32, #tpu.memory_space<vmem>>, vector<1x128xf32>
    %104 = arith.addf %102, %103 : vector<1x128xf32>
    %c0_30 = arith.constant 0 : index
    %c0_31 = arith.constant 0 : index
    %c0_32 = arith.constant 0 : index
    %105 = vector.load %arg12[%c0_30, %c0_31, %c0_32] : memref<1x1x128xf32, #tpu.memory_space<vmem>>, vector<1x1x128xf32>
    %106 = vector.shape_cast %105 : vector<1x1x128xf32> to vector<1x128xf32>
    %107 = vector.shape_cast %104 : vector<1x128xf32> to vector<1x1x128xf32>
    tpu.vector_store %arg12[%c0_30, %c0_31, %c0_32], %107 {strides = array<i32>} : memref<1x1x128xf32, #tpu.memory_space<vmem>>, vector<1x1x128xf32>,
    return
  }
  func.func @transform_0(%arg0: i32) -> (i32, i32, i32) {
    %c0_i32 = arith.constant 0 : i32
    %c0_i32_0 = arith.constant 0 : i32
    %c0_i32_1 = arith.constant 0 : i32
    return %arg0, %c0_i32, %c0_i32_0 : i32, i32, i32
  }
  func.func @transform_1(%arg0: i32) -> (i32, i32) {
    %c0_i32 = arith.constant 0 : i32
    %c0_i32_0 = arith.constant 0 : i32
    %c0_i32_1 = arith.constant 0 : i32
    return %c0_i32, %c0_i32_0 : i32, i32
  }
  func.func @transform_2(%arg0: i32) -> (i32, i32) {
    %c0_i32 = arith.constant 0 : i32
    %c0_i32_0 = arith.constant 0 : i32
    %c0_i32_1 = arith.constant 0 : i32
    return %c0_i32, %c0_i32_0 : i32, i32
  }
  func.func @transform_3(%arg0: i32) -> (i32, i32) {
    %c0_i32 = arith.constant 0 : i32
    %c0_i32_0 = arith.constant 0 : i32
    %c0_i32_1 = arith.constant 0 : i32
    return %c0_i32, %c0_i32_0 : i32, i32
  }
  func.func @transform_4(%arg0: i32) -> (i32, i32) {
    %c0_i32 = arith.constant 0 : i32
    %c0_i32_0 = arith.constant 0 : i32
    %c0_i32_1 = arith.constant 0 : i32
    return %c0_i32, %c0_i32_0 : i32, i32
  }
  func.func @transform_5(%arg0: i32) -> (i32, i32) {
    %c0_i32 = arith.constant 0 : i32
    %c0_i32_0 = arith.constant 0 : i32
    %c0_i32_1 = arith.constant 0 : i32
    return %c0_i32, %c0_i32_0 : i32, i32
  }
  func.func @transform_6(%arg0: i32) -> (i32, i32) {
    %c0_i32 = arith.constant 0 : i32
    %c0_i32_0 = arith.constant 0 : i32
    %c0_i32_1 = arith.constant 0 : i32
    return %c0_i32, %c0_i32_0 : i32, i32
  }
  func.func @transform_7(%arg0: i32) -> (i32, i32) {
    %c0_i32 = arith.constant 0 : i32
    %c0_i32_0 = arith.constant 0 : i32
    %c0_i32_1 = arith.constant 0 : i32
    return %c0_i32, %c0_i32_0 : i32, i32
  }
  func.func @transform_8(%arg0: i32) -> (i32, i32) {
    %c0_i32 = arith.constant 0 : i32
    %c0_i32_0 = arith.constant 0 : i32
    %c0_i32_1 = arith.constant 0 : i32
    return %c0_i32, %c0_i32_0 : i32, i32
  }
  func.func @transform_9(%arg0: i32) -> (i32, i32) {
    %c0_i32 = arith.constant 0 : i32
    %c0_i32_0 = arith.constant 0 : i32
    %c0_i32_1 = arith.constant 0 : i32
    return %c0_i32, %c0_i32_0 : i32, i32
  }
  func.func @transform_10(%arg0: i32) -> (i32, i32) {
    %c0_i32 = arith.constant 0 : i32
    %c0_i32_0 = arith.constant 0 : i32
    %c0_i32_1 = arith.constant 0 : i32
    return %c0_i32, %c0_i32_0 : i32, i32
  }
  func.func @transform_11(%arg0: i32) -> (i32, i32, i32) {
    %c0_i32 = arith.constant 0 : i32
    %c0_i32_0 = arith.constant 0 : i32
    %c0_i32_1 = arith.constant 0 : i32
    return %arg0, %c0_i32, %c0_i32_0 : i32, i32, i32
  }
}

</mosaic_0001>

<bundles_post_ra>
// kernel: qnetwork_forward.1
= control target key start
LH: loop header
LB: loop body
LE: loop exit
PB: predicated region body
PF: predicated region fallthrough
CT: control target
= control target key end

     0   :  { %16 = vsyncpa [#allocation3], 0  ;;  %s16925_s0 = inlined_call_operand.vmem [shape: bf16[2,100,1024], index: 0, kind: input, shape index: {}]   ;;  %s16926_s1 = inlined_call_operand.vmem [shape: bf16[1024,128], index: 1, kind: input, shape index: {}]   ;;  %s16927_s2 = inlined_call_operand.vmem [shape: f32[1,128], index: 2, kind: input, shape index: {}]   ;;  %s16928_s3 = inlined_call_operand.vmem [shape: bf16[512,128], index: 3, kind: input, shape index: {}]   ;;  %s16929_s4 = inlined_call_operand.vmem [shape: f32[1,128], index: 4, kind: input, shape index: {}]   ;;  %s16930_s5 = inlined_call_operand.vmem [shape: bf16[1152,128], index: 5, kind: input, shape index: {}]   ;;  %s16931_s6 = inlined_call_operand.vmem [shape: f32[1,128], index: 6, kind: input, shape index: {}]   ;;  %s16932_s7 = inlined_call_operand.vmem [shape: bf16[3136,512], index: 7, kind: input, shape index: {}]   ;;  %s16933_s8 = inlined_call_operand.vmem [shape: f32[1,512], index: 8, kind: input, shape index: {}]   ;;  %s16934_s9 = inlined_call_operand.vmem [shape: bf16[512,128], index: 9, kind: input, shape index: {}]   ;;  %s16935_s10 = inlined_call_operand.vmem [shape: f32[1,128], index: 10, kind: input, shape index: {}]   ;;  %s16936_s11 = inlined_call_operand.hbm [shape: f32[2,1,128], index: 11, kind: output, shape index: {}]  }
   0x1   :  { %18 = vsyncpa [#allocation3 + $0x1], 0  ;;  %s12955_s17 = smov 0   ;;  %s12957_s18 = smov 0  }
   0x2   :  { %s12959_s19 = smov 0   ;;  %s12961_s20 = smov 0  }
   0x3 LB: > { %s12976_s21 = sadd.s32 4294967295, %s12888_s20   ;;  %s9732_s22 = sadd.s32 4294967294, %s12888_s20   ;;  %s12888_s20 = sphi %s12961_s20, %s16954_s20   ;;  %s12884_s19 = sphi %s12959_s19, %s16953_s19   ;;  %s12880_s18 = sphi %s12957_s18, %s16952_s18   ;;  %s12876_s17 = sphi %s12955_s17, %s16951_s17  }
   0x4   : > { %s12980_s23 = sadd.s32 1, %s12888_s20   ;;  %s267_s24 = sadd.s32 1, %s12884_s19 }
   0x5   : > { %s264_s25 = ssub.s32 %s12888_s20, %s12980_s23  ;;  %p277_p0 = scmp.ne.s32.totalorder %s12884_s19, %s12880_s18 }
   0x6   : > { %p265_p1 = scmp.eq.s32.totalorder %s264_s25, 0  ;;  %p278_p2 = scmp.eq.s32.totalorder %s12976_s21, 1 }
   0x7   : > { %p283_p3 = scmp.ne.s32.totalorder %s12880_s18, %s12876_s17  ;;  %p284_p4 = scmp.eq.s32.totalorder %s9732_s22, 1 }
   0x8   : > { %s12991_s26 = scalar_select %p265_p1, %s12884_s19, %s267_s24  }
   0x9   : > { %p12993_p5 = por %p278_p2, %p277_p0  ;;  %p12997_p6 = por %p284_p4, %p283_p3 }
   0xa   : > { %16937 = sst [smem:[#allocation5_spill]] %s12991_s26  ;;  %p9735_p7 = scmp.ge.s32.totalorder %s12888_s20, 1 }
   0xb   : > { %p340_p8 = scmp.lt.s32.totalorder %s12888_s20, 3 }
   0xd   : > { %p341_p9 = pnand %p9735_p7, %p340_p8 }
   0xf   : > { %344 = sbr.rel (%p341_p9) target bundleno = 2114 (0x842), region = 64 }
  0x14   : > { %v11442_v0 = vld [vmem:[%s16926_s1 + $0x78] sm:$0xff]   ;;  %v11446_v4 = vld [vmem:[%s16926_s1 + $0x70] sm:$0xff]   ;;  %v11450_v8 = vld [vmem:[%s16926_s1 + $0x68] sm:$0xff]   ;;  %p379_p10 = scmp.lt.s32.totalorder %s12976_s21, 1  ;;  %vm1596_vm0 = vsmask.f32 7424 }
  0x15   : > { %v11443_v1 = vld [vmem:[%s16926_s1 + $0xf8] sm:$0xff]   ;;  %10785 = vmatprep.subr.bf16.mxu0 %v11442_v0  ;;  %v11447_v5 = vld [vmem:[%s16926_s1 + $0xf0] sm:$0xff]   ;;  %v11451_v9 = vld [vmem:[%s16926_s1 + $0xe8] sm:$0xff]   ;;  %vm1657_vm1 = vcmask 1042432   ;;  %vm1677_vm2 = vsmask.f32 2304 }
  0x16   : > { %v11444_v2 = vld [vmem:[%s16926_s1 + $0x38] sm:$0xff]   ;;  %10843 = vmatprep.subr.bf16.mxu1 %v11443_v1  ;;  %v11448_v6 = vld [vmem:[%s16926_s1 + $0x30] sm:$0xff]   ;;  %v11452_v10 = vld [vmem:[%s16926_s1 + $0x28] sm:$0xff]   ;;  %s380_s14 = scalar_select %p379_p10, %s12976_s21, 1  ;;  %vm2208_vm3 = vcmask 1046528   ;;  %vm2322_vm4 = vcmask 1044480  }
  0x17   : > { %v11445_v3 = vld [vmem:[%s16926_s1 + $0xb8] sm:$0xff]   ;;  %10786 = vmatpush3.bf16.msra.mxu0 %v11444_v2  ;;  %v11449_v7 = vld [vmem:[%s16926_s1 + $0xb0] sm:$0xff]   ;;  %v11453_v11 = vld [vmem:[%s16926_s1 + $0xa8] sm:$0xff]   ;;  %vm2292_vm5 = vsmask.f32 5376  ;;  %vm2261_vm6 = vcmask 1041408  }
  0x18   : > { %10844 = vmatpush3.bf16.msra.mxu1 %v11445_v3  ;;  %10787 = vmatprep.subr.bf16.mxu0 %v11446_v4  ;;  %v11454_v12 = vld [vmem:[%s16926_s1 + $0x60] sm:$0xff]   ;;  %v11458_v16 = vld [vmem:[%s16926_s1 + $0x58] sm:$0xff]   ;;  %v11462_v20 = vld [vmem:[%s16926_s1 + $0x50] sm:$0xff]   ;;  %s11398_s13 = smul.u32 416, %s380_s14  ;;  %vm2277_vm7 = vcmask 1045504   ;;  %vm12891_vm8 = vmmov 0  }
  0x19   : > { %10845 = vmatprep.subr.bf16.mxu1 %v11447_v5  ;;  %v11455_v13 = vld [vmem:[%s16926_s1 + $0xe0] sm:$0xff]   ;;  %v11459_v17 = vld [vmem:[%s16926_s1 + $0xd8] sm:$0xff]   ;;  %v11463_v21 = vld [vmem:[%s16926_s1 + $0xd0] sm:$0xff]   ;;  %vm3331_vm9 = vcmask 523264   ;;  %s377_s24 = sand.u32 1, %s12880_s18   ;;  %s10782_s25 = sshll.u32 %s12976_s21, 4 }
  0x1a   : > { %v11456_v14 = vld [vmem:[%s16926_s1 + $0x20] sm:$0xff]   ;;  %v11460_v18 = vld [vmem:[%s16926_s1 + $0x18] sm:$0xff]   ;;  %v11464_v22 = vld [vmem:[%s16926_s1 + $0x10] sm:$0xff]   ;;  %s13098_s26 = scalar_lea.vmem %s16925_s0, %s11398_s13  ;;  %s12892_s13 = smov 64  }
  0x1b   : > { %10788 = vmatpush3.bf16.msra.mxu0 %v11448_v6  ;;  %v11457_v15 = vld [vmem:[%s16926_s1 + $0xa0] sm:$0xff]   ;;  %v11461_v19 = vld [vmem:[%s16926_s1 + $0x98] sm:$0xff]   ;;  %v11465_v23 = vld [vmem:[%s16926_s1 + $0x90] sm:$0xff]   ;;  %s378_s29 = scalar_lea.vmem [#allocation2], %s377_s24  ;;  %s16890_s15 = scalar_lea.hbm %s16936_s11, %s10782_s25 }
  0x1c   : > { %10846 = vmatpush3.bf16.msra.mxu1 %v11449_v7  ;;  %10789 = vmatprep.subr.bf16.mxu0 %v11450_v8  ;;  %v11466_v24 = vld [vmem:[%s16926_s1 + $0x48] sm:$0xff]   ;;  %v11470_v28 = vld [vmem:[%s16926_s1 + $0x40] sm:$0xff]   ;;  %v11474_v40 = vld [vmem:[%s16926_s1 + $0x178] sm:$0xff]   ;;  %s9677_s30 = sshll.u32 %s378_s29, 4  ;;  %s9665_s16 = scalar_lea.sflag [#allocation3], %s377_s24  ;;  %s9678_s30 = int_to_ptr.vmem [resolvable:$true] %s9677_s30 }
  0x1d   : > { %10847 = vmatprep.subr.bf16.mxu1 %v11451_v9  ;;  %v11467_v25 = vld [vmem:[%s16926_s1 + $0xc8] sm:$0xff]   ;;  %v11471_v29 = vld [vmem:[%s16926_s1 + $0xc0] sm:$0xff]   ;;  %v11475_v41 = vld [vmem:[%s16926_s1 + $0x138] sm:$0xff]   ;;  %s12828_s22 = scalar_lea.vmem %s9678_s30, 16  ;;  %s12894_s21 = smov [#allocation2]  }
  0x1e   : > { %v11468_v26 = vld [vmem:[%s16926_s1 + $0x8] sm:$0xff]   ;;  %v11472_v30 = vld [vmem:[%s16926_s1] sm:$0xff]   ;;  %v11476_v42 = vld [vmem:[%s16926_s1 + $0x1f8] sm:$0xff]   ;;  %p12829_p11 = scmp.ne.s32.totalorder %s9678_s30, %s12828_s22 }
  0x1f   : > { %10790 = vmatpush3.bf16.msra.mxu0 %v11452_v10  ;;  %v11469_v27 = vld [vmem:[%s16926_s1 + $0x88] sm:$0xff]   ;;  %v11473_v31 = vld [vmem:[%s16926_s1 + $0x80] sm:$0xff]   ;;  %v11477_v43 = vld [vmem:[%s16926_s1 + $0x1b8] sm:$0xff]  }
  0x20   : > { %10848 = vmatpush3.bf16.msra.mxu1 %v11453_v11  ;;  %10791 = vmatprep.subr.bf16.mxu0 %v11454_v12  ;;  %v385_v32 = vld [vmem:[%s13098_s26] sm:$0xff]  ;;  %v386_v34 = vld [vmem:[%s13098_s26 + $0x8] sm:$0xff]  ;;  %v11478_v50 = vld [vmem:[%s16926_s1 + $0x170] sm:$0xff]   ;;  %p12830_p12 = pnand %p12829_p11, %p12993_p5 }
  0x21   : > { %10849 = vmatprep.subr.bf16.mxu1 %v11455_v13  ;;  %v389_v33 = vld [vmem:[%s13098_s26 + $0x20] sm:$0xff]  ;;  %v390_v37 = vld [vmem:[%s13098_s26 + $0x28] sm:$0xff]  ;;  %v11479_v52 = vld [vmem:[%s16926_s1 + $0x130] sm:$0xff]  }
  0x22   : > { %v9738_v35 = vcombine.low %v385_v32, %v389_v33  ;;  %v9739_v36 = vcombine.high %v385_v32, %v389_v33  ;;  %v9740_v38 = vcombine.low %v386_v34, %v390_v37  ;;  %v9741_v39 = vcombine.high %v386_v34, %v390_v37  ;;  %v393_v44 = vld [vmem:[%s13098_s26 + $0x40] sm:$0xff]  ;;  %v394_v47 = vld [vmem:[%s13098_s26 + $0x48] sm:$0xff]  ;;  %v11480_v54 = vld [vmem:[%s16926_s1 + $0x1f0] sm:$0xff]   ;;  %p12831_p13 = pneg %p12830_p12 }
  0x23   : > { %10792 = vmatpush3.bf16.msra.mxu0 %v11456_v14  ;;  %v397_v45 = vld [vmem:[%s13098_s26 + $0x60] sm:$0xff]  ;;  %v398_v48 = vld [vmem:[%s13098_s26 + $0x68] sm:$0xff]  ;;  %v11481_v55 = vld [vmem:[%s16926_s1 + $0x1b0] sm:$0xff]  }
  0x24   : > { %10850 = vmatpush3.bf16.msra.mxu1 %v11457_v15  ;;  %10793 = vmatprep.subr.bf16.mxu0 %v11458_v16  ;;  %v9747_v46 = vcombine.high %v393_v44, %v397_v45  ;;  %v9749_v49 = vcombine.high %v394_v47, %v398_v48  ;;  %v9746_v51 = vcombine.low %v393_v44, %v397_v45  ;;  %v11482_v56 = vld [vmem:[%s16926_s1 + $0x168] sm:$0xff]   ;;  %v401_v57 = vld [vmem:[%s13098_s26 + $0x80] sm:$0xff]  ;;  %v11490_v14 = vld [vmem:[%s16926_s1 + $0x158] sm:$0xff]  }
  0x25   : > { %10851 = vmatprep.subr.bf16.mxu1 %v11459_v17  ;;  %1256 = vmatprep.mubr.bf16.mxu0 %v9739_v36  ;;  %v9748_v53 = vcombine.low %v394_v47, %v398_v48  ;;  %v405_v58 = vld [vmem:[%s13098_s26 + $0xa0] sm:$0xff]  ;;  %v402_v59 = vld [vmem:[%s13098_s26 + $0x88] sm:$0xff]  ;;  %v11491_v15 = vld [vmem:[%s16926_s1 + $0x118] sm:$0xff]  }
  0x26   : > { %1344 = vmatprep.mubr.bf16.mxu1 %v9741_v39  ;;  %v406_v60 = vld [vmem:[%s13098_s26 + $0xa8] sm:$0xff]  ;;  %v9755_v61 = vcombine.high %v401_v57, %v405_v58  ;;  %v9754_v2 = vcombine.low %v401_v57, %v405_v58  ;;  %v11486_v3 = vld [vmem:[%s16926_s1 + $0x160] sm:$0xff]   ;;  %v11492_v17 = vld [vmem:[%s16926_s1 + $0x1d8] sm:$0xff]  }
  0x27   : > { %10794 = vmatpush3.bf16.msra.mxu0 %v11460_v18  ;;  %v9757_v62 = vcombine.high %v402_v59, %v406_v60  ;;  %v11483_v63 = vld [vmem:[%s16926_s1 + $0x128] sm:$0xff]   ;;  %v9756_v4 = vcombine.low %v402_v59, %v406_v60  ;;  %v11487_v5 = vld [vmem:[%s16926_s1 + $0x120] sm:$0xff]   ;;  %v395_v60 = vld [vmem:[%s13098_s26 + $0x50] sm:$0xff] }
  0x28   : > { %10852 = vmatpush3.bf16.msra.mxu1 %v11461_v19  ;;  %10795 = vmatprep.subr.bf16.mxu0 %v11462_v20  ;;  %v11484_v0 = vld [vmem:[%s16926_s1 + $0x1e8] sm:$0xff]   ;;  %v409_v6 = vld [vmem:[%s13098_s26 + $0xc0] sm:$0xff] }
  0x29   : > { %10853 = vmatprep.subr.bf16.mxu1 %v11463_v21  ;;  %v11485_v1 = vld [vmem:[%s16926_s1 + $0x1a8] sm:$0xff]   ;;  %v413_v7 = vld [vmem:[%s13098_s26 + $0xe0] sm:$0xff] }
  0x2a   : > { %v410_v8 = vld [vmem:[%s13098_s26 + $0xc8] sm:$0xff]  ;;  %v9763_v9 = vcombine.high %v409_v6, %v413_v7  ;;  %v11488_v12 = vld [vmem:[%s16926_s1 + $0x1e0] sm:$0xff]   ;;  %v9762_v16 = vcombine.low %v409_v6, %v413_v7  ;;  %v404_v6 = vld [vmem:[%s13098_s26 + $0x98] sm:$0xff] }
  0x2b   : > { %10796 = vmatpush3.bf16.msra.mxu0 %v11464_v22  ;;  %v414_v10 = vld [vmem:[%s13098_s26 + $0xe8] sm:$0xff]  ;;  %v11489_v13 = vld [vmem:[%s16926_s1 + $0x1a0] sm:$0xff]   ;;  %v408_v7 = vld [vmem:[%s13098_s26 + $0xb8] sm:$0xff] }
  0x2c   : > { %10854 = vmatpush3.bf16.msra.mxu1 %v11465_v23  ;;  %10797 = vmatprep.subr.bf16.mxu0 %v11466_v24  ;;  %v9765_v11 = vcombine.high %v410_v8, %v414_v10  ;;  %v417_v18 = vld [vmem:[%s13098_s26 + $0x100] sm:$0xff]  ;;  %v9764_v20 = vcombine.low %v410_v8, %v414_v10  ;;  %v418_v22 = vld [vmem:[%s13098_s26 + $0x108] sm:$0xff] }
  0x2d   : > { %10855 = vmatprep.subr.bf16.mxu1 %v11467_v25  ;;  %v421_v19 = vld [vmem:[%s13098_s26 + $0x120] sm:$0xff]  ;;  %v422_v23 = vld [vmem:[%s13098_s26 + $0x128] sm:$0xff]  ;;  %v11493_v25 = vld [vmem:[%s16926_s1 + $0x198] sm:$0xff]  }
  0x2e   : > { %v9771_v21 = vcombine.high %v417_v18, %v421_v19  ;;  %v9773_v24 = vcombine.high %v418_v22, %v422_v23  ;;  %v426_v32 = vld [vmem:[%s13098_s26 + $0x148] sm:$0xff]  ;;  %v9770_v34 = vcombine.low %v417_v18, %v421_v19  ;;  %v9772_v36 = vcombine.low %v418_v22, %v422_v23  ;;  %v11506_v44 = vld [vmem:[%s16926_s1 + $0x140] sm:$0xff]   ;;  %v420_v22 = vld [vmem:[%s13098_s26 + $0x118] sm:$0xff] }
  0x2f   : > { %10798 = vmatpush3.bf16.msra.mxu0 %v11468_v26  ;;  %v11494_v26 = vld [vmem:[%s16926_s1 + $0x150] sm:$0xff]   ;;  %v430_v33 = vld [vmem:[%s13098_s26 + $0x168] sm:$0xff]  ;;  %v11507_v45 = vld [vmem:[%s16926_s1 + $0x100] sm:$0xff]  }
  0x30   : > { %10856 = vmatpush3.bf16.msra.mxu1 %v11469_v27  ;;  %10799 = vmatprep.subr.bf16.mxu0 %v11470_v28  ;;  %v11495_v27 = vld [vmem:[%s16926_s1 + $0x110] sm:$0xff]   ;;  %v9781_v39 = vcombine.high %v426_v32, %v430_v33  ;;  %v11509_v48 = vld [vmem:[%s16926_s1 + $0x180] sm:$0xff]   ;;  %v424_v23 = vld [vmem:[%s13098_s26 + $0x138] sm:$0xff] }
  0x31   : > { %10857 = vmatprep.subr.bf16.mxu1 %v11471_v29  ;;  %v11496_v28 = vld [vmem:[%s16926_s1 + $0x1d0] sm:$0xff]  }
  0x32   : > { %v11497_v29 = vld [vmem:[%s16926_s1 + $0x190] sm:$0xff]  }
  0x33   : > { %10800 = vmatpush3.bf16.msra.mxu0 %v11472_v30  ;;  %v425_v30 = vld [vmem:[%s13098_s26 + $0x140] sm:$0xff] }
  0x34   : > { %10858 = vmatpush3.bf16.msra.mxu1 %v11473_v31  ;;  %10901 = vmatprep.subr.bf16.mxu0 %v11474_v40  ;;  %v429_v31 = vld [vmem:[%s13098_s26 + $0x160] sm:$0xff]  ;;  %v11500_v40 = vld [vmem:[%s16926_s1 + $0x1c8] sm:$0xff]  }
  0x35   : > { %10959 = vmatprep.subr.bf16.mxu1 %v11476_v42  ;;  %v9779_v37 = vcombine.high %v425_v30, %v429_v31  ;;  %v433_v42 = vld [vmem:[%s13098_s26 + $0x180] sm:$0x33]  ;;  %v9778_v47 = vcombine.low %v425_v30, %v429_v31  ;;  %v428_v30 = vld [vmem:[%s13098_s26 + $0x158] sm:$0xff] }
  0x36   : > { %1257 = vmatmul.mubr.bf16.vlgmr.msra.gmra.mxu0 %v9738_v35  ;;  %v11498_v35 = vld [vmem:[%s16926_s1 + $0x148] sm:$0xff]   ;;  %v432_v31 = vld [vmem:[%s13098_s26 + $0x178] sm:$0xff] }
  0x37   : > { %1345 = vmatmul.mubr.bf16.vlgmr.msra.gmra.mxu1 %v9740_v38  ;;  %10902 = vmatpush3.bf16.msra.mxu0 %v11475_v41  ;;  %v11499_v38 = vld [vmem:[%s16926_s1 + $0x108] sm:$0xff]  }
  0x38   : > { %10960 = vmatpush3.bf16.msra.mxu1 %v11477_v43  ;;  %1264 = vmatprep.mubr.bf16.mxu0 %v9747_v46  ;;  %v11501_v41 = vld [vmem:[%s16926_s1 + $0x188] sm:$0xff]   ;;  %v11508_v46 = vld [vmem:[%s16926_s1 + $0x1c0] sm:$0xff]  }
  0x39   : > { %1352 = vmatprep.mubr.bf16.mxu1 %v9749_v49  ;;  %10903 = vmatprep.subr.bf16.mxu0 %v11478_v50  ;;  %v434_v43 = vld [vmem:[%s13098_s26 + $0x188] sm:$0x33]  ;;  %v9780_v49 = vcombine.low %v426_v32, %v430_v33  ;;  %v9787_v50 = vcombine.high %v433_v42, %v433_v42  ;;  %v9776_v33 = vcombine.low %v420_v22, %v424_v23 }
  0x3a   : > { %10961 = vmatprep.subr.bf16.mxu1 %v11480_v54  ;;  %v388_v54 = vld [vmem:[%s13098_s26 + $0x18] sm:$0xff]  ;;  %v9788_v57 = vcombine.low %v434_v43, %v434_v43 }
  0x3b   : > { %10904 = vmatpush3.bf16.msra.mxu0 %v11479_v52  ;;  %v387_v52 = vld [vmem:[%s13098_s26 + $0x10] sm:$0xff] }
  0x3c   : > { %10962 = vmatpush3.bf16.msra.mxu1 %v11481_v55  ;;  %10905 = vmatprep.subr.bf16.mxu0 %v11482_v56  ;;  %v392_v55 = vld [vmem:[%s13098_s26 + $0x38] sm:$0xff]  ;;  %v9786_v56 = vcombine.low %v433_v42, %v433_v42 }
  0x3d   : > { %10963 = vmatprep.subr.bf16.mxu1 %v11484_v0  ;;  %v9745_v59 = vcombine.high %v388_v54, %v392_v55  ;;  %v11514_v42 = vld [vmem:[%s16928_s3 + $0x78] sm:$0xff]  }
  0x3e   : > { %1265 = vmatmul.mubr.bf16.gmra.mxu0 %v9746_v51  ;;  %v9789_v51 = vcombine.high %v434_v43, %v434_v43  ;;  %v11515_v43 = vld [vmem:[%s16928_s3 + $0x38] sm:$0xff]  }
  0x3f   : > { %1353 = vmatmul.mubr.bf16.gmra.mxu1 %v9748_v53  ;;  %1272 = vmatprep.mubr.bf16.mxu0 %v9755_v61  ;;  %v391_v53 = vld [vmem:[%s13098_s26 + $0x30] sm:$0xff] }
  0x40   : > { %1360 = vmatprep.mubr.bf16.mxu1 %v9757_v62  ;;  %10906 = vmatpush3.bf16.msra.mxu0 %v11483_v63  ;;  %v9743_v58 = vcombine.high %v387_v52, %v391_v53  ;;  %v399_v61 = vld [vmem:[%s13098_s26 + $0x70] sm:$0xff]  ;;  %v396_v62 = vld [vmem:[%s13098_s26 + $0x58] sm:$0xff]  ;;  %v9742_v0 = vcombine.low %v387_v52, %v391_v53  ;;  %v11522_v52 = vld [vmem:[%s16928_s3 + $0x68] sm:$0xff]  }
  0x41   : > { %10964 = vmatpush3.bf16.msra.mxu1 %v11485_v1  ;;  %10907 = vmatprep.subr.bf16.mxu0 %v11486_v3  ;;  %v400_v63 = vld [vmem:[%s13098_s26 + $0x78] sm:$0xff]  ;;  %v9744_v1 = vcombine.low %v388_v54, %v392_v55  ;;  %v9750_v8 = vcombine.low %v395_v60, %v399_v61  ;;  %v11523_v53 = vld [vmem:[%s16928_s3 + $0x28] sm:$0xff]  }
  0x42   : > { %10965 = vmatprep.subr.bf16.mxu1 %v11488_v12  ;;  %v9753_v3 = vcombine.high %v396_v62, %v400_v63  ;;  %v411_v12 = vld [vmem:[%s13098_s26 + $0xd0] sm:$0xff]  ;;  %v11524_v54 = vld [vmem:[%s16928_s3 + $0xe8] sm:$0xff]  }
  0x43   : > { %v11525_v55 = vld [vmem:[%s16928_s3 + $0xa8] sm:$0xff]  }
  0x44   : > { %10908 = vmatpush3.bf16.msra.mxu0 %v11487_v5  ;;  %v407_v5 = vld [vmem:[%s13098_s26 + $0xb0] sm:$0xff] }
  0x45   : > { %10966 = vmatpush3.bf16.msra.mxu1 %v11489_v13  ;;  %10909 = vmatprep.subr.bf16.mxu0 %v11490_v14  ;;  %v415_v13 = vld [vmem:[%s13098_s26 + $0xf0] sm:$0xff]  ;;  %v412_v14 = vld [vmem:[%s13098_s26 + $0xd8] sm:$0xff] }
  0x46   : > { %1273 = vmatmul.mubr.bf16.gmra.mxu0 %v9754_v2  ;;  %10967 = vmatprep.subr.bf16.mxu1 %v11492_v17  ;;  %v9751_v2 = vcombine.high %v395_v60, %v399_v61  ;;  %v9760_v17 = vcombine.low %v404_v6, %v408_v7  ;;  %v9767_v18 = vcombine.high %v411_v12, %v415_v13  ;;  %v11530_v60 = vld [vmem:[%s16928_s3 + $0x58] sm:$0xff]  }
  0x47   : > { %1361 = vmatmul.mubr.bf16.gmra.mxu1 %v9756_v4  ;;  %1280 = vmatprep.mubr.bf16.mxu0 %v9763_v9  ;;  %v403_v4 = vld [vmem:[%s13098_s26 + $0x90] sm:$0xff]  ;;  %v9752_v9 = vcombine.low %v396_v62, %v400_v63  ;;  %v11531_v61 = vld [vmem:[%s16928_s3 + $0x18] sm:$0xff]  }
  0x48   : > { %1368 = vmatprep.mubr.bf16.mxu1 %v9765_v11  ;;  %10910 = vmatpush3.bf16.msra.mxu0 %v11491_v15  ;;  %v9759_v10 = vcombine.high %v403_v4, %v407_v5  ;;  %v9761_v11 = vcombine.high %v404_v6, %v408_v7  ;;  %v416_v15 = vld [vmem:[%s13098_s26 + $0xf8] sm:$0xff]  ;;  %v11540_v6 = vld [vmem:[%s16928_s3 + $0xc8] sm:$0xff]  }
  0x49   : > { %10968 = vmatpush3.bf16.msra.mxu1 %v11493_v25  ;;  %10911 = vmatprep.subr.bf16.mxu0 %v11494_v26  ;;  %v9769_v19 = vcombine.high %v412_v14, %v416_v15  ;;  %v9768_v25 = vcombine.low %v412_v14, %v416_v15  ;;  %v11532_v62 = vld [vmem:[%s16928_s3 + $0xd8] sm:$0xff]   ;;  %v11541_v7 = vld [vmem:[%s16928_s3 + $0x88] sm:$0xff]   ;;  %v13353_v14 = vld [vmem:[%s16927_s2] ss:$0 sm:$0xff] }
  0x4a   : > { %10969 = vmatprep.subr.bf16.mxu1 %v11496_v28  ;;  %v427_v28 = vld [vmem:[%s13098_s26 + $0x150] sm:$0xff]  ;;  %v11533_v63 = vld [vmem:[%s16928_s3 + $0x98] sm:$0xff]  }
  0x4c   : > { %10912 = vmatpush3.bf16.msra.mxu0 %v11495_v27  ;;  %v9777_v27 = vcombine.high %v420_v22, %v424_v23 }
  0x4d   : > { %10970 = vmatpush3.bf16.msra.mxu1 %v11497_v29  ;;  %10913 = vmatprep.subr.bf16.mxu0 %v11498_v35  ;;  %v431_v29 = vld [vmem:[%s13098_s26 + $0x170] sm:$0xff]  ;;  %v9785_v35 = vcombine.high %v428_v30, %v432_v31 }
  0x4e   : > { %1281 = vmatmul.mubr.bf16.gmra.mxu0 %v9762_v16  ;;  %10971 = vmatprep.subr.bf16.mxu1 %v11500_v40  ;;  %v9758_v16 = vcombine.low %v403_v4, %v407_v5  ;;  %v11538_v4 = vld [vmem:[%s16928_s3 + $0x48] sm:$0xff]  }
  0x4f   : > { %1369 = vmatmul.mubr.bf16.gmra.mxu1 %v9764_v20  ;;  %1288 = vmatprep.mubr.bf16.mxu0 %v9771_v21  ;;  %v419_v20 = vld [vmem:[%s13098_s26 + $0x110] sm:$0xff]  ;;  %v11539_v5 = vld [vmem:[%s16928_s3 + $0x8] sm:$0xff]  }
  0x50   : > { %1376 = vmatprep.mubr.bf16.mxu1 %v9773_v24  ;;  %10914 = vmatpush3.bf16.msra.mxu0 %v11499_v38  ;;  %v423_v21 = vld [vmem:[%s13098_s26 + $0x130] sm:$0xff]  ;;  %v9766_v24 = vcombine.low %v411_v12, %v415_v13  ;;  %v9782_v38 = vcombine.low %v427_v28, %v431_v29 }
  0x51   : > { %10972 = vmatpush3.bf16.msra.mxu1 %v11501_v41  ;;  %10915 = vmatprep.subr.bf16.mxu0 %v11506_v44  ;;  %v9775_v26 = vcombine.high %v419_v20, %v423_v21  ;;  %v9774_v32 = vcombine.low %v419_v20, %v423_v21  ;;  %v11516_v44 = vld [vmem:[%s16928_s3 + $0xf8] sm:$0xff]  }
  0x52   : > { %10973 = vmatprep.subr.bf16.mxu1 %v11508_v46  ;;  %v11552_v20 = vld [vmem:[%s16930_s5 + $0xf8] sm:$0xff]  }
  0x54   : > { %10916 = vmatpush3.bf16.msra.mxu0 %v11507_v45 }
  0x55   : > { %10974 = vmatpush3.bf16.msra.mxu1 %v11509_v48  ;;  %11017 = vmatprep.subr.bf16.mxu0 %v11514_v42  ;;  %v11518_v48 = vld [vmem:[%s16928_s3 + $0x70] sm:$0xff]  }
  0x56   : > { %1289 = vmatmul.mubr.bf16.gmra.mxu0 %v9770_v34  ;;  %v9783_v34 = vcombine.high %v427_v28, %v431_v29  ;;  %11069 = vmatprep.subr.bf16.mxu1 %v11516_v44 }
  0x57   : > { %1377 = vmatmul.mubr.bf16.gmra.mxu1 %v9772_v36  ;;  %1296 = vmatprep.mubr.bf16.mxu0 %v9779_v37  ;;  %v435_v36 = vld [vmem:[%s13098_s26 + $0x190] sm:$0x33]  ;;  %v436_v37 = vld [vmem:[%s13098_s26 + $0x198] sm:$0x33]  ;;  %s12832_s26 = sshll.u32 %s12894_s21, 4  ;;  %s12833_s26 = int_to_ptr.vmem [resolvable:$false] %s12832_s26 }
  0x58   : > { %1384 = vmatprep.mubr.bf16.mxu1 %v9781_v39  ;;  %v9784_v39 = vcombine.low %v428_v30, %v432_v31  ;;  %v9791_v40 = vcombine.high %v435_v36, %v435_v36  ;;  %v9793_v41 = vcombine.high %v436_v37, %v436_v37  ;;  %v9790_v45 = vcombine.low %v435_v36, %v435_v36  ;;  %p12835_p0 = scmp.lt.s32.totalorder %s9678_s30, %s12833_s26 }
  0x59   : > { %v9792_v46 = vcombine.low %v436_v37, %v436_v37 }
  0x5e   : > { %1297 = vmatmul.mubr.bf16.gmra.mxu0 %v9778_v47  ;;  %v11517_v47 = vld [vmem:[%s16928_s3 + $0xb8] sm:$0xff]  }
  0x5f   : > { %1385 = vmatmul.mubr.bf16.gmra.mxu1 %v9780_v49  ;;  %1304 = vmatprep.mubr.bf16.mxu0 %v9787_v50  ;;  %v11519_v49 = vld [vmem:[%s16928_s3 + $0x30] sm:$0xff]  }
  0x60   : > { %1392 = vmatprep.mubr.bf16.mxu1 %v9789_v51  ;;  %v11520_v50 = vld [vmem:[%s16928_s3 + $0xf0] sm:$0xff]  }
  0x61   : > { %v11521_v51 = vld [vmem:[%s16928_s3 + $0xb0] sm:$0xff]  }
  0x66   : > { %1305 = vmatmul.mubr.bf16.gmra.mxu0 %v9786_v56  ;;  %v11526_v56 = vld [vmem:[%s16928_s3 + $0x60] sm:$0xff]  }
  0x67   : > { %1393 = vmatmul.mubr.bf16.gmra.mxu1 %v9788_v57  ;;  %1432 = vmatprep.mubr.bf16.mxu0 %v9743_v58  ;;  %v11527_v57 = vld [vmem:[%s16928_s3 + $0x20] sm:$0xff]  }
  0x68   : > { %1520 = vmatprep.mubr.bf16.mxu1 %v9745_v59  ;;  %v11528_v58 = vld [vmem:[%s16928_s3 + $0xe0] sm:$0xff]  }
  0x69   : > { %v11529_v59 = vld [vmem:[%s16928_s3 + $0xa0] sm:$0xff]  }
  0x6e   : > { %1433 = vmatmul.mubr.bf16.vlgmr.msra.gmra.mxu0 %v9742_v0  ;;  %v11534_v0 = vld [vmem:[%s16928_s3 + $0x50] sm:$0xff]  }
  0x6f   : > { %1521 = vmatmul.mubr.bf16.vlgmr.msra.gmra.mxu1 %v9744_v1  ;;  %1440 = vmatprep.mubr.bf16.mxu0 %v9751_v2  ;;  %v11535_v1 = vld [vmem:[%s16928_s3 + $0x10] sm:$0xff]  }
  0x70   : > { %1528 = vmatprep.mubr.bf16.mxu1 %v9753_v3  ;;  %11018 = vmatpush3.bf16.msra.mxu0 %v11515_v43  ;;  %v11536_v2 = vld [vmem:[%s16928_s3 + $0xd0] sm:$0xff]  }
  0x71   : > { %11070 = vmatpush3.bf16.msra.mxu1 %v11517_v47  ;;  %11019 = vmatprep.subr.bf16.mxu0 %v11518_v48  ;;  %v11537_v3 = vld [vmem:[%s16928_s3 + $0x90] sm:$0xff]  }
  0x72   : > { %11071 = vmatprep.subr.bf16.mxu1 %v11520_v50 }
  0x74   : > { %11020 = vmatpush3.bf16.msra.mxu0 %v11519_v49 }
  0x75   : > { %11072 = vmatpush3.bf16.msra.mxu1 %v11521_v51  ;;  %11021 = vmatprep.subr.bf16.mxu0 %v11522_v52 }
  0x76   : > { %1441 = vmatmul.mubr.bf16.gmra.mxu0 %v9750_v8  ;;  %11073 = vmatprep.subr.bf16.mxu1 %v11524_v54  ;;  %v11542_v8 = vld [vmem:[%s16928_s3 + $0x40] sm:$0xff]  }
  0x77   : > { %1529 = vmatmul.mubr.bf16.gmra.mxu1 %v9752_v9  ;;  %1448 = vmatprep.mubr.bf16.mxu0 %v9759_v10  ;;  %v11543_v9 = vld [vmem:[%s16928_s3] sm:$0xff]  }
  0x78   : > { %1536 = vmatprep.mubr.bf16.mxu1 %v9761_v11  ;;  %11022 = vmatpush3.bf16.msra.mxu0 %v11523_v53  ;;  %v11544_v10 = vld [vmem:[%s16928_s3 + $0xc0] sm:$0xff]  }
  0x79   : > { %11074 = vmatpush3.bf16.msra.mxu1 %v11525_v55  ;;  %11023 = vmatprep.subr.bf16.mxu0 %v11526_v56  ;;  %v11545_v11 = vld [vmem:[%s16928_s3 + $0x80] sm:$0xff]  }
  0x7a   : > { %11075 = vmatprep.subr.bf16.mxu1 %v11528_v58 }
  0x7c   : > { %11024 = vmatpush3.bf16.msra.mxu0 %v11527_v57 }
  0x7d   : > { %11076 = vmatpush3.bf16.msra.mxu1 %v11529_v59  ;;  %11025 = vmatprep.subr.bf16.mxu0 %v11530_v60 }
  0x7e   : > { %1449 = vmatmul.mubr.bf16.gmra.mxu0 %v9758_v16  ;;  %11077 = vmatprep.subr.bf16.mxu1 %v11532_v62  ;;  %v11546_v16 = vld [vmem:[%s16930_s5 + $0x78] sm:$0xff]  }
  0x7f   : > { %1537 = vmatmul.mubr.bf16.gmra.mxu1 %v9760_v17  ;;  %1456 = vmatprep.mubr.bf16.mxu0 %v9767_v18 }
  0x80   : > { %1544 = vmatprep.mubr.bf16.mxu1 %v9769_v19  ;;  %11026 = vmatpush3.bf16.msra.mxu0 %v11531_v61 }
  0x81   : > { %11078 = vmatpush3.bf16.msra.mxu1 %v11533_v63  ;;  %11027 = vmatprep.subr.bf16.mxu0 %v11534_v0 }
  0x82   : > { %11079 = vmatprep.subr.bf16.mxu1 %v11536_v2 }
  0x84   : > { %11028 = vmatpush3.bf16.msra.mxu0 %v11535_v1 }
  0x85   : > { %11080 = vmatpush3.bf16.msra.mxu1 %v11537_v3  ;;  %11029 = vmatprep.subr.bf16.mxu0 %v11538_v4 }
  0x86   : > { %1457 = vmatmul.mubr.bf16.gmra.mxu0 %v9766_v24  ;;  %11081 = vmatprep.subr.bf16.mxu1 %v11540_v6 }
  0x87   : > { %1545 = vmatmul.mubr.bf16.gmra.mxu1 %v9768_v25  ;;  %1464 = vmatprep.mubr.bf16.mxu0 %v9775_v26 }
  0x88   : > { %1552 = vmatprep.mubr.bf16.mxu1 %v9777_v27  ;;  %11030 = vmatpush3.bf16.msra.mxu0 %v11539_v5 }
  0x89   : > { %11082 = vmatpush3.bf16.msra.mxu1 %v11541_v7  ;;  %11031 = vmatprep.subr.bf16.mxu0 %v11542_v8 }
  0x8a   : > { %11083 = vmatprep.subr.bf16.mxu1 %v11544_v10 }
  0x8c   : > { %11032 = vmatpush3.bf16.msra.mxu0 %v11543_v9 }
  0x8d   : > { %11084 = vmatpush3.bf16.msra.mxu1 %v11545_v11  ;;  %11121 = vmatprep.subr.bf16.mxu0 %v11546_v16 }
  0x8e   : > { %1465 = vmatmul.mubr.bf16.gmra.mxu0 %v9774_v32  ;;  %11167 = vmatprep.subr.bf16.mxu1 %v11552_v20 }
  0x8f   : > { %1553 = vmatmul.mubr.bf16.gmra.mxu1 %v9776_v33  ;;  %1472 = vmatprep.mubr.bf16.mxu0 %v9783_v34 }
  0x90   : > { %1560 = vmatprep.mubr.bf16.mxu1 %v9785_v35 }
  0x96   : > { %1473 = vmatmul.mubr.bf16.gmra.mxu0 %v9782_v38 }
  0x97   : > { %1561 = vmatmul.mubr.bf16.gmra.mxu1 %v9784_v39  ;;  %1480 = vmatprep.mubr.bf16.mxu0 %v9791_v40 }
  0x98   : > { %1568 = vmatprep.mubr.bf16.mxu1 %v9793_v41 }
  0x9e   : > { %1481 = vmatmul.mubr.bf16.gmra.mxu0 %v9790_v45 }
  0x9f   : > { %1569 = vmatmul.mubr.bf16.gmra.mxu1 %v9792_v46 }
  0xf6   : > { %v10801_v12 = vpop.f32.mrf.mxu0 }
  0xf7   : > { %v10859_v13 = vpop.f32.mrf.mxu1 }
  0xf8   : > { %v10802_v15 = vpop.f32.mrf.mxu0 }
  0xf9   : > { %v10803_v17 = vadd.f32 %v10802_v15, %v10801_v12  ;;  %v10860_v18 = vpop.f32.mrf.mxu1 }
  0xfa   : > { %v10804_v19 = vpop.f32.mrf.mxu0  ;;  %v10861_v22 = vadd.f32 %v10860_v18, %v10859_v13 }
  0xfb   : > { %v1259_v21 = vadd.f32 %v10803_v17, %v13353_v14  ;;  %v10862_v23 = vpop.f32.mrf.mxu1 }
  0xfc   : > { %v10805_v24 = vpop.f32.mrf.mxu0 }
  0xfd   : > { %v1347_v25 = vadd.f32 %v10861_v22, %v1259_v21  ;;  %v10863_v26 = vpop.f32.mrf.mxu1  ;;  %v10806_v10 = vadd.f32 %v10805_v24, %v10804_v19 }
  0xfe   : > { %v10807_v27 = vpop.f32.mrf.mxu0  ;;  %v10864_v22 = vadd.f32 %v10863_v26, %v10862_v23 }
  0xff   : > { %v13362_v28 = vpop.f32.mrf.mxu1  ;;  %v1262_v16 = vadd.f32 %v10806_v10, %v13353_v14 }
 0x100   : > { %v10808_v29 = vpop.f32.mrf.mxu0 }
 0x101   : > { %v13364_v30 = vpop.f32.mrf.mxu1  ;;  %v10809_v17 = vadd.f32 %v10808_v29, %v10807_v27 }
 0x102   : > { %v10810_v31 = vpop.f32.mrf.mxu0 }
 0x103   : > { %v13366_v32 = vpop.f32.mrf.mxu1 }
 0x104   : > { %v10811_v33 = vpop.f32.mrf.mxu0 }
 0x105   : > { %v13368_v34 = vpop.f32.mrf.mxu1 }
 0x106   : > { %v13370_v35 = vpop.f32.mrf.mxu0 }
 0x107   : > { %v13372_v36 = vpop.f32.mrf.mxu1 }
 0x108   : > { %v13374_v37 = vpop.f32.mrf.mxu0 }
 0x109   : > { %v13376_v38 = vpop.f32.mrf.mxu1 }
 0x10a   : > { %v13378_v39 = vpop.f32.mrf.mxu0 }
 0x10b   : > { %v13380_v40 = vpop.f32.mrf.mxu1 }
 0x10c   : > { %v13382_v41 = vpop.f32.mrf.mxu0 }
 0x10d   : > { %v13384_v42 = vpop.f32.mrf.mxu1 }
 0x10e   : > { %v13386_v43 = vpop.f32.mrf.mxu0 }
 0x10f   : > { %v13388_v44 = vpop.f32.mrf.mxu1 }
 0x110   : > { %v13390_v45 = vpop.f32.mrf.mxu0 }
 0x111   : > { %v13392_v46 = vpop.f32.mrf.mxu1 }
 0x112   : > { %v13394_v47 = vpop.f32.mrf.mxu0 }
 0x113   : > { %v13396_v48 = vpop.f32.mrf.mxu1 }
 0x114   : > { %v13398_v49 = vpop.f32.mrf.mxu0 }
 0x115   : > { %v13400_v50 = vpop.f32.mrf.mxu1 }
 0x116   : > { %v13402_v51 = vpop.f32.mrf.mxu0 }
 0x117   : > { %v13404_v52 = vpop.f32.mrf.mxu1 }
 0x118   : > { %v13406_v53 = vpop.f32.mrf.mxu0 }
 0x119   : > { %v13408_v54 = vpop.f32.mrf.mxu1 }
 0x11a   : > { %v13410_v55 = vpop.f32.mrf.mxu0 }
 0x11b   : > { %v13412_v56 = vpop.f32.mrf.mxu1 }
 0x11c   : > { %v13414_v57 = vpop.f32.mrf.mxu0 }
 0x11d   : > { %v13416_v58 = vpop.f32.mrf.mxu1 }
 0x11e   : > { %v13418_v59 = vpop.f32.mrf.mxu0 }
 0x11f   : > { %v13420_v60 = vpop.f32.mrf.mxu1 }
 0x120   : > { %v13422_v61 = vpop.f32.mrf.mxu0 }
 0x121   : > { %v13424_v62 = vpop.f32.mrf.mxu1 }
 0x122   : > { %v13426_v63 = vpop.f32.mrf.mxu0 }
 0x123   : > { %v13428_v0 = vpop.f32.mrf.mxu1 }
 0x124   : > { %16940 = vst [vmem:[#allocation6_spill] sm:$0xff] %v13428_v0  ;;  %v13430_v1 = vpop.f32.mrf.mxu0  ;;  %v10812_v0 = vadd.f32 %v10811_v33, %v10810_v31 }
 0x125   : > { %v13432_v2 = vpop.f32.mrf.mxu1 }
 0x126   : > { %16941 = vst [vmem:[#allocation7_spill] sm:$0xff] %v13432_v2  ;;  %v13434_v3 = vpop.f32.mrf.mxu0  ;;  %v1270_v23 = vadd.f32 %v10812_v0, %v13353_v14 }
 0x127   : > { %v13436_v4 = vpop.f32.mrf.mxu1 }
 0x128   : > { %16942 = vst [vmem:[#allocation8_spill] sm:$0xff] %v13436_v4  ;;  %v13438_v5 = vpop.f32.mrf.mxu0 }
 0x129   : > { %16943 = vst [vmem:[#allocation9_spill] sm:$0xff] %v13438_v5  ;;  %v13440_v6 = vpop.f32.mrf.mxu1 }
 0x12a   : > { %16944 = vst [vmem:[#allocation10_spill] sm:$0xff] %v13440_v6  ;;  %v10840_v7 = vpop.f32.mrf.mxu0  ;;  %v1350_v6 = vadd.f32 %v10864_v22, %v1262_v16  ;;  %v10873_v22 = vadd.f32 %v13376_v38, %v13372_v36  ;;  %v10879_v36 = vadd.f32 %v13392_v46, %v13388_v44  ;;  %v10882_v46 = vadd.f32 %v13400_v50, %v13396_v48  ;;  %v11547_v48 = vld [vmem:[%s16930_s5 + $0x38] sm:$0xff]  }
 0x12b   : > { %v10898_v8 = vpop.f32.mrf.mxu1  ;;  %v1267_v7 = vadd.f32 %v10809_v17, %v13353_v14 }
 0x12c   : > { %v10841_v9 = vpop.f32.mrf.mxu0 }
 0x12d   : > { %v10899_v11 = vpop.f32.mrf.mxu1 }
 0x12e   : > { %v10917_v12 = vpop.f32.mrf.mxu0  ;;  %v10867_v11 = vadd.f32 %v13364_v30, %v13362_v28 }
 0x12f   : > { %v10975_v13 = vpop.f32.mrf.mxu1 }
 0x130   : > { %v10918_v15 = vpop.f32.mrf.mxu0  ;;  %v1355_v31 = vadd.f32 %v10867_v11, %v1267_v7 }
 0x131   : > { %v10919_v18 = vadd.f32 %v10918_v15, %v10917_v12  ;;  %v10976_v20 = vpop.f32.mrf.mxu1 }
 0x132   : > { %v10920_v21 = vpop.f32.mrf.mxu0  ;;  %v10977_v8 = vadd.f32 %v10976_v20, %v10975_v13 }
 0x133   : > { %v1435_v4 = vadd.f32 %v10919_v18, %v1347_v25  ;;  %v10978_v2 = vpop.f32.mrf.mxu1  ;;  %v10815_v25 = vadd.f32 %v13374_v37, %v13370_v35  ;;  %v10818_v35 = vadd.f32 %v13382_v41, %v13378_v39 }
 0x134   : > { %v10921_v5 = vpop.f32.mrf.mxu0 }
 0x135   : > { %v10922_v19 = vadd.f32 %v10921_v5, %v10920_v21  ;;  %v10979_v24 = vpop.f32.mrf.mxu1  ;;  %v1523_v10 = vadd.f32 %v10977_v8, %v1435_v4  ;;  %v10870_v5 = vadd.f32 %v13368_v34, %v13366_v32  ;;  %v10821_v32 = vadd.f32 %v13390_v45, %v13386_v43 }
 0x136   : > { %v10923_v9 = vpop.f32.mrf.mxu0  ;;  %v10980_v29 = vadd.f32 %v10979_v24, %v10978_v2  ;;  %v1278_v41 = vadd.f32 %v10818_v35, %v13353_v14  ;;  %v10876_v43 = vadd.f32 %v13384_v42, %v13380_v40 }
 0x137   : > { %v1438_v27 = vadd.f32 %v10922_v19, %v1350_v6  ;;  %v10981_v12 = vpop.f32.mrf.mxu1  ;;  %v1576_v17 = vmax.f32 %v1523_v10, 0.0  ;;  %v1358_v2 = vadd.f32 %v10870_v5, %v1270_v23  ;;  %v1275_v6 = vadd.f32 %v10815_v25, %v13353_v14 }
 0x138   : > { %v10924_v26 = vpop.f32.mrf.mxu0  ;;  %v1283_v45 = vadd.f32 %v10821_v32, %v13353_v14  ;;  %v1366_v42 = vadd.f32 %v10876_v43, %v1278_v41  ;;  %v11553_v43 = vld [vmem:[%s16930_s5 + $0xb8] sm:$0xff]  }
 0x139   : > { %v1526_v33 = vadd.f32 %v10980_v29, %v1438_v27  ;;  %v10925_v15 = vadd.f32 %v10924_v26, %v10923_v9  ;;  %v10982_v13 = vpop.f32.mrf.mxu1  ;;  %v1363_v39 = vadd.f32 %v10873_v22, %v1275_v6 }
 0x13a   : > { %v10926_v16 = vpop.f32.mrf.mxu0  ;;  %v10983_v18 = vadd.f32 %v10982_v13, %v10981_v12  ;;  %v1371_v44 = vadd.f32 %v10879_v36, %v1283_v45 }
 0x13b   : > { %v1577_v28 = vmax.f32 %v1526_v33, 0.0  ;;  %v1443_v30 = vadd.f32 %v10925_v15, %v1355_v31  ;;  %v10984_v4 = vpop.f32.mrf.mxu1  ;;  %v10824_v31 = vadd.f32 %v13398_v49, %v13394_v47 }
 0x13c   : > { %v10927_v0 = vpop.f32.mrf.mxu0 }
 0x13d   : > { %v13454_v37 = vpack.c.bf16 %v1577_v28, %v1576_v17  ;;  %v10928_v20 = vadd.f32 %v10927_v0, %v10926_v16  ;;  %v10985_v21 = vpop.f32.mrf.mxu1  ;;  %v1531_v7 = vadd.f32 %v10983_v18, %v1443_v30  ;;  %v10827_v28 = vadd.f32 %v13406_v53, %v13402_v51 }
 0x13e   : > { %v10929_v34 = vpop.f32.mrf.mxu0  ;;  %v10986_v19 = vadd.f32 %v10985_v21, %v10984_v4  ;;  %v1286_v35 = vadd.f32 %v10824_v31, %v13353_v14 }
 0x13f   : > { %v1446_v8 = vadd.f32 %v10928_v20, %v1358_v2  ;;  %v10987_v24 = vpop.f32.mrf.mxu1  ;;  %v1600_v11 = vshll.u32 %v13454_v37, 16  ;;  %v1578_v38 = vmax.f32 %v1531_v7, 0.0  ;;  %v1598_v13 = vshrl.u32 %v13454_v37, 16  ;;  %v11548_v7 = vld [vmem:[%s16930_s5 + $0x70] sm:$0xff]  }
 0x140   : > { %v10930_v9 = vpop.f32.mrf.mxu0 }
 0x141   : > { %v1534_v10 = vadd.f32 %v10986_v19, %v1446_v8  ;;  %v10931_v27 = vadd.f32 %v10930_v9, %v10929_v34  ;;  %v10988_v29 = vpop.f32.mrf.mxu1  ;;  %v1602_v40 = vrot.slane %v1600_v11, 1  ;;  %v1678_v21 = vrot.slane %v1598_v13, 5 }
 0x142   : > { %v10932_v12 = vpop.f32.mrf.mxu0  ;;  %v10989_v33 = vadd.f32 %v10988_v29, %v10987_v24  ;;  %v1679_v32 = vrot.slane %v1600_v11, 6  ;;  %v1291_v8 = vadd.f32 %v10827_v28, %v13353_v14  ;;  %v10830_v19 = vadd.f32 %v13414_v57, %v13410_v55  ;;  %v11549_v57 = vld [vmem:[%s16930_s5 + $0x30] sm:$0xff]  }
 0x143   : > { %v1579_v23 = vmax.f32 %v1534_v10, 0.0  ;;  %v1451_v25 = vadd.f32 %v10931_v27, %v1363_v39  ;;  %v10990_v26 = vpop.f32.mrf.mxu1  ;;  %v1603_v20 = vor.u32 %v1602_v40, %v1598_v13  ;;  %v1658_v55 = vrot.slane %v13454_v37, 5 }
 0x144   : > { %v10933_v15 = vpop.f32.mrf.mxu0  ;;  %v1680_v36 = vor.u32 %v1679_v32, %v1678_v21  ;;  %v10888_v21 = vadd.f32 %v13416_v58, %v13412_v56 }
 0x145   : > { %v13470_v5 = vpack.c.bf16 %v1579_v23, %v1578_v38  ;;  %v10934_v16 = vadd.f32 %v10933_v15, %v10932_v12  ;;  %v10991_v17 = vpop.f32.mrf.mxu1  ;;  %v1539_v30 = vadd.f32 %v10989_v33, %v1451_v25  ;;  %v1374_v23 = vadd.f32 %v10882_v46, %v1286_v35  ;;  %v11550_v33 = vld [vmem:[%s16930_s5 + $0x68] sm:$0xff]  }
 0x146   : > { %v10935_v47 = vpop.f32.mrf.mxu0  ;;  %v10992_v4 = vadd.f32 %v10991_v17, %v10990_v26  ;;  %v10885_v15 = vadd.f32 %v13408_v54, %v13404_v52  ;;  %v1294_v52 = vadd.f32 %v10830_v19, %v13353_v14  ;;  %v10833_v54 = vadd.f32 %v13422_v61, %v13418_v59 }
 0x147   : > { %v1454_v49 = vadd.f32 %v10934_v16, %v1366_v42  ;;  %v10993_v2 = vpop.f32.mrf.mxu1  ;;  %v1605_v6 = vshll.u32 %v13470_v5, 16  ;;  %v1609_v0 = vshrl.u32 %v13470_v5, 16  ;;  %v1659_v11 = vrot.slane %v13470_v5, 5 }
 0x148   : > { %v10936_v18 = vpop.f32.mrf.mxu0  ;;  %v1580_v39 = vmax.f32 %v1539_v30, 0.0  ;;  %v1379_v30 = vadd.f32 %v10885_v15, %v1291_v8  ;;  %v1382_v58 = vadd.f32 %v10888_v21, %v1294_v52  ;;  %v16947_v15 = vld [vmem:[#allocation7_spill] sm:$0xff] }
 0x149   : > { %v1542_v50 = vadd.f32 %v10992_v4, %v1454_v49  ;;  %v10937_v51 = vadd.f32 %v10936_v18, %v10935_v47  ;;  %v10994_v53 = vpop.f32.mrf.mxu1  ;;  %v1607_v34 = vrot.slane %v1605_v6, 1  ;;  %v1681_v22 = vrot.slane %v1609_v0, 5  ;;  %v11551_v4 = vld [vmem:[%s16930_s5 + $0x28] sm:$0xff]  }
 0x14a   : > { %v10938_v24 = vpop.f32.mrf.mxu0  ;;  %v1682_v9 = vrot.slane %v1605_v6, 6  ;;  %v10995_v45 = vadd.f32 %v10994_v53, %v10993_v2  ;;  %v1660_v16 = vsel %vm1657_vm1, %v1658_v55, %v1659_v11 }
 0x14b   : > { %v1581_v41 = vmax.f32 %v1542_v50, 0.0  ;;  %v1459_v10 = vadd.f32 %v10937_v51, %v1371_v44  ;;  %v10996_v27 = vpop.f32.mrf.mxu1  ;;  %v1608_v29 = vsel %vm1596_vm0, %v1603_v20, %v1607_v34  ;;  %v1611_v49 = vor.u32 %v1609_v0, %v1607_v34 }
 0x14c   : > { %v10939_v12 = vpop.f32.mrf.mxu0  ;;  %2011 = vmatprep.mubr.bf16.mxu0 %v1608_v29  ;;  %v1683_v38 = vor.u32 %v1682_v9, %v1681_v22  ;;  %v1299_v34 = vadd.f32 %v10833_v54, %v13353_v14  ;;  %v10836_v22 = vadd.f32 %v13430_v1, %v13426_v63 }
 0x14d   : > { %v13497_v25 = vpack.c.bf16 %v1581_v41, %v1580_v39  ;;  %v10940_v26 = vadd.f32 %v10939_v12, %v10938_v24  ;;  %v10997_v31 = vpop.f32.mrf.mxu1  ;;  %2012 = vmatmul.mubr.bf16.vlgmr.msra.gmra.mxu0 %v13454_v37  ;;  %v1547_v13 = vadd.f32 %v10995_v45, %v1459_v10  ;;  %v10891_v39 = vadd.f32 %v13424_v62, %v13420_v60  ;;  %v12826_v62 = vld [vmem:[%s16927_s2] ss:$0 sm:$0xff] }
 0x14e   : > { %v10941_v40 = vpop.f32.mrf.mxu0  ;;  %v1684_v42 = vsel %vm1677_vm2, %v1680_v36, %v1683_v38  ;;  %11122 = vmatpush3.bf16.msra.mxu0 %v11547_v48  ;;  %v10998_v44 = vadd.f32 %v10997_v31, %v10996_v27  ;;  %v1302_v12 = vadd.f32 %v12826_v62, %v10836_v22  ;;  %v16945_v36 = vld [vmem:[#allocation9_spill] sm:$0xff] }
 0x14f   : > { %v1462_v17 = vadd.f32 %v10940_v26, %v1374_v23  ;;  %v10999_v46 = vpop.f32.mrf.mxu1  ;;  %2092 = vmatprep.mubr.bf16.mxu1 %v1684_v42  ;;  %v1613_v37 = vshll.u32 %v13497_v25, 16  ;;  %v1617_v28 = vshrl.u32 %v13497_v25, 16  ;;  %11123 = vmatprep.subr.bf16.mxu0 %v11548_v7  ;;  %v1661_v59 = vrot.slane %v13497_v25, 5 }
 0x150   : > { %2093 = vmatmul.mubr.bf16.vlgmr.msra.gmra.mxu1 %v1660_v16  ;;  %v10942_v47 = vpop.f32.mrf.mxu0  ;;  %v1582_v61 = vmax.f32 %v1547_v13, 0.0  ;;  %v1387_v60 = vadd.f32 %v10891_v39, %v1299_v34 }
 0x151   : > { %v1550_v2 = vadd.f32 %v10998_v44, %v1462_v17  ;;  %v10943_v6 = vadd.f32 %v10942_v47, %v10941_v40  ;;  %v11000_v35 = vpop.f32.mrf.mxu1  ;;  %v1615_v18 = vrot.slane %v1613_v37, 1  ;;  %v1685_v20 = vrot.slane %v1617_v28, 5  ;;  %11168 = vmatpush3.bf16.msra.mxu1 %v11553_v43 }
 0x152   : > { %v10944_v32 = vpop.f32.mrf.mxu0  ;;  %v1686_v48 = vrot.slane %v1613_v37, 6  ;;  %11124 = vmatpush3.bf16.msra.mxu0 %v11549_v57  ;;  %v11001_v7 = vadd.f32 %v11000_v35, %v10999_v46  ;;  %v1662_v63 = vsel %vm1657_vm1, %v1659_v11, %v1661_v59  ;;  %v16949_v35 = vld [vmem:[#allocation10_spill] sm:$0xff] }
 0x153   : > { %v1583_v0 = vmax.f32 %v1550_v2, 0.0  ;;  %v1467_v50 = vadd.f32 %v10943_v6, %v1379_v30  ;;  %v11002_v51 = vpop.f32.mrf.mxu1  ;;  %v1616_v53 = vsel %vm1596_vm0, %v1611_v49, %v1615_v18  ;;  %11125 = vmatprep.subr.bf16.mxu0 %v11550_v33  ;;  %v16946_v33 = vld [vmem:[#allocation6_spill] sm:$0xff]  ;;  %v16948_v6 = vld [vmem:[#allocation8_spill] sm:$0xff] }
 0x154   : > { %v10945_v8 = vpop.f32.mrf.mxu0  ;;  %2019 = vmatprep.mubr.bf16.mxu0 %v1616_v53  ;;  %v1687_v56 = vor.u32 %v1686_v48, %v1685_v20  ;;  %v10894_v13 = vadd.f32 %v16947_v15, %v16946_v33 }
 0x155   : > { %v13524_v19 = vpack.c.bf16 %v1583_v0, %v1582_v61  ;;  %v10946_v24 = vadd.f32 %v10945_v8, %v10944_v32  ;;  %v11003_v9 = vpop.f32.mrf.mxu1  ;;  %2020 = vmatmul.mubr.bf16.gmra.mxu0 %v13470_v5  ;;  %v1555_v41 = vadd.f32 %v11001_v7, %v1467_v50  ;;  %v10839_v5 = vadd.f32 %v16945_v36, %v13434_v3 }
 0x156   : > { %v10947_v10 = vpop.f32.mrf.mxu0  ;;  %v1688_v14 = vsel %vm1677_vm2, %v1683_v38, %v1687_v56  ;;  %11126 = vmatpush3.bf16.msra.mxu0 %v11551_v4  ;;  %v11004_v27 = vadd.f32 %v11003_v9, %v11002_v51  ;;  %v1619_v38 = vor.u32 %v1617_v28, %v1615_v18  ;;  %v1390_v47 = vadd.f32 %v10894_v13, %v1302_v12 }
 0x157   : > { %v1470_v1 = vadd.f32 %v10946_v24, %v1382_v58  ;;  %v11005_v29 = vpop.f32.mrf.mxu1  ;;  %2100 = vmatprep.mubr.bf16.mxu1 %v1688_v14  ;;  %v1621_v43 = vshll.u32 %v13524_v19, 16  ;;  %v1625_v45 = vshrl.u32 %v13524_v19, 16  ;;  %v1663_v16 = vrot.slane %v13524_v19, 5 }
 0x158   : > { %2101 = vmatmul.mubr.bf16.gmra.mxu1 %v1662_v63  ;;  %v10948_v11 = vpop.f32.mrf.mxu0  ;;  %v1584_v17 = vmax.f32 %v1555_v41, 0.0  ;;  %v1307_v30 = vadd.f32 %v12826_v62, %v10839_v5  ;;  %v10897_v18 = vadd.f32 %v16949_v35, %v16948_v6  ;;  %v11562_v6 = vld [vmem:[%s16930_s5 + $0xe0] sm:$0xff]  }
 0x159   : > { %v1558_v55 = vadd.f32 %v11004_v27, %v1470_v1  ;;  %v10949_v57 = vadd.f32 %v10948_v11, %v10947_v10  ;;  %v11006_v23 = vpop.f32.mrf.mxu1  ;;  %v1623_v26 = vrot.slane %v1621_v43, 1  ;;  %v1689_v31 = vrot.slane %v1625_v45, 5  ;;  %v11563_v35 = vld [vmem:[%s16930_s5 + $0xa0] sm:$0xff]  }
 0x15a   : > { %v10950_v40 = vpop.f32.mrf.mxu0  ;;  %v1690_v42 = vrot.slane %v1621_v43, 6  ;;  %v11007_v28 = vadd.f32 %v11006_v23, %v11005_v29  ;;  %v1664_v48 = vsel %vm1657_vm1, %v1661_v59, %v1663_v16  ;;  %v1395_v34 = vadd.f32 %v10897_v18, %v1307_v30  ;;  %v11560_v18 = vld [vmem:[%s16930_s5 + $0x58] sm:$0xff]  }
 0x15b   : > { %v1585_v44 = vmax.f32 %v1558_v55, 0.0  ;;  %v1475_v46 = vadd.f32 %v10949_v57, %v1387_v60  ;;  %v11008_v37 = vpop.f32.mrf.mxu1  ;;  %v1624_v3 = vsel %vm1596_vm0, %v1619_v38, %v1623_v26  ;;  %v1627_v7 = vor.u32 %v1625_v45, %v1623_v26 }
 0x15c   : > { %v10951_v52 = vpop.f32.mrf.mxu0  ;;  %2027 = vmatprep.mubr.bf16.mxu0 %v1624_v3  ;;  %v1691_v54 = vor.u32 %v1690_v42, %v1689_v31 }
 0x15d   : > { %v13546_v49 = vpack.c.bf16 %v1585_v44, %v1584_v17  ;;  %v10952_v4 = vadd.f32 %v10951_v52, %v10950_v40  ;;  %v11009_v2 = vpop.f32.mrf.mxu1  ;;  %2028 = vmatmul.mubr.bf16.gmra.mxu0 %v13497_v25  ;;  %v1563_v20 = vadd.f32 %v11007_v28, %v1475_v46  ;;  %v11554_v52 = vld [vmem:[%s16930_s5 + $0x60] sm:$0xff]  }
 0x15e   : > { %v10953_v21 = vpop.f32.mrf.mxu0  ;;  %v1692_v32 = vsel %vm1677_vm2, %v1687_v56, %v1691_v54  ;;  %v11010_v0 = vadd.f32 %v11009_v2, %v11008_v37  ;;  %11127 = vmatprep.subr.bf16.mxu0 %v11554_v52  ;;  %v11559_v2 = vld [vmem:[%s16930_s5 + $0xa8] sm:$0xff]  }
 0x15f   : > { %v1478_v61 = vadd.f32 %v10952_v4, %v1390_v47  ;;  %2108 = vmatprep.mubr.bf16.mxu1 %v1692_v32  ;;  %v11011_v50 = vpop.f32.mrf.mxu1  ;;  %v1629_v51 = vshll.u32 %v13546_v49, 16  ;;  %v1633_v53 = vshrl.u32 %v13546_v49, 16  ;;  %v1586_v25 = vmax.f32 %v1563_v20, 0.0  ;;  %v11557_v47 = vld [vmem:[%s16930_s5 + $0xb0] sm:$0xff]   ;;  %v11556_v4 = vld [vmem:[%s16930_s5 + $0x20] sm:$0xff]   ;;  %v11565_v20 = vld [vmem:[%s16930_s5 + $0xd8] sm:$0xff]  }
 0x160   : > { %2109 = vmatmul.mubr.bf16.gmra.mxu1 %v1664_v48  ;;  %v10954_v22 = vpop.f32.mrf.mxu0  ;;  %v1665_v1 = vrot.slane %v13546_v49, 5  ;;  %11128 = vmatpush3.bf16.msra.mxu0 %v11556_v4  ;;  %v11561_v32 = vld [vmem:[%s16930_s5 + $0x18] sm:$0xff]   ;;  %v11568_v48 = vld [vmem:[%s16930_s5 + $0xd0] sm:$0xff]  }
 0x161   : > { %v1566_v8 = vadd.f32 %v11010_v0, %v1478_v61  ;;  %v10955_v58 = vadd.f32 %v10954_v22, %v10953_v21  ;;  %v11012_v24 = vpop.f32.mrf.mxu1  ;;  %v1631_v56 = vrot.slane %v1629_v51, 1  ;;  %v1693_v9 = vrot.slane %v1633_v53, 5  ;;  %11129 = vmatprep.subr.bf16.mxu0 %v11560_v18  ;;  %v11567_v21 = vld [vmem:[%s16930_s5 + $0x98] sm:$0xff]   ;;  %v11569_v61 = vld [vmem:[%s16930_s5 + $0x90] sm:$0xff]   ;;  %v11571_v22 = vld [vmem:[%s16930_s5 + $0x8] sm:$0xff]  }
 0x162   : > { %v11013_v39 = vadd.f32 %v11012_v24, %v11011_v50  ;;  %v1694_v59 = vrot.slane %v1629_v51, 6  ;;  %v10956_v41 = vpop.f32.mrf.mxu0  ;;  %v1666_v5 = vsel %vm1657_vm1, %v1663_v16, %v1665_v1  ;;  %v11564_v0 = vld [vmem:[%s16930_s5 + $0x50] sm:$0xff]   ;;  %v11572_v51 = vld [vmem:[%s16930_s5 + $0xc8] sm:$0xff]   ;;  %v11576_v24 = vld [vmem:[%s16930_s5] sm:$0xff]  }
 0x163   : > { %v1587_v10 = vmax.f32 %v1566_v8, 0.0  ;;  %v1483_v14 = vadd.f32 %v10955_v58, %v1395_v34  ;;  %v1632_v63 = vsel %vm1596_vm0, %v1627_v7, %v1631_v56  ;;  %v11014_v27 = vpop.f32.mrf.mxu1  ;;  %v1635_v55 = vor.u32 %v1633_v53, %v1631_v56  ;;  %v11566_v50 = vld [vmem:[%s16930_s5 + $0x10] sm:$0xff]   ;;  %v11573_v53 = vld [vmem:[%s16930_s5 + $0x88] sm:$0xff]   ;;  %v11575_v7 = vld [vmem:[%s16930_s5 + $0xc0] sm:$0xff]  }
 0x164   : > { %2035 = vmatprep.mubr.bf16.mxu0 %v1632_v63  ;;  %v1695_v29 = vor.u32 %v1694_v59, %v1693_v9  ;;  %v10957_v43 = vpop.f32.mrf.mxu0  ;;  %11130 = vmatpush3.bf16.msra.mxu0 %v11561_v32  ;;  %v11570_v34 = vld [vmem:[%s16930_s5 + $0x48] sm:$0xff]   ;;  %v11577_v8 = vld [vmem:[%s16930_s5 + $0x80] sm:$0xff]   ;;  %v11578_v56 = vld [vmem:[%s16930_s5 + $0x178] sm:$0xff]  }
 0x165   : > { %v1594_v45 = vpack.c.bf16 %v1587_v10, %v1586_v25  ;;  %v1571_v60 = vadd.f32 %v11013_v39, %v1483_v14  ;;  %2036 = vmatmul.mubr.bf16.gmra.mxu0 %v13524_v19  ;;  %v11015_v62 = vpop.f32.mrf.mxu1  ;;  %11131 = vmatprep.subr.bf16.mxu0 %v11564_v0  ;;  %v11574_v58 = vld [vmem:[%s16930_s5 + $0x40] sm:$0xff]   ;;  %v11582_v9 = vld [vmem:[%s16930_s5 + $0x1f8] sm:$0xff]  }
 0x166   : > { %v1696_v12 = vsel %vm1677_vm2, %v1691_v54, %v1695_v29  ;;  %v11555_v54 = vld [vmem:[%s16930_s5 + $0xf0] sm:$0xff]   ;;  %v13649_v10 = vld [vmem:[%s16929_s4] ss:$0 sm:$0xff] }
 0x167   : > { %v1588_v36 = vmax.f32 %v1571_v60, 0.0  ;;  %2116 = vmatprep.mubr.bf16.mxu1 %v1696_v12  ;;  %v1637_v11 = vshll.u32 %v1594_v45, 16  ;;  %v1641_v38 = vshrl.u32 %v1594_v45, 16  ;;  %v1667_v33 = vrot.slane %v1594_v45, 5  ;;  %11169 = vmatprep.subr.bf16.mxu1 %v11555_v54 }
 0x168   : > { %2117 = vmatmul.mubr.bf16.gmra.mxu1 %v1666_v5  ;;  %11132 = vmatpush3.bf16.msra.mxu0 %v11566_v50 }
 0x169   : > { %v1595_v57 = vpack.c.bf16 %v1588_v36, %v1588_v36  ;;  %v1639_v23 = vrot.slane %v1637_v11, 1  ;;  %v1697_v26 = vrot.slane %v1641_v38, 5  ;;  %v1698_v31 = vrot.slane %v1637_v11, 6  ;;  %11170 = vmatpush3.bf16.msra.mxu1 %v11557_v47  ;;  %11133 = vmatprep.subr.bf16.mxu0 %v11570_v34 }
 0x16a   : > { %v1668_v46 = vsel %vm1657_vm1, %v1665_v1, %v1667_v33 }
 0x16b   : > { %v1702_v15 = vshrl.u32 %v1595_v57, 16  ;;  %v1705_v13 = vshll.u32 %v1595_v57, 16  ;;  %v1640_v19 = vsel %vm1596_vm0, %v1635_v55, %v1639_v23  ;;  %v1643_v40 = vor.u32 %v1641_v38, %v1639_v23 }
 0x16c   : > { %2043 = vmatprep.mubr.bf16.mxu0 %v1640_v19  ;;  %v1699_v42 = vor.u32 %v1698_v31, %v1697_v26  ;;  %v1669_v30 = vrot.slane %v1595_v57, 5  ;;  %11134 = vmatpush3.bf16.msra.mxu0 %v11571_v22 }
 0x16d   : > { %2044 = vmatmul.mubr.bf16.gmra.mxu0 %v13546_v49  ;;  %v1704_v17 = vrot.slane %v1702_v15, 5  ;;  %v1707_v16 = vrot.slane %v1705_v13, 6  ;;  %v11558_v49 = vld [vmem:[%s16930_s5 + $0xe8] sm:$0xff]   ;;  %11135 = vmatprep.subr.bf16.mxu0 %v11574_v58 }
 0x16e   : > { %2051 = vmatprep.mubr.bf16.mxu0 %v1643_v40  ;;  %v1700_v44 = vsel %vm1677_vm2, %v1695_v29, %v1699_v42  ;;  %v1670_v28 = vsel %vm1657_vm1, %v1667_v33, %v1669_v30  ;;  %11171 = vmatprep.subr.bf16.mxu1 %v11558_v49 }
 0x16f   : > { %2124 = vmatprep.mubr.bf16.mxu1 %v1700_v44  ;;  %v1708_v37 = vor.u32 %v1707_v16, %v1704_v17  ;;  %11172 = vmatpush3.bf16.msra.mxu1 %v11559_v2 }
 0x170   : > { %2125 = vmatmul.mubr.bf16.gmra.mxu1 %v1668_v46  ;;  %11173 = vmatprep.subr.bf16.mxu1 %v11562_v6 }
 0x171   : > { %v1709_v3 = vsel %vm1677_vm2, %v1699_v42, %v1708_v37  ;;  %11136 = vmatpush3.bf16.msra.mxu0 %v11576_v24 }
 0x172   : > { %2132 = vmatprep.mubr.bf16.mxu1 %v1709_v3  ;;  %11213 = vmatprep.subr.bf16.mxu0 %v11578_v56 }
 0x173   : > { %11174 = vmatpush3.bf16.msra.mxu1 %v11563_v35 }
 0x174   : > { %11175 = vmatprep.subr.bf16.mxu1 %v11565_v20 }
 0x175   : > { %2052 = vmatmul.mubr.bf16.gmra.mxu0 %v1594_v45 }
 0x177   : > { %11176 = vmatpush3.bf16.msra.mxu1 %v11567_v21 }
 0x178   : > { %2133 = vmatmul.mubr.bf16.gmra.mxu1 %v1670_v28  ;;  %11177 = vmatprep.subr.bf16.mxu1 %v11568_v48 }
 0x17b   : > { %11178 = vmatpush3.bf16.msra.mxu1 %v11569_v61 }
 0x17c   : > { %11179 = vmatprep.subr.bf16.mxu1 %v11572_v51 }
 0x17f   : > { %11180 = vmatpush3.bf16.msra.mxu1 %v11573_v53 }
 0x180   : > { %11181 = vmatprep.subr.bf16.mxu1 %v11575_v7 }
 0x183   : > { %11182 = vmatpush3.bf16.msra.mxu1 %v11577_v8 }
 0x184   : > { %11259 = vmatprep.subr.bf16.mxu1 %v11582_v9 }
 0x20d   : > { %v11033_v25 = vpop.f32.mrf.mxu0 }
 0x20f   : > { %v11034_v39 = vpop.f32.mrf.mxu0 }
 0x210   : > { %v11035_v59 = vadd.f32 %v11034_v39, %v11033_v25  ;;  %v11085_v41 = vpop.f32.mrf.mxu1 }
 0x211   : > { %v11036_v14 = vpop.f32.mrf.mxu0 }
 0x212   : > { %v11086_v63 = vpop.f32.mrf.mxu1  ;;  %v2014_v27 = vadd.f32 %v11035_v59, %v13649_v10  ;;  %v11583_v59 = vld [vmem:[%s16930_s5 + $0x1b8] sm:$0xff]  }
 0x213   : > { %v11037_v1 = vpop.f32.mrf.mxu0  ;;  %v11087_v29 = vadd.f32 %v11086_v63, %v11085_v41 }
 0x214   : > { %v11038_v43 = vadd.f32 %v11037_v1, %v11036_v14  ;;  %v11088_v45 = vpop.f32.mrf.mxu1 }
 0x215   : > { %v11039_v60 = vpop.f32.mrf.mxu0  ;;  %v2095_v11 = vadd.f32 %v11087_v29, %v2014_v27  ;;  %v11585_v27 = vld [vmem:[%s16930_s5 + $0x1f0] sm:$0xff]  }
 0x216   : > { %v2017_v62 = vadd.f32 %v11038_v43, %v13649_v10  ;;  %v11089_v12 = vpop.f32.mrf.mxu1 }
 0x217   : > { %v11090_v36 = vadd.f32 %v11089_v12, %v11088_v45  ;;  %v11040_v5 = vpop.f32.mrf.mxu0  ;;  %v2141_v19 = vmax.f32 %v2095_v11, 0.0  ;;  %v11579_v11 = vld [vmem:[%s16930_s5 + $0x138] sm:$0xff]  }
 0x218   : > { %v11041_v38 = vadd.f32 %v11040_v5, %v11039_v60  ;;  %v11091_v55 = vpop.f32.mrf.mxu1 }
 0x219   : > { %v2098_v57 = vadd.f32 %v11090_v36, %v2017_v62  ;;  %v11042_v23 = vpop.f32.mrf.mxu0 }
 0x21a   : > { %v11092_v26 = vpop.f32.mrf.mxu1  ;;  %v2022_v33 = vadd.f32 %v11041_v38, %v13649_v10 }
 0x21b   : > { %v2142_v31 = vmax.f32 %v2098_v57, 0.0  ;;  %v11093_v15 = vadd.f32 %v11092_v26, %v11091_v55  ;;  %v11043_v13 = vpop.f32.mrf.mxu0  ;;  %v11587_v26 = vld [vmem:[%s16930_s5 + $0x1b0] sm:$0xff]  }
 0x21c   : > { %v11044_v40 = vadd.f32 %v11043_v13, %v11042_v23  ;;  %v11094_v42 = vpop.f32.mrf.mxu1  ;;  %v11580_v23 = vld [vmem:[%s16930_s5 + $0x170] sm:$0xff]  }
 0x21d   : > { %v11045_v17 = vpop.f32.mrf.mxu0  ;;  %v13654_v16 = vpack.c.bf16 %v2142_v31, %v2141_v19  ;;  %v2103_v37 = vadd.f32 %v11093_v15, %v2022_v33  ;;  %v11588_v15 = vld [vmem:[%s16930_s5 + $0x1e8] sm:$0xff]  }
 0x21e   : > { %v2025_v44 = vadd.f32 %v11044_v40, %v13649_v10  ;;  %v11095_v46 = vpop.f32.mrf.mxu1 }
 0x21f   : > { %v11096_v3 = vadd.f32 %v11095_v46, %v11094_v42  ;;  %v11046_v30 = vpop.f32.mrf.mxu0  ;;  %v2162_v4 = vshll.u32 %v13654_v16, 16  ;;  %v2143_v2 = vmax.f32 %v2103_v37, 0.0  ;;  %v2223_v51 = vrot.slane %v13654_v16, 5  ;;  %v11581_v37 = vld [vmem:[%s16930_s5 + $0x130] sm:$0xff]  }
 0x220   : > { %v11047_v28 = vadd.f32 %v11046_v30, %v11045_v17  ;;  %v11097_v52 = vpop.f32.mrf.mxu1  ;;  %v2209_v53 = vrot.slane %v13654_v16, 1  ;;  %v2160_v25 = vshrl.u32 %v13654_v16, 16 }
 0x221   : > { %v2106_v54 = vadd.f32 %v11096_v3, %v2025_v44  ;;  %v11048_v47 = vpop.f32.mrf.mxu0  ;;  %v2164_v34 = vrot.slane %v2162_v4, 1 }
 0x222   : > { %v11098_v49 = vpop.f32.mrf.mxu1  ;;  %v2030_v35 = vadd.f32 %v11047_v28, %v13649_v10 }
 0x223   : > { %v2144_v6 = vmax.f32 %v2106_v54, 0.0  ;;  %v11099_v18 = vadd.f32 %v11098_v49, %v11097_v52  ;;  %v11049_v20 = vpop.f32.mrf.mxu0  ;;  %v2165_v43 = vor.u32 %v2164_v34, %v2160_v25  ;;  %v11584_v54 = vld [vmem:[%s16930_s5 + $0x168] sm:$0xff]  }
 0x224   : > { %v11050_v21 = vadd.f32 %v11049_v20, %v11048_v47  ;;  %v11100_v32 = vpop.f32.mrf.mxu1  ;;  %v11590_v47 = vld [vmem:[%s16930_s5 + $0x1a8] sm:$0xff]  }
 0x225   : > { %v13659_v48 = vpack.c.bf16 %v2144_v6, %v2143_v2  ;;  %v11051_v61 = vpop.f32.mrf.mxu0  ;;  %v2111_v22 = vadd.f32 %v11099_v18, %v2030_v35  ;;  %v11592_v18 = vld [vmem:[%s16930_s5 + $0x1e0] sm:$0xff]   ;;  %v11586_v34 = vld [vmem:[%s16930_s5 + $0x128] sm:$0xff]  }
 0x226   : > { %v2033_v0 = vadd.f32 %v11050_v21, %v13649_v10  ;;  %v11101_v50 = vpop.f32.mrf.mxu1 }
 0x227   : > { %v11102_v7 = vadd.f32 %v11101_v50, %v11100_v32  ;;  %v11052_v8 = vpop.f32.mrf.mxu0  ;;  %v2224_v58 = vrot.slane %v13659_v48, 5  ;;  %v2210_v24 = vrot.slane %v13659_v48, 1  ;;  %v13670_v39 = vshll.u32 %v13659_v48, 16 }
 0x228   : > { %v11053_v56 = vadd.f32 %v11052_v8, %v11051_v61  ;;  %v11103_v9 = vpop.f32.mrf.mxu1  ;;  %v2145_v60 = vmax.f32 %v2111_v22, 0.0  ;;  %v13707_v28 = vshrl.u32 %v13659_v48, 16 }
 0x229   : > { %v2114_v41 = vadd.f32 %v11102_v7, %v2033_v0  ;;  %v11054_v14 = vpop.f32.mrf.mxu0  ;;  %v2225_v63 = vsel %vm1657_vm1, %v2223_v51, %v2224_v58  ;;  %v2211_v1 = vsel %vm2208_vm3, %v2209_v53, %v2210_v24  ;;  %v2169_v45 = vrot.slane %v13670_v39, 1 }
 0x22a   : > { %v11104_v29 = vpop.f32.mrf.mxu1  ;;  %3024 = vmatprep.mubr.bf16.mxu1 %v2225_v63  ;;  %v2038_v12 = vadd.f32 %v11053_v56, %v13649_v10 }
 0x22b   : > { %v2146_v62 = vmax.f32 %v2114_v41, 0.0  ;;  %v11105_v36 = vadd.f32 %v11104_v29, %v11103_v9  ;;  %3025 = vmatmul.mubr.bf16.vlgmr.msra.gmra.mxu1 %v2211_v1  ;;  %v11055_v5 = vpop.f32.mrf.mxu0  ;;  %v2170_v57 = vsel %vm1596_vm0, %v2165_v43, %v2169_v45  ;;  %v2173_v21 = vor.u32 %v13707_v28, %v2169_v45  ;;  %v11591_v43 = vld [vmem:[%s16930_s5 + $0x120] sm:$0xff]  }
 0x22c   : > { %v11056_v38 = vadd.f32 %v11055_v5, %v11054_v14  ;;  %v11106_v55 = vpop.f32.mrf.mxu1  ;;  %11260 = vmatpush3.bf16.msra.mxu1 %v11583_v59  ;;  %2952 = vmatprep.mubr.bf16.mxu0 %v2170_v57  ;;  %v11596_v59 = vld [vmem:[%s16930_s5 + $0x1d8] sm:$0xff]   ;;  %v11600_v57 = vld [vmem:[%s16930_s5 + $0x1d0] sm:$0xff]  }
 0x22d   : > { %v13694_v31 = vpack.c.bf16 %v2146_v62, %v2145_v60  ;;  %v11057_v33 = vpop.f32.mrf.mxu0  ;;  %11261 = vmatprep.subr.bf16.mxu1 %v11585_v27  ;;  %2953 = vmatmul.mubr.bf16.vlgmr.msra.gmra.mxu0 %v13654_v16  ;;  %v2119_v40 = vadd.f32 %v11105_v36, %v2038_v12  ;;  %v11594_v36 = vld [vmem:[%s16930_s5 + $0x158] sm:$0xff]  }
 0x22e   : > { %v2041_v13 = vadd.f32 %v11056_v38, %v13649_v10  ;;  %v11107_v19 = vpop.f32.mrf.mxu1  ;;  %11214 = vmatpush3.bf16.msra.mxu0 %v11579_v11  ;;  %v11597_v5 = vld [vmem:[%s16930_s5 + $0x198] sm:$0xff]  }
 0x22f   : > { %v11108_v42 = vadd.f32 %v11107_v19, %v11106_v55  ;;  %v11058_v17 = vpop.f32.mrf.mxu0  ;;  %v2226_v44 = vrot.slane %v13694_v31, 5  ;;  %v2212_v46 = vrot.slane %v13694_v31, 1  ;;  %11215 = vmatprep.subr.bf16.mxu0 %v11580_v23  ;;  %v13710_v52 = vshll.u32 %v13694_v31, 16 }
 0x230   : > { %v11059_v3 = vadd.f32 %v11058_v17, %v11057_v33  ;;  %v11109_v30 = vpop.f32.mrf.mxu1  ;;  %11262 = vmatpush3.bf16.msra.mxu1 %v11587_v26  ;;  %v2147_v61 = vmax.f32 %v2119_v40, 0.0  ;;  %v13755_v62 = vshrl.u32 %v13694_v31, 16  ;;  %v11598_v17 = vld [vmem:[%s16930_s5 + $0x150] sm:$0xff]  }
 0x231   : > { %v2122_v49 = vadd.f32 %v11108_v42, %v2041_v13  ;;  %v11060_v2 = vpop.f32.mrf.mxu0  ;;  %v2227_v6 = vsel %vm1657_vm1, %v2224_v58, %v2226_v44  ;;  %v2213_v35 = vsel %vm2208_vm3, %v2210_v24, %v2212_v46  ;;  %11263 = vmatprep.subr.bf16.mxu1 %v11588_v15  ;;  %v2177_v32 = vrot.slane %v13710_v52, 1  ;;  %v11589_v58 = vld [vmem:[%s16930_s5 + $0x160] sm:$0xff]   ;;  %v11595_v13 = vld [vmem:[%s16930_s5 + $0x118] sm:$0xff]  }
 0x232   : > { %v11110_v20 = vpop.f32.mrf.mxu1  ;;  %3032 = vmatprep.mubr.bf16.mxu1 %v2227_v6  ;;  %v2046_v50 = vadd.f32 %v11059_v3, %v13649_v10  ;;  %11216 = vmatpush3.bf16.msra.mxu0 %v11581_v37  ;;  %v11593_v24 = vld [vmem:[%s16930_s5 + $0x1a0] sm:$0xff]   ;;  %v11603_v37 = vld [vmem:[%s16930_s5 + $0x1c8] sm:$0xff]  }
 0x233   : > { %v2148_v0 = vmax.f32 %v2122_v49, 0.0  ;;  %v11111_v51 = vadd.f32 %v11110_v20, %v11109_v30  ;;  %3033 = vmatmul.mubr.bf16.gmra.mxu1 %v2213_v35  ;;  %v11061_v53 = vpop.f32.mrf.mxu0  ;;  %v2178_v8 = vsel %vm1596_vm0, %v2173_v21, %v2177_v32  ;;  %11217 = vmatprep.subr.bf16.mxu0 %v11584_v54  ;;  %v2181_v23 = vor.u32 %v13755_v62, %v2177_v32  ;;  %v11599_v54 = vld [vmem:[%s16930_s5 + $0x110] sm:$0xff]   ;;  %v11602_v35 = vld [vmem:[%s16930_s5 + $0x148] sm:$0xff]  }
 0x234   : > { %v11062_v22 = vadd.f32 %v11061_v53, %v11060_v2  ;;  %v11112_v7 = vpop.f32.mrf.mxu1  ;;  %11264 = vmatpush3.bf16.msra.mxu1 %v11590_v47  ;;  %2960 = vmatprep.mubr.bf16.mxu0 %v2178_v8  ;;  %v11605_v21 = vld [vmem:[%s16930_s5 + $0x188] sm:$0xff]   ;;  %v2296_v32 = vrot.slane %v13755_v62, 2  ;;  %v2297_v53 = vrot.slane %v13710_v52, 3  ;;  %v2323_v8 = vrot.slane %v13659_v48, 3 }
 0x235   : > { %v13736_v56 = vpack.c.bf16 %v2148_v0, %v2147_v61  ;;  %v13738_v9 = vpop.f32.mrf.mxu0  ;;  %11265 = vmatprep.subr.bf16.mxu1 %v11592_v18  ;;  %2961 = vmatmul.mubr.bf16.gmra.mxu0 %v13659_v48  ;;  %v2127_v63 = vadd.f32 %v11111_v51, %v2046_v50  ;;  %v2324_v61 = vrot.slane %v13694_v31, 3 }
 0x236   : > { %v2049_v41 = vadd.f32 %v11062_v22, %v13649_v10  ;;  %v11113_v14 = vpop.f32.mrf.mxu1  ;;  %11218 = vmatpush3.bf16.msra.mxu0 %v11586_v34  ;;  %v11606_v34 = vld [vmem:[%s16930_s5 + $0x1c0] sm:$0xff]  }
 0x237   : > { %v11114_v1 = vadd.f32 %v11113_v14, %v11112_v7  ;;  %v2228_v27 = vrot.slane %v13736_v56, 5  ;;  %v2214_v29 = vrot.slane %v13736_v56, 1  ;;  %v13750_v45 = vpop.f32.mrf.mxu0  ;;  %v13758_v12 = vshll.u32 %v13736_v56, 16  ;;  %11219 = vmatprep.subr.bf16.mxu0 %v11589_v58  ;;  %v11604_v7 = vld [vmem:[%s16930_s5 + $0x108] sm:$0xff]   ;;  %v11607_v14 = vld [vmem:[%s16930_s5 + $0x140] sm:$0xff]  }
 0x238   : > { %v13752_v60 = vpop.f32.mrf.mxu1  ;;  %11266 = vmatpush3.bf16.msra.mxu1 %v11593_v24  ;;  %v2149_v33 = vmax.f32 %v2127_v63, 0.0  ;;  %v13797_v2 = vshrl.u32 %v13736_v56, 16  ;;  %v11065_v63 = vadd.f32 %v13750_v45, %v13738_v9 }
 0x239   : > { %v2130_v11 = vadd.f32 %v11114_v1, %v2049_v41  ;;  %v2229_v38 = vsel %vm1657_vm1, %v2226_v44, %v2228_v27  ;;  %v2215_v55 = vsel %vm2208_vm3, %v2212_v46, %v2214_v29  ;;  %11267 = vmatprep.subr.bf16.mxu1 %v11596_v59  ;;  %v2185_v26 = vrot.slane %v13758_v12, 1  ;;  %v11066_v19 = vpop.f32.mrf.mxu0  ;;  %v11601_v44 = vld [vmem:[%s16930_s5 + $0x190] sm:$0xff]  }
 0x23a   : > { %3040 = vmatprep.mubr.bf16.mxu1 %v2229_v38  ;;  %11220 = vmatpush3.bf16.msra.mxu0 %v11591_v43  ;;  %v13776_v40 = vpop.f32.mrf.mxu1  ;;  %v2293_v41 = vrot.slane %v13707_v28, 2  ;;  %v2294_v1 = vrot.slane %v13670_v39, 3  ;;  %v2326_v43 = vrot.slane %v13736_v56, 3 }
 0x23b   : > { %v2150_v15 = vmax.f32 %v2130_v11, 0.0  ;;  %3041 = vmatmul.mubr.bf16.gmra.mxu1 %v2215_v55  ;;  %v2186_v42 = vsel %vm1596_vm0, %v2181_v23, %v2185_v26  ;;  %11221 = vmatprep.subr.bf16.mxu0 %v11594_v36  ;;  %v11067_v47 = vpop.f32.mrf.mxu0  ;;  %v2189_v0 = vor.u32 %v13797_v2, %v2185_v26  ;;  %v2298_v36 = vor.u32 %v2297_v53, %v2296_v32  ;;  %v11609_v11 = vld [vmem:[%s16930_s5 + $0x100] sm:$0xff]  }
 0x23c   : > { %11268 = vmatpush3.bf16.msra.mxu1 %v11597_v5  ;;  %2968 = vmatprep.mubr.bf16.mxu0 %v2186_v42  ;;  %v11118_v49 = vpop.f32.mrf.mxu1  ;;  %v11068_v22 = vadd.f32 %v11067_v47, %v11066_v19  ;;  %v13848_v38 = vsel %vm2322_vm4, %v2324_v61, %v2326_v43  ;;  %v11117_v23 = vadd.f32 %v13776_v40, %v13752_v60  ;;  %v2300_v19 = vrot.slane %v13797_v2, 2 }
 0x23d   : > { %v13785_v46 = vpack.c.bf16 %v2150_v15, %v2149_v33  ;;  %11269 = vmatprep.subr.bf16.mxu1 %v11600_v57  ;;  %2969 = vmatmul.mubr.bf16.gmra.mxu0 %v13694_v31  ;;  %v2054_v57 = vadd.f32 %v11065_v63, %v13649_v10  ;;  %v2295_v26 = vor.u32 %v2294_v1, %v2293_v41  ;;  %v2263_v33 = vrot.slane %v13659_v48, 6 }
 0x23e   : > { %11222 = vmatpush3.bf16.msra.mxu0 %v11595_v13  ;;  %v11119_v58 = vpop.f32.mrf.mxu1  ;;  %v2057_v9 = vadd.f32 %v11068_v22, %v13649_v10  ;;  %v2301_v42 = vrot.slane %v13758_v12, 3  ;;  %v2262_v10 = vrot.slane %v13654_v16, 6  ;;  %v2240_v40 = vrot.slane %v13707_v28, 5  ;;  %v11610_v16 = vld [vmem:[%s16930_s5 + $0x238] sm:$0xff]  }
 0x23f   : > { %v2230_v3 = vrot.slane %v13785_v46, 5  ;;  %v2216_v30 = vrot.slane %v13785_v46, 1  ;;  %v13800_v6 = vshll.u32 %v13785_v46, 16  ;;  %11223 = vmatprep.subr.bf16.mxu0 %v11598_v17  ;;  %v13815_v51 = vshrl.u32 %v13785_v46, 16 }
 0x240   : > { %11270 = vmatpush3.bf16.msra.mxu1 %v11601_v44  ;;  %v2328_v5 = vrot.slane %v13785_v46, 3  ;;  %v11120_v45 = vadd.f32 %v11119_v58, %v11118_v49  ;;  %v2299_v13 = vsel %vm2292_vm5, %v2295_v26, %v2298_v36  ;;  %v12890_v17 = vmov 0.0  }
 0x241   : > { %v2231_v18 = vsel %vm1657_vm1, %v2228_v27, %v2230_v3  ;;  %v2217_v20 = vsel %vm2208_vm3, %v2214_v29, %v2216_v30  ;;  %11271 = vmatprep.subr.bf16.mxu1 %v11603_v37  ;;  %v2193_v50 = vrot.slane %v13800_v6, 1  ;;  %v11608_v27 = vld [vmem:[%s16930_s5 + $0x180] sm:$0xff]   ;;  %v13838_v29 = vsel %vm2322_vm4, %v2323_v8, %v2324_v61 }
 0x242   : > { %3048 = vmatprep.mubr.bf16.mxu1 %v2231_v18  ;;  %11224 = vmatpush3.bf16.msra.mxu0 %v11599_v54  ;;  %v13853_v55 = vsel %vm2322_vm4, %v2326_v43, %v2328_v5  ;;  %v2138_v15 = vadd.f32 %v11120_v45, %v2057_v9  ;;  %v2135_v60 = vadd.f32 %v11117_v23, %v2054_v57  ;;  %v2241_v44 = vrot.slane %v13670_v39, 6  ;;  %v11613_v9 = vld [vmem:[%s16930_s5 + $0x220] sm:$0xff]   ;;  %v11614_v57 = vld [vmem:[%s16930_s5 + $0x218] sm:$0xff]  }
 0x243   : > { %3049 = vmatmul.mubr.bf16.gmra.mxu1 %v2217_v20  ;;  %v2194_v24 = vsel %vm1596_vm0, %v2189_v0, %v2193_v50  ;;  %v2197_v59 = vor.u32 %v13815_v51, %v2193_v50  ;;  %11225 = vmatprep.subr.bf16.mxu0 %v11602_v35  ;;  %v2237_v37 = vrot.slane %v2160_v25, 5  ;;  %v2238_v54 = vrot.slane %v2162_v4, 6 }
 0x244   : > { %3056 = vmatprep.mubr.bf16.mxu1 %v2230_v3  ;;  %2976 = vmatprep.mubr.bf16.mxu0 %v2194_v24  ;;  %v2264_v3 = vsel %vm2261_vm6, %v2262_v10, %v2263_v33  ;;  %v2152_v47 = vmax.f32 %v2138_v15, 0.0  ;;  %v2302_v49 = vor.u32 %v2301_v42, %v2300_v19  ;;  %v2278_v28 = vrot.slane %v13659_v48, 2  ;;  %v11615_v19 = vld [vmem:[%s16930_s5 + $0x210] sm:$0xff]  }
 0x245   : > { %11272 = vmatpush3.bf16.msra.mxu1 %v11605_v21  ;;  %2977 = vmatmul.mubr.bf16.gmra.mxu0 %v13736_v56  ;;  %v2151_v35 = vmax.f32 %v2135_v60, 0.0  ;;  %v2242_v39 = vor.u32 %v2241_v44, %v2240_v40  ;;  %v2239_v25 = vor.u32 %v2238_v54, %v2237_v37  ;;  %v2265_v20 = vrot.slane %v13694_v31, 6  ;;  %v11617_v60 = vld [vmem:[%s16930_s5 + $0x200] sm:$0xff]  }
 0x246   : > { %11273 = vmatprep.subr.bf16.mxu1 %v11606_v34  ;;  %2984 = vmatprep.mubr.bf16.mxu0 %v2197_v59  ;;  %v2303_v32 = vsel %vm2292_vm5, %v2298_v36, %v2302_v49  ;;  %v2304_v4 = vrot.slane %v13815_v51, 2  ;;  %v2305_v48 = vrot.slane %v13800_v6, 3  ;;  %v2244_v0 = vrot.slane %v13755_v62, 5  ;;  %v11611_v34 = vld [vmem:[%s16930_s5 + $0x230] sm:$0xff]   ;;  %v11612_v59 = vld [vmem:[%s16930_s5 + $0x228] sm:$0xff]  }
 0x247   : > { %11226 = vmatpush3.bf16.msra.mxu0 %v11604_v7  ;;  %v13876_v21 = vpack.c.bf16 %v2152_v47, %v2151_v35  ;;  %v2243_v61 = vsel %vm1677_vm2, %v2239_v25, %v2242_v39  ;;  %v2266_v50 = vsel %vm2261_vm6, %v2263_v33, %v2265_v20  ;;  %v2281_v53 = vrot.slane %v13736_v56, 2 }
 0x248   : > { %11227 = vmatprep.subr.bf16.mxu0 %v11607_v14  ;;  %v2306_v22 = vor.u32 %v2305_v48, %v2304_v4  ;;  %v2267_v58 = vrot.slane %v13736_v56, 6  ;;  %v2248_v1 = vrot.slane %v13797_v2, 5  ;;  %v2283_v43 = vrot.slane %v13785_v46, 2 }
 0x249   : > { %11274 = vmatpush3.bf16.msra.mxu1 %v11608_v27  ;;  %v2309_v7 = vshrl.u32 %v13876_v21, 16  ;;  %v2312_v8 = vshll.u32 %v13876_v21, 16  ;;  %v2249_v27 = vrot.slane %v13758_v12, 6  ;;  %v2269_v2 = vrot.slane %v13785_v46, 6 }
 0x24a   : > { %v2307_v24 = vsel %vm2292_vm5, %v2302_v49, %v2306_v22  ;;  %v2268_v56 = vsel %vm2261_vm6, %v2265_v20, %v2267_v58  ;;  %v2252_v26 = vrot.slane %v13815_v51, 5  ;;  %v2253_v33 = vrot.slane %v13800_v6, 6  ;;  %v11616_v6 = vld [vmem:[%s16930_s5 + $0x208] sm:$0xff]  }
 0x24b   : > { %3057 = vmatmul.mubr.bf16.gmra.mxu1 %v2216_v30  ;;  %11228 = vmatpush3.bf16.msra.mxu0 %v11609_v11  ;;  %v2279_v30 = vrot.slane %v13694_v31, 2  ;;  %v2245_v31 = vrot.slane %v13710_v52, 6  ;;  %v2311_v41 = vrot.slane %v2309_v7, 2  ;;  %v2314_v14 = vrot.slane %v2312_v8, 3  ;;  %v11623_v7 = vld [vmem:[%s16932_s7 + $0xe4] ss:$16 sps:$4 sm:$0xff]  }
 0x24c   : > { %3168 = vmatprep.mubr.bf16.mxu1 %v2299_v13  ;;  %11362 = vmatprep.subr.bf16.mxu0 %v12890_v17  ;;  %v2250_v45 = vor.u32 %v2249_v27, %v2248_v1  ;;  %v2284_v11 = vsel %vm2277_vm7, %v2281_v53, %v2283_v43  ;;  %v2270_v15 = vsel %vm2261_vm6, %v2267_v58, %v2269_v2  ;;  %v2285_v13 = vrot.slane %v13876_v21, 2  ;;  %v11626_v8 = vld [vmem:[%s16932_s7 + $0x2c4] ss:$16 sps:$4 sm:$0xff]   ;;  %v11627_v1 = vld [vmem:[%s16932_s7 + $0xc0] ss:$16 sps:$4 sm:$0xff]  }
 0x24d   : > { %2985 = vmatmul.mubr.bf16.gmra.mxu0 %v13785_v46  ;;  %v2280_v18 = vsel %vm2277_vm7, %v2278_v28, %v2279_v30  ;;  %v2246_v62 = vor.u32 %v2245_v31, %v2244_v0  ;;  %v2282_v52 = vsel %vm2277_vm7, %v2279_v30, %v2281_v53  ;;  %v2315_v36 = vor.u32 %v2314_v14, %v2311_v41  ;;  %v11618_v31 = vld [vmem:[%s16932_s7 + $0x2e0] ss:$16 sps:$4 sm:$0xff]   ;;  %v11629_v58 = vld [vmem:[%s16932_s7 + $0xc4] ss:$16 sps:$4 sm:$0xff]  }
 0x24e   : > { %3096 = vmatprep.mubr.bf16.mxu0 %v2264_v3  ;;  %v2254_v42 = vor.u32 %v2253_v33, %v2252_v26  ;;  %v2286_v10 = vsel %vm2277_vm7, %v2283_v43, %v2285_v13  ;;  %v2330_v40 = vrot.slane %v13876_v21, 3  ;;  %v11621_v53 = vld [vmem:[%s16932_s7 + $0xe0] ss:$16 sps:$4 sm:$0xff]   ;;  %8252 = vmatprep.subr.bf16.mxu1 %v11623_v7  ;;  %v11632_v27 = vld [vmem:[%s16932_s7 + $0x2a4] ss:$16 sps:$4 sm:$0xff]  }
 0x24f   : > { %v2247_v63 = vsel %vm1677_vm2, %v2242_v39, %v2246_v62  ;;  %v2316_v12 = vsel %vm2292_vm5, %v2306_v22, %v2315_v36  ;;  %v2251_v23 = vsel %vm1677_vm2, %v2246_v62, %v2250_v45  ;;  %v11633_v26 = vld [vmem:[%s16932_s7 + $0xa0] ss:$16 sps:$4 sm:$0xff]   ;;  %v11638_v33 = vld [vmem:[%s16932_s7 + $0x284] ss:$16 sps:$4 sm:$0xff]  }
 0x250   : > { %v2255_v51 = vsel %vm1677_vm2, %v2250_v45, %v2254_v42  ;;  %v2331_v44 = vsel %vm2322_vm4, %v2328_v5, %v2330_v40 }
 0x253   : > { %3169 = vmatmul.mubr.bf16.vlgmr.msra.gmra.mxu1 %v2280_v18 }
 0x254   : > { %3176 = vmatprep.mubr.bf16.mxu1 %v2303_v32  ;;  %8253 = vmatpush1.bf16.msra.mxu1 %v11621_v53  ;;  %v11651_v53 = vld [vmem:[%s16932_s7 + $0x40] ss:$16 sps:$4 sm:$0xff]  }
 0x255   : > { %3097 = vmatmul.mubr.bf16.vlgmr.msra.gmra.mxu0 %v2243_v61  ;;  %8254 = vmatprep.subr.bf16.mxu1 %v11629_v58 }
 0x256   : > { %3104 = vmatprep.mubr.bf16.mxu0 %v2266_v50  ;;  %11363 = vmatpush3.bf16.msra.mxu0 %v11610_v16  ;;  %v11620_v50 = vld [vmem:[%s16932_s7 + $0x2e4] ss:$16 sps:$4 sm:$0xff]  }
 0x257   : > { %11364 = vmatprep.subr.bf16.mxu0 %v12890_v17 }
 0x258   : > { %8255 = vmatpush1.bf16.msra.mxu1 %v11627_v1  ;;  %v11657_v1 = vld [vmem:[%s16932_s7 + $0x20] ss:$16 sps:$4 sm:$0xff]  }
 0x25a   : > { %11365 = vmatpush3.bf16.msra.mxu0 %v11611_v34 }
 0x25b   : > { %3177 = vmatmul.mubr.bf16.gmra.mxu1 %v2282_v52  ;;  %11366 = vmatprep.subr.bf16.mxu0 %v12890_v17 }
 0x25c   : > { %3184 = vmatprep.mubr.bf16.mxu1 %v2307_v24 }
 0x25d   : > { %3105 = vmatmul.mubr.bf16.gmra.mxu0 %v2247_v63 }
 0x25e   : > { %3112 = vmatprep.mubr.bf16.mxu0 %v2268_v56  ;;  %11367 = vmatpush3.bf16.msra.mxu0 %v11612_v59  ;;  %v11624_v59 = vld [vmem:[%s16932_s7 + $0x2c0] ss:$16 sps:$4 sm:$0xff]  }
 0x25f   : > { %11368 = vmatprep.subr.bf16.mxu0 %v12890_v17 }
 0x262   : > { %11369 = vmatpush3.bf16.msra.mxu0 %v11613_v9 }
 0x263   : > { %3185 = vmatmul.mubr.bf16.gmra.mxu1 %v2284_v11  ;;  %11370 = vmatprep.subr.bf16.mxu0 %v12890_v17 }
 0x264   : > { %3192 = vmatprep.mubr.bf16.mxu1 %v2316_v12 }
 0x265   : > { %3113 = vmatmul.mubr.bf16.gmra.mxu0 %v2251_v23 }
 0x266   : > { %3120 = vmatprep.mubr.bf16.mxu0 %v2270_v15  ;;  %11371 = vmatpush3.bf16.msra.mxu0 %v11614_v57 }
 0x267   : > { %11372 = vmatprep.subr.bf16.mxu0 %v12890_v17 }
 0x26a   : > { %11373 = vmatpush3.bf16.msra.mxu0 %v11615_v19  ;;  %v11641_v19 = vld [vmem:[%s16932_s7 + $0x84] ss:$16 sps:$4 sm:$0xff]  }
 0x26b   : > { %3193 = vmatmul.mubr.bf16.gmra.mxu1 %v2286_v10  ;;  %11374 = vmatprep.subr.bf16.mxu0 %v12890_v17 }
 0x26c   : > { %3200 = vmatprep.mubr.bf16.mxu1 %v2315_v36  ;;  %v11635_v36 = vld [vmem:[%s16932_s7 + $0xa4] ss:$16 sps:$4 sm:$0xff]  }
 0x26d   : > { %3121 = vmatmul.mubr.bf16.gmra.mxu0 %v2255_v51  ;;  %8256 = vmatprep.subr.bf16.mxu1 %v11635_v36  ;;  %v11636_v51 = vld [vmem:[%s16932_s7 + $0x280] ss:$16 sps:$4 sm:$0xff]  }
 0x26e   : > { %3128 = vmatprep.mubr.bf16.mxu0 %v2269_v2  ;;  %11375 = vmatpush3.bf16.msra.mxu0 %v11616_v6  ;;  %v11630_v2 = vld [vmem:[%s16932_s7 + $0x2a0] ss:$16 sps:$4 sm:$0xff]  }
 0x26f   : > { %11376 = vmatprep.subr.bf16.mxu0 %v12890_v17  ;;  %8257 = vmatpush1.bf16.msra.mxu1 %v11633_v26 }
 0x270   : > { %8258 = vmatprep.subr.bf16.mxu1 %v11641_v19  ;;  %v11666_v19 = vld [vmem:[%s16932_s7 + $0x3e0] ss:$16 sps:$4 sm:$0xff]  }
 0x272   : > { %11377 = vmatpush3.bf16.msra.mxu0 %v11617_v60 }
 0x273   : > { %3201 = vmatmul.mubr.bf16.gmra.mxu1 %v2285_v13  ;;  %8293 = vmatprep.subr.bf16.mxu0 %v11620_v50 }
 0x275   : > { %3129 = vmatmul.mubr.bf16.gmra.mxu0 %v2254_v42 }
 0x276   : > { %11378 = vmatprep.mubr.msk.bf16.mxu0 %vm12891_vm8, %v12890_v17 }
 0x27d   : > { %11379 = vmatmul.mubr.bf16.vlgmr.msra.gmra.mxu0 %v13838_v29 }
 0x27e   : > { %11382 = vmatprep.mubr.msk.bf16.mxu0 %vm12891_vm8, %v12890_v17  ;;  %8294 = vmatpush1.bf16.msra.mxu0 %v11618_v31 }
 0x27f   : > { %8295 = vmatprep.subr.bf16.mxu0 %v11626_v8  ;;  %v11659_v8 = vld [vmem:[%s16932_s7 + $0x24] ss:$16 sps:$4 sm:$0xff]  }
 0x282   : > { %8296 = vmatpush1.bf16.msra.mxu0 %v11624_v59 }
 0x283   : > { %8297 = vmatprep.subr.bf16.mxu0 %v11632_v27  ;;  %v11662_v27 = vld [vmem:[%s16932_s7 + $0x204] ss:$16 sps:$4 sm:$0xff]  }
 0x285   : > { %11383 = vmatmul.mubr.bf16.gmra.mxu0 %v13848_v38 }
 0x286   : > { %11386 = vmatprep.mubr.msk.bf16.mxu0 %vm12891_vm8, %v12890_v17  ;;  %8298 = vmatpush1.bf16.msra.mxu0 %v11630_v2 }
 0x287   : > { %8299 = vmatprep.subr.bf16.mxu0 %v11638_v33  ;;  %v11671_v33 = vld [vmem:[%s16932_s7 + $0x1e4] ss:$16 sps:$4 sm:$0xff]  }
 0x28a   : > { %8300 = vmatpush1.bf16.msra.mxu0 %v11636_v51 }
 0x28d   : > { %11387 = vmatmul.mubr.bf16.gmra.mxu0 %v13853_v55  ;;  %v13952_v55 = vld [vmem:[%s16931_s6] ss:$0 sm:$0xff] }
 0x28e   : > { %11390 = vmatprep.mubr.msk.bf16.mxu0 %vm12891_vm8, %v12890_v17 }
 0x295   : > { %11391 = vmatmul.mubr.bf16.gmra.mxu0 %v2331_v44 }
 0x296   : > { %11394 = vmatprep.mubr.msk.bf16.mxu0 %vm12891_vm8, %v12890_v17 }
 0x29d   : > { %11395 = vmatmul.mubr.bf16.gmra.mxu0 %v2330_v40 }
 0x2eb   : > { %v11183_v29 = vpop.f32.mrf.mxu1 }
 0x2ed   : > { %v11184_v37 = vpop.f32.mrf.mxu1  ;;  %v11137_v3 = vpop.f32.mrf.mxu0 }
 0x2ee   : > { %v11185_v38 = vadd.f32 %v11184_v37, %v11183_v29  ;;  %v11639_v29 = vld [vmem:[%s16932_s7 + $0x80] ss:$16 sps:$4 sm:$0xff]   ;;  %v11644_v37 = vld [vmem:[%s16932_s7 + $0x264] ss:$16 sps:$4 sm:$0xff]  }
 0x2ef   : > { %v11186_v30 = vpop.f32.mrf.mxu1  ;;  %v11138_v54 = vpop.f32.mrf.mxu0  ;;  %8259 = vmatpush1.bf16.msra.mxu1 %v11639_v29  ;;  %8301 = vmatprep.subr.bf16.mxu0 %v11644_v37  ;;  %v11672_v37 = vld [vmem:[%s16932_s7 + $0x3c0] ss:$16 sps:$4 sm:$0xff]  }
 0x2f0   : > { %v11139_v47 = vadd.f32 %v11138_v54, %v11137_v3 }
 0x2f1   : > { %v11187_v49 = vpop.f32.mrf.mxu1  ;;  %v11140_v46 = vpop.f32.mrf.mxu0 }
 0x2f2   : > { %v11188_v28 = vadd.f32 %v11187_v49, %v11186_v30  ;;  %v2955_v5 = vadd.f32 %v11139_v47, %v13952_v55  ;;  %v11647_v30 = vld [vmem:[%s16932_s7 + $0x64] ss:$16 sps:$4 sm:$0xff]  }
 0x2f3   : > { %v11189_v35 = vpop.f32.mrf.mxu1  ;;  %v11141_v17 = vpop.f32.mrf.mxu0  ;;  %8260 = vmatprep.subr.bf16.mxu1 %v11647_v30  ;;  %v11680_v30 = vld [vmem:[%s16932_s7 + $0x3a4] ss:$16 sps:$4 sm:$0xff]  }
 0x2f4   : > { %v11142_v39 = vadd.f32 %v11141_v17, %v11140_v46  ;;  %v13955_v25 = vadd.f32 %v11185_v38, %v2955_v5  ;;  %v11642_v46 = vld [vmem:[%s16932_s7 + $0x260] ss:$16 sps:$4 sm:$0xff]  }
 0x2f5   : > { %v11190_v18 = vpop.f32.mrf.mxu1  ;;  %v11143_v20 = vpop.f32.mrf.mxu0  ;;  %v11645_v17 = vld [vmem:[%s16932_s7 + $0x60] ss:$16 sps:$4 sm:$0xff]   ;;  %8302 = vmatpush1.bf16.msra.mxu0 %v11642_v46 }
 0x2f6   : > { %v11191_v21 = vadd.f32 %v11190_v18, %v11189_v35  ;;  %v2958_v32 = vadd.f32 %v11142_v39, %v13952_v55  ;;  %v11650_v39 = vld [vmem:[%s16932_s7 + $0x244] ss:$16 sps:$4 sm:$0xff]   ;;  %8261 = vmatpush1.bf16.msra.mxu1 %v11645_v17  ;;  %v11681_v17 = vld [vmem:[%s16932_s7 + $0x1a0] ss:$16 sps:$4 sm:$0xff]  }
 0x2f7   : > { %v11192_v16 = vpop.f32.mrf.mxu1  ;;  %v11144_v4 = vpop.f32.mrf.mxu0  ;;  %8303 = vmatprep.subr.bf16.mxu0 %v11650_v39  ;;  %v11686_v39 = vld [vmem:[%s16932_s7 + $0x384] ss:$16 sps:$4 sm:$0xff]  }
 0x2f8   : > { %v11145_v48 = vadd.f32 %v11144_v4, %v11143_v20  ;;  %v13958_v0 = vadd.f32 %v11188_v28, %v2958_v32 }
 0x2f9   : > { %v11193_v61 = vpop.f32.mrf.mxu1  ;;  %v11146_v34 = vpop.f32.mrf.mxu0 }
 0x2fa   : > { %v11194_v22 = vadd.f32 %v11193_v61, %v11192_v16  ;;  %v2963_v62 = vadd.f32 %v11145_v48, %v13952_v55  ;;  %v11648_v48 = vld [vmem:[%s16932_s7 + $0x240] ss:$16 sps:$4 sm:$0xff]  }
 0x2fb   : > { %v11195_v52 = vpop.f32.mrf.mxu1  ;;  %v11147_v24 = vpop.f32.mrf.mxu0  ;;  %8304 = vmatpush1.bf16.msra.mxu0 %v11648_v48  ;;  %v11687_v48 = vld [vmem:[%s16932_s7 + $0x180] ss:$16 sps:$4 sm:$0xff]  }
 0x2fc   : > { %v11148_v41 = vadd.f32 %v11147_v24, %v11146_v34  ;;  %v13982_v63 = vadd.f32 %v11191_v21, %v2963_v62  ;;  %v11653_v21 = vld [vmem:[%s16932_s7 + $0x44] ss:$16 sps:$4 sm:$0xff]   ;;  %v11654_v24 = vld [vmem:[%s16932_s7 + $0x220] ss:$16 sps:$4 sm:$0xff]  }
 0x2fd   : > { %v11196_v14 = vpop.f32.mrf.mxu1  ;;  %v11149_v56 = vpop.f32.mrf.mxu0  ;;  %v11656_v34 = vld [vmem:[%s16932_s7 + $0x224] ss:$16 sps:$4 sm:$0xff]   ;;  %8262 = vmatprep.subr.bf16.mxu1 %v11653_v21 }
 0x2fe   : > { %v11197_v43 = vadd.f32 %v11196_v14, %v11195_v52  ;;  %v2966_v9 = vadd.f32 %v11148_v41, %v13952_v55  ;;  %8263 = vmatpush1.bf16.msra.mxu1 %v11651_v53  ;;  %8305 = vmatprep.subr.bf16.mxu0 %v11656_v34  ;;  %v11695_v53 = vld [vmem:[%s16932_s7 + $0x164] ss:$16 sps:$4 sm:$0xff]  }
 0x2ff   : > { %v11198_v45 = vpop.f32.mrf.mxu1  ;;  %v11150_v11 = vpop.f32.mrf.mxu0  ;;  %8264 = vmatprep.subr.bf16.mxu1 %v11659_v8  ;;  %8306 = vmatpush1.bf16.msra.mxu0 %v11654_v24  ;;  %v11701_v24 = vld [vmem:[%s16932_s7 + $0x144] ss:$16 sps:$4 sm:$0xff]  }
 0x300   : > { %v11151_v12 = vadd.f32 %v11150_v11, %v11149_v56  ;;  %v13997_v23 = vadd.f32 %v11194_v22, %v2966_v9  ;;  %v11660_v11 = vld [vmem:[%s16932_s7 + $0x200] ss:$16 sps:$4 sm:$0xff]   ;;  %8307 = vmatprep.subr.bf16.mxu0 %v11662_v27 }
 0x301   : > { %v11199_v57 = vpop.f32.mrf.mxu1  ;;  %v11152_v15 = vpop.f32.mrf.mxu0 }
 0x302   : > { %v11200_v13 = vadd.f32 %v11199_v57, %v11198_v45  ;;  %v2971_v42 = vadd.f32 %v11151_v12, %v13952_v55  ;;  %8265 = vmatpush1.bf16.msra.mxu1 %v11657_v1  ;;  %v11663_v57 = vld [vmem:[%s16932_s7] ss:$16 sps:$4 sm:$0xff]  }
 0x303   : > { %v11201_v10 = vpop.f32.mrf.mxu1  ;;  %v11153_v6 = vpop.f32.mrf.mxu0  ;;  %8308 = vmatpush1.bf16.msra.mxu0 %v11660_v11  ;;  %v11696_v1 = vld [vmem:[%s16932_s7 + $0x340] ss:$16 sps:$4 sm:$0xff]  }
 0x304   : > { %v11154_v60 = vadd.f32 %v11153_v6, %v11152_v15  ;;  %v14012_v44 = vadd.f32 %v11197_v43, %v2971_v42  ;;  %v11665_v43 = vld [vmem:[%s16932_s7 + $0x4] ss:$16 sps:$4 sm:$0xff]  }
 0x305   : > { %v11202_v40 = vpop.f32.mrf.mxu1  ;;  %v11155_v3 = vpop.f32.mrf.mxu0  ;;  %8266 = vmatprep.subr.bf16.mxu1 %v11665_v43  ;;  %v11674_v6 = vld [vmem:[%s16932_s7 + $0x3c4] ss:$16 sps:$4 sm:$0xff]  }
 0x306   : > { %v11203_v38 = vadd.f32 %v11202_v40, %v11201_v10  ;;  %v2974_v54 = vadd.f32 %v11154_v60, %v13952_v55  ;;  %8267 = vmatpush1.bf16.msra.mxu1 %v11663_v57  ;;  %v11669_v10 = vld [vmem:[%s16932_s7 + $0x1e0] ss:$16 sps:$4 sm:$0xff]   ;;  %v11677_v60 = vld [vmem:[%s16932_s7 + $0x1c4] ss:$16 sps:$4 sm:$0xff]  }
 0x307   : > { %v11204_v47 = vpop.f32.mrf.mxu1  ;;  %v11156_v49 = vpop.f32.mrf.mxu0  ;;  %8268 = vmatprep.subr.bf16.mxu1 %v11671_v33  ;;  %v11704_v43 = vld [vmem:[%s16932_s7 + $0x324] ss:$16 sps:$4 sm:$0xff]  }
 0x308   : > { %v11157_v28 = vadd.f32 %v11156_v49, %v11155_v3  ;;  %v14027_v35 = vadd.f32 %v11200_v13, %v2974_v54 }
 0x309   : > { %v11205_v5 = vpop.f32.mrf.mxu1  ;;  %v11158_v18 = vpop.f32.mrf.mxu0 }
 0x30a   : > { %v11206_v20 = vadd.f32 %v11205_v5, %v11204_v47  ;;  %v2979_v32 = vadd.f32 %v11157_v28, %v13952_v55  ;;  %8269 = vmatpush2.bf16.msra.mxu1 %v11669_v10  ;;  %v11683_v47 = vld [vmem:[%s16932_s7 + $0x1a4] ss:$16 sps:$4 sm:$0xff]   ;;  %v11678_v28 = vld [vmem:[%s16932_s7 + $0x3a0] ss:$16 sps:$4 sm:$0xff]  }
 0x30b   : > { %v11207_v16 = vpop.f32.mrf.mxu1  ;;  %v11159_v4 = vpop.f32.mrf.mxu0  ;;  %8270 = vmatprep.subr.bf16.mxu1 %v11677_v60 }
 0x30c   : > { %v11160_v61 = vadd.f32 %v11159_v4, %v11158_v18  ;;  %v14042_v50 = vadd.f32 %v11203_v38, %v2979_v32  ;;  %v11675_v38 = vld [vmem:[%s16932_s7 + $0x1c0] ss:$16 sps:$4 sm:$0xff]  }
 0x30d   : > { %v11208_v31 = vpop.f32.mrf.mxu1  ;;  %v11161_v22 = vpop.f32.mrf.mxu0 }
 0x30e   : > { %v11209_v7 = vadd.f32 %v11208_v31, %v11207_v16  ;;  %v2982_v62 = vadd.f32 %v11160_v61, %v13952_v55  ;;  %8271 = vmatpush2.bf16.msra.mxu1 %v11675_v38  ;;  %v11684_v16 = vld [vmem:[%s16932_s7 + $0x380] ss:$16 sps:$4 sm:$0xff]   ;;  %v11692_v61 = vld [vmem:[%s16932_s7 + $0x364] ss:$16 sps:$4 sm:$0xff]  }
 0x30f   : > { %v11210_v52 = vpop.f32.mrf.mxu1  ;;  %v11162_v58 = vpop.f32.mrf.mxu0  ;;  %8272 = vmatprep.subr.bf16.mxu1 %v11683_v47 }
 0x310   : > { %v11163_v59 = vadd.f32 %v11162_v58, %v11161_v22  ;;  %v14057_v14 = vadd.f32 %v11206_v20, %v2982_v62  ;;  %v11689_v20 = vld [vmem:[%s16932_s7 + $0x184] ss:$16 sps:$4 sm:$0xff]   ;;  %v11693_v62 = vld [vmem:[%s16932_s7 + $0x160] ss:$16 sps:$4 sm:$0xff]  }
 0x311   : > { %v11211_v41 = vpop.f32.mrf.mxu1  ;;  %v11164_v56 = vpop.f32.mrf.mxu0  ;;  %v11698_v52 = vld [vmem:[%s16932_s7 + $0x344] ss:$16 sps:$4 sm:$0xff]  }
 0x312   : > { %v2987_v36 = vadd.f32 %v11163_v59, %v13952_v55  ;;  %v11668_v55 = vld [vmem:[%s16932_s7 + $0x3e4] ss:$16 sps:$4 sm:$0xff]   ;;  %8273 = vmatpush2.bf16.msra.mxu1 %v11681_v17  ;;  %v11699_v56 = vld [vmem:[%s16932_s7 + $0x140] ss:$16 sps:$4 sm:$0xff]  }
 0x313   : > { %v14069_v9 = vpop.f32.mrf.mxu1  ;;  %v11165_v45 = vpop.f32.mrf.mxu0  ;;  %8309 = vmatprep.subr.bf16.mxu0 %v11668_v55  ;;  %8274 = vmatprep.subr.bf16.mxu1 %v11689_v20  ;;  %v11702_v55 = vld [vmem:[%s16932_s7 + $0x320] ss:$16 sps:$4 sm:$0xff]  }
 0x314   : > { %v14076_v12 = vadd.f32 %v11209_v7, %v2987_v36  ;;  %8310 = vmatpush2.bf16.msra.mxu0 %v11666_v19  ;;  %v11690_v7 = vld [vmem:[%s16932_s7 + $0x360] ss:$16 sps:$4 sm:$0xff]   ;;  %v11707_v45 = vld [vmem:[%s16932_s7 + $0x124] ss:$16 sps:$4 sm:$0xff]  }
 0x315   : > { %v14074_v2 = vpop.f32.mrf.mxu1  ;;  %v14084_v26 = vpop.f32.mrf.mxu0  ;;  %8311 = vmatprep.subr.bf16.mxu0 %v11674_v6  ;;  %v11705_v19 = vld [vmem:[%s16932_s7 + $0x120] ss:$16 sps:$4 sm:$0xff]  }
 0x316   : > { %8275 = vmatpush2.bf16.msra.mxu1 %v11687_v48 }
 0x317   : > { %v14089_v15 = vpop.f32.mrf.mxu1  ;;  %v14091_v13 = vpop.f32.mrf.mxu0  ;;  %8276 = vmatprep.subr.bf16.mxu1 %v11695_v53 }
 0x318   : > { %8312 = vmatpush2.bf16.msra.mxu0 %v11672_v37 }
 0x319   : > { %v14096_v42 = vpop.f32.mrf.mxu1  ;;  %v14104_v51 = vpop.f32.mrf.mxu0  ;;  %8313 = vmatprep.subr.bf16.mxu0 %v11680_v30  ;;  %v11231_v30 = vadd.f32 %v14091_v13, %v14084_v26  ;;  %v11708_v26 = vld [vmem:[%s16932_s7 + $0x300] ss:$16 sps:$4 sm:$0xff]   ;;  %v11710_v13 = vld [vmem:[%s16932_s7 + $0x304] ss:$16 sps:$4 sm:$0xff]  }
 0x31a   : > { %8277 = vmatpush2.bf16.msra.mxu1 %v11693_v62 }
 0x31b   : > { %v14109_v40 = vpop.f32.mrf.mxu1  ;;  %v14111_v29 = vpop.f32.mrf.mxu0  ;;  %8278 = vmatprep.subr.bf16.mxu1 %v11701_v24 }
 0x31c   : > { %8314 = vmatpush2.bf16.msra.mxu0 %v11678_v28  ;;  %v11234_v17 = vadd.f32 %v14111_v29, %v14104_v51  ;;  %v11280_v51 = vadd.f32 %v14096_v42, %v14089_v15 }
 0x31d   : > { %v14116_v3 = vpop.f32.mrf.mxu1  ;;  %v14124_v54 = vpop.f32.mrf.mxu0  ;;  %8315 = vmatprep.subr.bf16.mxu0 %v11686_v39 }
 0x31e   : > { %8279 = vmatpush2.bf16.msra.mxu1 %v11699_v56  ;;  %v3102_v53 = vadd.f32 %v11234_v17, %v13958_v0  ;;  %v11711_v0 = vld [vmem:[%s16932_s7 + $0x100] ss:$16 sps:$4 sm:$0xff]  }
 0x31f   : > { %v14129_v49 = vpop.f32.mrf.mxu1  ;;  %v14131_v46 = vpop.f32.mrf.mxu0  ;;  %8280 = vmatprep.subr.bf16.mxu1 %v11707_v45 }
 0x320   : > { %8316 = vmatpush2.bf16.msra.mxu0 %v11684_v16  ;;  %v3099_v16 = vadd.f32 %v11231_v30, %v13955_v25  ;;  %v11237_v25 = vadd.f32 %v14131_v46, %v14124_v54  ;;  %v3174_v15 = vadd.f32 %v11280_v51, %v3102_v53  ;;  %v11716_v54 = vld [vmem:[%s16932_s7 + $0x6e4] ss:$16 sps:$4 sm:$0xff]  }
 0x321   : > { %v14136_v5 = vpop.f32.mrf.mxu1  ;;  %v14144_v18 = vpop.f32.mrf.mxu0  ;;  %8317 = vmatprep.subr.bf16.mxu0 %v11692_v61  ;;  %v11277_v61 = vadd.f32 %v14074_v2, %v14069_v9  ;;  %v11713_v9 = vld [vmem:[%s16932_s7 + $0x104] ss:$16 sps:$4 sm:$0xff]  }
 0x322   : > { %8281 = vmatpush2.bf16.msra.mxu1 %v11705_v19  ;;  %v3107_v46 = vadd.f32 %v11237_v25, %v13982_v63 }
 0x323   : > { %v14149_v21 = vpop.f32.mrf.mxu1  ;;  %v14151_v32 = vpop.f32.mrf.mxu0  ;;  %v3171_v29 = vadd.f32 %v11277_v61, %v3099_v16  ;;  %8282 = vmatprep.subr.bf16.mxu1 %v11713_v9 }
 0x324   : > { %8318 = vmatpush2.bf16.msra.mxu0 %v11690_v7  ;;  %v11240_v2 = vadd.f32 %v14151_v32, %v14144_v18  ;;  %v11719_v18 = vld [vmem:[%s16932_s7 + $0x4e4] ss:$16 sps:$4 sm:$0xff]   ;;  %v11283_v32 = vadd.f32 %v14116_v3, %v14109_v40 }
 0x325   : > { %v14156_v4 = vpop.f32.mrf.mxu1  ;;  %v14164_v31 = vpop.f32.mrf.mxu0  ;;  %8319 = vmatprep.subr.bf16.mxu0 %v11698_v52 }
 0x326   : > { %8283 = vmatpush2.bf16.msra.mxu1 %v11711_v0  ;;  %v3179_v30 = vadd.f32 %v11283_v32, %v3107_v46 }
 0x327   : > { %v14169_v34 = vpop.f32.mrf.mxu1  ;;  %v14171_v22 = vpop.f32.mrf.mxu0  ;;  %8334 = vmatprep.subr.bf16.mxu1 %v11719_v18 }
 0x328   : > { %8320 = vmatpush2.bf16.msra.mxu0 %v11696_v1  ;;  %v3110_v1 = vadd.f32 %v11240_v2, %v13997_v23  ;;  %v11243_v63 = vadd.f32 %v14171_v22, %v14164_v31  ;;  %v11289_v22 = vadd.f32 %v14156_v4, %v14149_v21 }
 0x329   : > { %v14176_v8 = vpop.f32.mrf.mxu1  ;;  %v14184_v58 = vpop.f32.mrf.mxu0  ;;  %8321 = vmatprep.subr.bf16.mxu0 %v11704_v43 }
 0x32b   : > { %v14189_v59 = vpop.f32.mrf.mxu1  ;;  %v14191_v41 = vpop.f32.mrf.mxu0 }
 0x32c   : > { %8322 = vmatpush2.bf16.msra.mxu0 %v11702_v55  ;;  %v11286_v55 = vadd.f32 %v14136_v5, %v14129_v49  ;;  %v3115_v5 = vadd.f32 %v11243_v63, %v14012_v44  ;;  %v11292_v44 = vadd.f32 %v14176_v8, %v14169_v34 }
 0x32d   : > { %v14196_v27 = vpop.f32.mrf.mxu1  ;;  %v14204_v36 = vpop.f32.mrf.mxu0  ;;  %8323 = vmatprep.subr.bf16.mxu0 %v11710_v13 }
 0x32e   : > { %v3182_v17 = vadd.f32 %v11286_v55, %v3110_v1  ;;  %v3187_v51 = vadd.f32 %v11289_v22, %v3115_v5 }
 0x32f   : > { %v14209_v11 = vpop.f32.mrf.mxu1  ;;  %v14211_v57 = vpop.f32.mrf.mxu0 }
 0x330   : > { %8324 = vmatpush2.bf16.msra.mxu0 %v11708_v26  ;;  %v11249_v13 = vadd.f32 %v14211_v57, %v14204_v36 }
 0x331   : > { %v14216_v33 = vpop.f32.mrf.mxu1  ;;  %v14221_v10 = vpop.f32.mrf.mxu0  ;;  %8375 = vmatprep.subr.bf16.mxu0 %v11716_v54 }
 0x332   : > { %v3123_v8 = vadd.f32 %v11249_v13, %v14042_v50  ;;  %v11298_v50 = vadd.f32 %v14216_v33, %v14209_v11 }
 0x333   : > { %v14223_v6 = vpop.f32.mrf.mxu1  ;;  %v14225_v60 = vpop.f32.mrf.mxu0 }
 0x335   : > { %v14227_v37 = vpop.f32.mrf.mxu1  ;;  %v14229_v38 = vpop.f32.mrf.mxu0 }
 0x337   : > { %v11302_v47 = vpop.f32.mrf.mxu1  ;;  %v14233_v28 = vpop.f32.mrf.mxu0 }
 0x338   : > { %v11255_v1 = vadd.f32 %v14233_v28, %v14229_v38 }
 0x339   : > { %v11303_v39 = vpop.f32.mrf.mxu1  ;;  %v11256_v20 = vpop.f32.mrf.mxu0 }
 0x33a   : > { %v11246_v39 = vadd.f32 %v14191_v41, %v14184_v58  ;;  %v3131_v63 = vadd.f32 %v11255_v1, %v14076_v12  ;;  %v11735_v1 = vld [vmem:[%s16932_s7 + $0x480] ss:$16 sps:$4 sm:$0xff]  }
 0x33b   : > { %v11257_v48 = vpop.f32.mrf.mxu0 }
 0x33c   : > { %v3118_v58 = vadd.f32 %v11246_v39, %v14027_v35  ;;  %v11252_v35 = vadd.f32 %v14225_v60, %v14221_v10  ;;  %v11295_v10 = vadd.f32 %v14196_v27, %v14189_v59 }
 0x33d   : > { %v3242_v7 = vpop.f32.mrf.mxu0 }
 0x33e   : > { %v3243_v52 = vadd.f32 %v3242_v7, %v3171_v29  ;;  %v3190_v25 = vadd.f32 %v11292_v44, %v3118_v58  ;;  %v3126_v60 = vadd.f32 %v11252_v35, %v14057_v14 }
 0x33f   : > { %v11380_v62 = vpop.f32.mrf.mxu0 }
 0x340   : > { %v3280_v43 = vmax.f32 %v3243_v52, 0.0  ;;  %v3198_v14 = vadd.f32 %v11298_v50, %v3126_v60  ;;  %v11728_v60 = vld [vmem:[%s16932_s7 + $0x6a4] ss:$16 sps:$4 sm:$0xff]  }
 0x341   : > { %v3245_v42 = vpop.f32.mrf.mxu0 }
 0x342   : > { %v3246_v24 = vadd.f32 %v3245_v42, %v3174_v15  ;;  %v3195_v42 = vadd.f32 %v11295_v10, %v3123_v8  ;;  %v11717_v8 = vld [vmem:[%s16932_s7 + $0x4e0] ss:$16 sps:$4 sm:$0xff]  }
 0x343   : > { %v11381_v56 = vpop.f32.mrf.mxu0  ;;  %v11720_v10 = vld [vmem:[%s16932_s7 + $0x6c0] ss:$16 sps:$4 sm:$0xff]  }
 0x344   : > { %v3281_v45 = vmax.f32 %v3246_v24, 0.0 }
 0x345   : > { %v3250_v19 = vpop.f32.mrf.mxu0 }
 0x346   : > { %v14273_v23 = vpack.c.bf16 %v3281_v45, %v3280_v43  ;;  %v3251_v20 = vadd.f32 %v3250_v19, %v3179_v30 }
 0x347   : > { %v11384_v47 = vpop.f32.mrf.mxu0 }
 0x348   : > { %v3309_v40 = vrot.slane %v14273_v23, 5  ;;  %v14279_v3 = vshrl.u32 %v14273_v23, 16  ;;  %v3282_v41 = vmax.f32 %v3251_v20, 0.0  ;;  %v3313_v29 = vrot.slane %v14273_v23, 6 }
 0x349   : > { %v3253_v49 = vpop.f32.mrf.mxu0  ;;  %v3317_v57 = vrot.slane %v14273_v23, 7  ;;  %v11301_v47 = vadd.f32 %v14227_v37, %v14223_v6  ;;  %v3300_v13 = vrot.slane %v14273_v23, 1 }
 0x34a   : > { %v3254_v16 = vadd.f32 %v3253_v49, %v3182_v17  ;;  %3310 = vrot.lane.b32.xlu1 %v3309_v40, %s12892_s13  ;;  %v3301_v31 = vrot.slane %v14279_v3, 1  ;;  %v3305_v53 = vrot.slane %v14279_v3, 2 }
 0x34b   : > { %v11385_v48 = vpop.f32.mrf.mxu0  ;;  %v3203_v20 = vadd.f32 %v11301_v47, %v3131_v63  ;;  %v11752_v63 = vld [vmem:[%s16932_s7 + $0x624] ss:$16 sps:$4 sm:$0xff]   ;;  %v11750_v47 = vld [vmem:[%s16932_s7 + $0x620] ss:$16 sps:$4 sm:$0xff]  }
 0x34c   : > { %v3283_v61 = vmax.f32 %v3254_v16, 0.0  ;;  %3302 = vrot.lane.b32.xlu0 %v3301_v31, %s12892_s13 }
 0x34d   : > { %v3258_v26 = vpop.f32.mrf.mxu0 }
 0x34e   : > { %v14293_v7 = vpack.c.bf16 %v3283_v61, %v3282_v41  ;;  %3306 = vrot.lane.b32.xlu1 %v3305_v53, %s12892_s13  ;;  %v3259_v4 = vadd.f32 %v3258_v26, %v3187_v51  ;;  %v3308_v53 = vrot.slane %v14273_v23, 3 }
 0x34f   : > { %v11388_v21 = vpop.f32.mrf.mxu0 }
 0x350   : > { %3297 = vrot.lane.b32.xlu0 %v14279_v3, %s12892_s13  ;;  %v14305_v0 = vshrl.u32 %v14293_v7, 16  ;;  %v3284_v2 = vmax.f32 %v3259_v4, 0.0  ;;  %v3369_v32 = vrot.slane %v14293_v7, 4  ;;  %v3304_v21 = vrot.slane %v14273_v23, 2  ;;  %v11714_v4 = vld [vmem:[%s16932_s7 + $0x6e0] ss:$16 sps:$4 sm:$0xff]  }
 0x351   : > { %v3261_v34 = vpop.f32.mrf.mxu0 }
 0x352   : > { %v3262_v36 = vadd.f32 %v3261_v34, %v3190_v25  ;;  %3314 = vrot.lane.b32.xlu1 %v3313_v29, %s12892_s13  ;;  %v3328_v54 = vrot.slane %v14305_v0, 2  ;;  %v3366_v11 = vrot.slane %v14305_v0, 1  ;;  %v11722_v29 = vld [vmem:[%s16932_s7 + $0x6c4] ss:$16 sps:$4 sm:$0xff]  }
 0x353   : > { %v11389_v9 = vpop.f32.mrf.mxu0 }
 0x354   : > { %v3285_v62 = vmax.f32 %v3262_v36, 0.0  ;;  %3318 = vrot.lane.b32.xlu0 %v3317_v57, %s12892_s13  ;;  %v11725_v57 = vld [vmem:[%s16932_s7 + $0x4c4] ss:$16 sps:$4 sm:$0xff]  }
 0x355   : > { %v3266_v52 = vpop.f32.mrf.mxu0 }
 0x356   : > { %v14313_v15 = vpack.c.bf16 %v3285_v62, %v3284_v2  ;;  %3322 = vrot.lane.b32.xlu1 %v14293_v7, %s12892_s13  ;;  %v3267_v59 = vadd.f32 %v3266_v52, %v3195_v42  ;;  %v11723_v2 = vld [vmem:[%s16932_s7 + $0x4c0] ss:$16 sps:$4 sm:$0xff]   ;;  %v3316_v62 = vrot.slane %v14279_v3, 6  ;;  %v11731_v52 = vld [vmem:[%s16932_s7 + $0x4a4] ss:$16 sps:$4 sm:$0xff]  }
 0x357   : > { %v11392_v46 = vpop.f32.mrf.mxu0  ;;  %v11726_v42 = vld [vmem:[%s16932_s7 + $0x6a0] ss:$16 sps:$4 sm:$0xff]  }
 0x358   : > { %3329 = vrot.lane.b32.xlu0 %v3328_v54, %s12892_s13  ;;  %v3286_v56 = vmax.f32 %v3267_v59, 0.0  ;;  %v3374_v55 = vrot.slane %v14313_v15, 5  ;;  %v3381_v38 = vrot.slane %v14313_v15, 6  ;;  %v14334_v28 = vshrl.u32 %v14313_v15, 16  ;;  %v11734_v54 = vld [vmem:[%s16932_s7 + $0x684] ss:$16 sps:$4 sm:$0xff]  }
 0x359   : > { %v3269_v27 = vpop.f32.mrf.mxu0  ;;  %v3385_v17 = vrot.slane %v14313_v15, 7  ;;  %v11729_v46 = vld [vmem:[%s16932_s7 + $0x4a0] ss:$16 sps:$4 sm:$0xff]   ;;  %v3324_v59 = vrot.slane %v14293_v7, 2 }
 0x35a   : > { %v3270_v24 = vadd.f32 %v3269_v27, %v3198_v14  ;;  %3363 = vrot.lane.b32.xlu1 %v14305_v0, %s12892_s13  ;;  %v3389_v12 = vrot.slane %v14334_v28, 1  ;;  %v3393_v49 = vrot.slane %v14334_v28, 2  ;;  %v11737_v27 = vld [vmem:[%s16932_s7 + $0x484] ss:$16 sps:$4 sm:$0xff]  }
 0x35b   : > { %v11393_v33 = vpop.f32.mrf.mxu0 }
 0x35c   : > { %v3287_v18 = vmax.f32 %v3270_v24, 0.0  ;;  %3367 = vrot.lane.b32.xlu0 %v3366_v11, %s12892_s13  ;;  %v11732_v11 = vld [vmem:[%s16932_s7 + $0x680] ss:$16 sps:$4 sm:$0xff]   ;;  %v11740_v33 = vld [vmem:[%s16932_s7 + $0x664] ss:$16 sps:$4 sm:$0xff]  }
 0x35d   : > { %v3274_v43 = vpop.f32.mrf.mxu0 }
 0x35e   : > { %v14326_v45 = vpack.c.bf16 %v3287_v18, %v3286_v56  ;;  %3370 = vrot.lane.b32.xlu1 %v3369_v32, %s12892_s13  ;;  %v3275_v40 = vadd.f32 %v3274_v43, %v3203_v20  ;;  %v11743_v56 = vld [vmem:[%s16932_s7 + $0x464] ss:$16 sps:$4 sm:$0xff]   ;;  %v11738_v18 = vld [vmem:[%s16932_s7 + $0x660] ss:$16 sps:$4 sm:$0xff]  }
 0x35f   : > { %v11396_v19 = vpop.f32.mrf.mxu0  ;;  %v11746_v32 = vld [vmem:[%s16932_s7 + $0x644] ss:$16 sps:$4 sm:$0xff]   ;;  %v11741_v43 = vld [vmem:[%s16932_s7 + $0x460] ss:$16 sps:$4 sm:$0xff]  }
 0x360   : > { %3375 = vrot.lane.b32.xlu0 %v3374_v55, %s12892_s13  ;;  %v3288_v5 = vmax.f32 %v3275_v40, 0.0  ;;  %v3421_v6 = vrot.slane %v14326_v45, 3  ;;  %v3428_v37 = vrot.slane %v14326_v45, 4  ;;  %v3432_v31 = vrot.slane %v14326_v45, 5  ;;  %v11749_v55 = vld [vmem:[%s16932_s7 + $0x444] ss:$16 sps:$4 sm:$0xff]  }
 0x361   : > { %v3277_v30 = vpop.f32.mrf.mxu0  ;;  %v3436_v22 = vrot.slane %v14326_v45, 6  ;;  %v14357_v48 = vshrl.u32 %v14326_v45, 16  ;;  %v11744_v19 = vld [vmem:[%s16932_s7 + $0x640] ss:$16 sps:$4 sm:$0xff]   ;;  %v11761_v20 = vld [vmem:[%s16932_s7 + $0x404] ss:$16 sps:$4 sm:$0xff]  }
 0x362   : > { %3382 = vrot.lane.b32.xlu1 %v3381_v38, %s12892_s13  ;;  %v14350_v16 = vpack.c.bf16 %v3288_v5, %v3288_v5  ;;  %v11747_v38 = vld [vmem:[%s16932_s7 + $0x440] ss:$16 sps:$4 sm:$0xff]   ;;  %v11755_v30 = vld [vmem:[%s16932_s7 + $0x424] ss:$16 sps:$4 sm:$0xff]  }
 0x363   : > { %v11397_v39 = vpop.f32.mrf.mxu0  ;;  %v3442_v41 = vrot.slane %v14357_v48, 1  ;;  %v11764_v40 = vld [vmem:[%s16932_s7 + $0x7e4] ss:$16 sps:$4 sm:$0xff]  }
 0x364   : > { %3386 = vrot.lane.b32.xlu0 %v3385_v17, %s12892_s13  ;;  %v3448_v58 = vshrl.u32 %v14350_v16, 16  ;;  %v11758_v17 = vld [vmem:[%s16932_s7 + $0x604] ss:$16 sps:$4 sm:$0xff]   ;;  %v11753_v39 = vld [vmem:[%s16932_s7 + $0x420] ss:$16 sps:$4 sm:$0xff]  }
 0x365   : > { %v11767_v5 = vld [vmem:[%s16932_s7 + $0x5e4] ss:$16 sps:$4 sm:$0xff]  }
 0x366   : > { %3390 = vrot.lane.b32.xlu1 %v3389_v12, %s12892_s13  ;;  %v3450_v61 = vrot.slane %v3448_v58, 2  ;;  %v11756_v12 = vld [vmem:[%s16932_s7 + $0x600] ss:$16 sps:$4 sm:$0xff]  }
 0x367   : > { %v11768_v58 = vld [vmem:[%s16932_s7 + $0x7c0] ss:$16 sps:$4 sm:$0xff]  }
 0x368   : > { %3394 = vrot.lane.b32.xlu0 %v3393_v49, %s12892_s13  ;;  %v11759_v49 = vld [vmem:[%s16932_s7 + $0x400] ss:$16 sps:$4 sm:$0xff]  }
 0x36a   : > { %3418 = vrot.lane.b32.xlu1 %v14334_v28, %s12892_s13 }
 0x36c   : > { %3422 = vrot.lane.b32.xlu0 %v3421_v6, %s12892_s13  ;;  %v11762_v6 = vld [vmem:[%s16932_s7 + $0x7e0] ss:$16 sps:$4 sm:$0xff]  }
 0x36e   : > { %3429 = vrot.lane.b32.xlu1 %v3428_v37, %s12892_s13  ;;  %v11770_v37 = vld [vmem:[%s16932_s7 + $0x7c4] ss:$16 sps:$4 sm:$0xff]  }
 0x370   : > { %3433 = vrot.lane.b32.xlu0 %v3432_v31, %s12892_s13  ;;  %v11765_v31 = vld [vmem:[%s16932_s7 + $0x5e0] ss:$16 sps:$4 sm:$0xff]  }
 0x372   : > { %3437 = vrot.lane.b32.xlu1 %v3436_v22, %s12892_s13  ;;  %v11773_v22 = vld [vmem:[%s16932_s7 + $0x5c4] ss:$16 sps:$4 sm:$0xff]  }
 0x374   : > { %3439 = vrot.lane.b32.xlu0 %v14357_v48, %s12892_s13 }
 0x376   : > { %3443 = vrot.lane.b32.xlu1 %v3442_v41, %s12892_s13  ;;  %v11776_v41 = vld [vmem:[%s16932_s7 + $0x7a4] ss:$16 sps:$4 sm:$0xff]  }
 0x378   : > { %3451 = vrot.lane.b32.xlu0 %v3450_v61, %s12892_s13  ;;  %v11771_v61 = vld [vmem:[%s16932_s7 + $0x5c0] ss:$16 sps:$4 sm:$0xff]   ;;  %s12834_s13 = scalar_lea.vmem %s12833_s26, 32 }
 0x379   : > { %p12836_p1 = scmp.lt.s32.totalorder %s12834_s13, %s12828_s22 }
 0x37b   : > { %p12837_p2 = por %p12836_p1, %p12835_p0 }
 0x37d   : > { %p12838_p3 = pnand %p12837_p2, %p12831_p13 }
 0x3bc   : > { %v3311_v26 = vpop.permute.xlu1 %3310 }
 0x3bd   : > { %v14368_v44 = vsel %vm3331_vm9, %v3308_v53, %v3311_v26  ;;  %v11779_v53 = vld [vmem:[%s16932_s7 + $0x5a4] ss:$16 sps:$4 sm:$0xff]   ;;  %v11774_v26 = vld [vmem:[%s16932_s7 + $0x7a0] ss:$16 sps:$4 sm:$0xff]  }
 0x3be   : > { %8325 = vmatprep.mubr.bf16.mxu0 %v14368_v44  ;;  %v3303_v51 = vpop.permute.xlu0 %3302 }
 0x3bf   : > { %v14374_v35 = vsel %vm3331_vm9, %v3300_v13, %v3303_v51  ;;  %v11782_v13 = vld [vmem:[%s16932_s7 + $0x784] ss:$16 sps:$4 sm:$0xff]   ;;  %v11777_v51 = vld [vmem:[%s16932_s7 + $0x5a0] ss:$16 sps:$4 sm:$0xff]  }
 0x3c0   : > { %v3307_v25 = vpop.permute.xlu1 %3306  ;;  %8284 = vmatprep.mubr.bf16.mxu1 %v14374_v35 }
 0x3c1   : > { %v14384_v34 = vsel %vm3331_vm9, %v3304_v21, %v3307_v25  ;;  %v11785_v21 = vld [vmem:[%s16932_s7 + $0x584] ss:$16 sps:$4 sm:$0xff]  }
 0x3c2   : > { %8326 = vmatmul.mubr.bf16.vlgmr.msra.gmra.mxu0 %v14384_v34  ;;  %v3298_v36 = vpop.permute.xlu0 %3297  ;;  %v11788_v25 = vld [vmem:[%s16932_s7 + $0x764] ss:$16 sps:$4 sm:$0xff]  }
 0x3c3   : > { %8376 = vmatpush1.bf16.msra.mxu0 %v11714_v4  ;;  %v14395_v9 = vsel %vm3331_vm9, %v14273_v23, %v3298_v36  ;;  %v11780_v4 = vld [vmem:[%s16932_s7 + $0x780] ss:$16 sps:$4 sm:$0xff]  }
 0x3c4   : > { %8285 = vmatmul.mubr.bf16.vlgmr.msra.gmra.mxu1 %v14395_v9  ;;  %8377 = vmatprep.subr.bf16.mxu0 %v11722_v29  ;;  %v11783_v29 = vld [vmem:[%s16932_s7 + $0x580] ss:$16 sps:$4 sm:$0xff]  }
 0x3c5   : > { %8335 = vmatpush1.bf16.msra.mxu1 %v11717_v8  ;;  %v11791_v8 = vld [vmem:[%s16932_s7 + $0x564] ss:$16 sps:$4 sm:$0xff]   ;;  %v11786_v36 = vld [vmem:[%s16932_s7 + $0x760] ss:$16 sps:$4 sm:$0xff]  }
 0x3c6   : > { %v3319_v23 = vpop.permute.xlu0 %3318  ;;  %8336 = vmatprep.subr.bf16.mxu1 %v11725_v57  ;;  %v11794_v57 = vld [vmem:[%s16932_s7 + $0x744] ss:$16 sps:$4 sm:$0xff]  }
 0x3c7   : > { %8378 = vmatpush1.bf16.msra.mxu0 %v11720_v10  ;;  %v14412_v50 = vsel %vm3331_vm9, %v3316_v62, %v3319_v23  ;;  %v11789_v10 = vld [vmem:[%s16932_s7 + $0x560] ss:$16 sps:$4 sm:$0xff]   ;;  %v11800_v62 = vld [vmem:[%s16932_s7 + $0x724] ss:$16 sps:$4 sm:$0xff]  }
 0x3c8   : > { %8366 = vmatprep.mubr.bf16.mxu1 %v14412_v50  ;;  %8379 = vmatprep.subr.bf16.mxu0 %v11728_v60  ;;  %v11797_v60 = vld [vmem:[%s16932_s7 + $0x544] ss:$16 sps:$4 sm:$0xff]  }
 0x3c9   : > { %8337 = vmatpush1.bf16.msra.mxu1 %v11723_v2  ;;  %v11792_v2 = vld [vmem:[%s16932_s7 + $0x740] ss:$16 sps:$4 sm:$0xff]  }
 0x3ca   : > { %v3330_v14 = vpop.permute.xlu0 %3329  ;;  %8338 = vmatprep.subr.bf16.mxu1 %v11731_v52  ;;  %v11795_v52 = vld [vmem:[%s16932_s7 + $0x540] ss:$16 sps:$4 sm:$0xff]  }
 0x3cb   : > { %8380 = vmatpush1.bf16.msra.mxu0 %v11726_v42  ;;  %v14431_v24 = vsel %vm3331_vm9, %v3324_v59, %v3330_v14  ;;  %v11803_v42 = vld [vmem:[%s16932_s7 + $0x524] ss:$16 sps:$4 sm:$0xff]  }
 0x3cc   : > { %8407 = vmatprep.mubr.bf16.mxu0 %v14431_v24  ;;  %8381 = vmatprep.subr.bf16.mxu0 %v11734_v54  ;;  %v11798_v54 = vld [vmem:[%s16932_s7 + $0x720] ss:$16 sps:$4 sm:$0xff]   ;;  %v11806_v14 = vld [vmem:[%s16932_s7 + $0x704] ss:$16 sps:$4 sm:$0xff]  }
 0x3cd   : > { %8339 = vmatpush1.bf16.msra.mxu1 %v11729_v46  ;;  %v3315_v46 = vpop.permute.xlu1 %3314 }
 0x3ce   : > { %8340 = vmatprep.subr.bf16.mxu1 %v11737_v27  ;;  %v3368_v23 = vpop.permute.xlu0 %3367  ;;  %v11801_v27 = vld [vmem:[%s16932_s7 + $0x520] ss:$16 sps:$4 sm:$0xff]  }
 0x3cf   : > { %8382 = vmatpush1.bf16.msra.mxu0 %v11732_v11  ;;  %v11809_v11 = vld [vmem:[%s16932_s7 + $0x504] ss:$16 sps:$4 sm:$0xff]  }
 0x3d0   : > { %8383 = vmatprep.subr.bf16.mxu0 %v11740_v33 }
 0x3d1   : > { %8341 = vmatpush1.bf16.msra.mxu1 %v11735_v1  ;;  %v11804_v1 = vld [vmem:[%s16932_s7 + $0x700] ss:$16 sps:$4 sm:$0xff]  }
 0x3d2   : > { %8342 = vmatprep.subr.bf16.mxu1 %v11743_v56  ;;  %v3376_v33 = vpop.permute.xlu0 %3375  ;;  %v3372_v56 = vrot.slane %v14305_v0, 4  ;;  %v11815_v0 = vld [vmem:[%s16932_s7 + $0x8e4] ss:$16 sps:$4 sm:$0xff]  }
 0x3d3   : > { %8384 = vmatpush1.bf16.msra.mxu0 %v11738_v18  ;;  %v11812_v18 = vld [vmem:[%s16932_s7 + $0xae4] ss:$16 sps:$4 sm:$0xff]  }
 0x3d4   : > { %8385 = vmatprep.subr.bf16.mxu0 %v11746_v32  ;;  %v11807_v32 = vld [vmem:[%s16932_s7 + $0x500] ss:$16 sps:$4 sm:$0xff]  }
 0x3d5   : > { %8343 = vmatpush1.bf16.msra.mxu1 %v11741_v43  ;;  %v3323_v43 = vpop.permute.xlu1 %3322 }
 0x3d6   : > { %8344 = vmatprep.subr.bf16.mxu1 %v11749_v55  ;;  %v3365_v55 = vrot.slane %v14293_v7, 1 }
 0x3d7   : > { %8386 = vmatpush1.bf16.msra.mxu0 %v11744_v19  ;;  %v14590_v19 = vsel %vm3331_vm9, %v3372_v56, %v3376_v33  ;;  %v11869_v33 = vld [vmem:[%s16932_s7 + $0x9c4] ss:$16 sps:$4 sm:$0xff]  }
 0x3d8   : > { %8387 = vmatprep.subr.bf16.mxu0 %v11752_v63  ;;  %v3320_v63 = vrot.slane %v14279_v3, 7  ;;  %v11872_v56 = vld [vmem:[%s16932_s7 + $0xba4] ss:$16 sps:$4 sm:$0xff]  }
 0x3d9   : > { %8345 = vmatpush1.bf16.msra.mxu1 %v11747_v38  ;;  %v11810_v38 = vld [vmem:[%s16932_s7 + $0xae0] ss:$16 sps:$4 sm:$0xff]  }
 0x3da   : > { %8346 = vmatprep.subr.bf16.mxu1 %v11755_v30  ;;  %v14600_v30 = vsel %vm3331_vm9, %v3365_v55, %v3368_v23  ;;  %v11857_v23 = vld [vmem:[%s16932_s7 + $0x804] ss:$16 sps:$4 sm:$0xff]  }
 0x3db   : > { %8388 = vmatpush1.bf16.msra.mxu0 %v11750_v47  ;;  %v11818_v47 = vld [vmem:[%s16932_s7 + $0xac4] ss:$16 sps:$4 sm:$0xff]  }
 0x3dc   : > { %8389 = vmatprep.subr.bf16.mxu0 %v11758_v17  ;;  %v3312_v17 = vrot.slane %v14279_v3, 5  ;;  %v3483_v3 = vrot.slane %v14600_v30, 3  ;;  %v11878_v55 = vld [vmem:[%s16932_s7 + $0xb84] ss:$16 sps:$4 sm:$0xff]   ;;  %v12430_v30 = vld [vmem:[%s16932_s7 + $0xa0c] ss:$16 sps:$4 sm:$0xff]  }
 0x3dd   : > { %8347 = vmatpush1.bf16.msra.mxu1 %v11753_v39  ;;  %v14607_v39 = vsel %vm3331_vm9, %v3320_v63, %v3323_v43  ;;  %v11870_v43 = vld [vmem:[%s16932_s7 + $0xba0] ss:$16 sps:$4 sm:$0xff]   ;;  %v11881_v63 = vld [vmem:[%s16932_s7 + $0x984] ss:$16 sps:$4 sm:$0xff]  }
 0x3de   : > { %8348 = vmatprep.subr.bf16.mxu1 %v11761_v20  ;;  %v3485_v20 = vrot.slane %v14590_v19, 3 }
 0x3df   : > { %8390 = vmatpush1.bf16.msra.mxu0 %v11756_v12  ;;  %v11813_v12 = vld [vmem:[%s16932_s7 + $0x8e0] ss:$16 sps:$4 sm:$0xff]  }
 0x3e0   : > { %8391 = vmatprep.subr.bf16.mxu0 %v11764_v40  ;;  %v11821_v40 = vld [vmem:[%s16932_s7 + $0x8c4] ss:$16 sps:$4 sm:$0xff]  }
 0x3e1   : > { %8349 = vmatpush1.bf16.msra.mxu1 %v11759_v49  ;;  %v14618_v49 = vsel %vm3331_vm9, %v3312_v17, %v3315_v46  ;;  %v11863_v46 = vld [vmem:[%s16932_s7 + $0x9e4] ss:$16 sps:$4 sm:$0xff]   ;;  %v11879_v17 = vld [vmem:[%s16932_s7 + $0x980] ss:$16 sps:$4 sm:$0xff]  }
 0x3e2   : > { %8350 = vmatprep.subr.bf16.mxu1 %v11767_v5  ;;  %v11816_v5 = vld [vmem:[%s16932_s7 + $0xac0] ss:$16 sps:$4 sm:$0xff]  }
 0x3e3   : > { %8392 = vmatpush2.bf16.msra.mxu0 %v11762_v6  ;;  %v11824_v6 = vld [vmem:[%s16932_s7 + $0xaa4] ss:$16 sps:$4 sm:$0xff]  }
 0x3e4   : > { %8393 = vmatprep.subr.bf16.mxu0 %v11770_v37  ;;  %v11819_v37 = vld [vmem:[%s16932_s7 + $0x8c0] ss:$16 sps:$4 sm:$0xff]  }
 0x3e5   : > { %8351 = vmatpush2.bf16.msra.mxu1 %v11765_v31  ;;  %v11827_v31 = vld [vmem:[%s16932_s7 + $0x8a4] ss:$16 sps:$4 sm:$0xff]  }
 0x3e6   : > { %8352 = vmatprep.subr.bf16.mxu1 %v11773_v22  ;;  %v11822_v22 = vld [vmem:[%s16932_s7 + $0xaa0] ss:$16 sps:$4 sm:$0xff]  }
 0x3e7   : > { %8394 = vmatpush2.bf16.msra.mxu0 %v11768_v58  ;;  %v11830_v58 = vld [vmem:[%s16932_s7 + $0xa84] ss:$16 sps:$4 sm:$0xff]  }
 0x3e8   : > { %8395 = vmatprep.subr.bf16.mxu0 %v11776_v41  ;;  %v11825_v41 = vld [vmem:[%s16932_s7 + $0x8a0] ss:$16 sps:$4 sm:$0xff]  }
 0x3e9   : > { %8353 = vmatpush2.bf16.msra.mxu1 %v11771_v61  ;;  %v11833_v61 = vld [vmem:[%s16932_s7 + $0x884] ss:$16 sps:$4 sm:$0xff]  }
 0x3ea   : > { %8354 = vmatprep.subr.bf16.mxu1 %v11779_v53  ;;  %v11828_v53 = vld [vmem:[%s16932_s7 + $0xa80] ss:$16 sps:$4 sm:$0xff]  }
 0x3eb   : > { %8396 = vmatpush2.bf16.msra.mxu0 %v11774_v26  ;;  %v11836_v26 = vld [vmem:[%s16932_s7 + $0xa64] ss:$16 sps:$4 sm:$0xff]  }
 0x3ec   : > { %8397 = vmatprep.subr.bf16.mxu0 %v11782_v13  ;;  %v11831_v13 = vld [vmem:[%s16932_s7 + $0x880] ss:$16 sps:$4 sm:$0xff]  }
 0x3ed   : > { %8355 = vmatpush2.bf16.msra.mxu1 %v11777_v51  ;;  %v11839_v51 = vld [vmem:[%s16932_s7 + $0x864] ss:$16 sps:$4 sm:$0xff]  }
 0x3ee   : > { %8356 = vmatprep.subr.bf16.mxu1 %v11785_v21  ;;  %v11834_v21 = vld [vmem:[%s16932_s7 + $0xa60] ss:$16 sps:$4 sm:$0xff]  }
 0x3ef   : > { %8398 = vmatpush2.bf16.msra.mxu0 %v11780_v4  ;;  %v11842_v4 = vld [vmem:[%s16932_s7 + $0xa44] ss:$16 sps:$4 sm:$0xff]  }
 0x3f0   : > { %8399 = vmatprep.subr.bf16.mxu0 %v11788_v25  ;;  %v11837_v25 = vld [vmem:[%s16932_s7 + $0x860] ss:$16 sps:$4 sm:$0xff]  }
 0x3f1   : > { %8357 = vmatpush2.bf16.msra.mxu1 %v11783_v29  ;;  %v11845_v29 = vld [vmem:[%s16932_s7 + $0x844] ss:$16 sps:$4 sm:$0xff]  }
 0x3f2   : > { %8358 = vmatprep.subr.bf16.mxu1 %v11791_v8  ;;  %v11840_v8 = vld [vmem:[%s16932_s7 + $0xa40] ss:$16 sps:$4 sm:$0xff]  }
 0x3f3   : > { %8400 = vmatpush2.bf16.msra.mxu0 %v11786_v36  ;;  %v11848_v36 = vld [vmem:[%s16932_s7 + $0xa24] ss:$16 sps:$4 sm:$0xff]  }
 0x3f4   : > { %8401 = vmatprep.subr.bf16.mxu0 %v11794_v57  ;;  %v11843_v57 = vld [vmem:[%s16932_s7 + $0x840] ss:$16 sps:$4 sm:$0xff]  }
 0x3f5   : > { %8359 = vmatpush2.bf16.msra.mxu1 %v11789_v10  ;;  %v11851_v10 = vld [vmem:[%s16932_s7 + $0x824] ss:$16 sps:$4 sm:$0xff]  }
 0x3f6   : > { %8360 = vmatprep.subr.bf16.mxu1 %v11797_v60  ;;  %v11846_v60 = vld [vmem:[%s16932_s7 + $0xa20] ss:$16 sps:$4 sm:$0xff]  }
 0x3f7   : > { %8402 = vmatpush2.bf16.msra.mxu0 %v11792_v2  ;;  %v11854_v2 = vld [vmem:[%s16932_s7 + $0xa04] ss:$16 sps:$4 sm:$0xff]  }
 0x3f8   : > { %8403 = vmatprep.subr.bf16.mxu0 %v11800_v62  ;;  %v11849_v62 = vld [vmem:[%s16932_s7 + $0x820] ss:$16 sps:$4 sm:$0xff]  }
 0x3f9   : > { %8361 = vmatpush2.bf16.msra.mxu1 %v11795_v52  ;;  %v11852_v52 = vld [vmem:[%s16932_s7 + $0xa00] ss:$16 sps:$4 sm:$0xff]  }
 0x3fa   : > { %8362 = vmatprep.subr.bf16.mxu1 %v11803_v42  ;;  %v11860_v42 = vld [vmem:[%s16932_s7 + $0xbe4] ss:$16 sps:$4 sm:$0xff]  }
 0x3fb   : > { %8404 = vmatpush2.bf16.msra.mxu0 %v11798_v54  ;;  %v11855_v54 = vld [vmem:[%s16932_s7 + $0x800] ss:$16 sps:$4 sm:$0xff]  }
 0x3fc   : > { %8405 = vmatprep.subr.bf16.mxu0 %v11806_v14  ;;  %v11858_v14 = vld [vmem:[%s16932_s7 + $0xbe0] ss:$16 sps:$4 sm:$0xff]  }
 0x3fd   : > { %8363 = vmatpush2.bf16.msra.mxu1 %v11801_v27  ;;  %v11866_v27 = vld [vmem:[%s16932_s7 + $0xbc4] ss:$16 sps:$4 sm:$0xff]  }
 0x3fe   : > { %8364 = vmatprep.subr.bf16.mxu1 %v11809_v11  ;;  %v11861_v11 = vld [vmem:[%s16932_s7 + $0x9e0] ss:$16 sps:$4 sm:$0xff]  }
 0x3ff   : > { %8406 = vmatpush2.bf16.msra.mxu0 %v11804_v1  ;;  %v11864_v1 = vld [vmem:[%s16932_s7 + $0xbc0] ss:$16 sps:$4 sm:$0xff]  }
 0x400   : > { %8457 = vmatprep.subr.bf16.mxu0 %v11812_v18  ;;  %v11867_v18 = vld [vmem:[%s16932_s7 + $0x9c0] ss:$16 sps:$4 sm:$0xff]  }
 0x401   : > { %8365 = vmatpush2.bf16.msra.mxu1 %v11807_v32  ;;  %v11875_v32 = vld [vmem:[%s16932_s7 + $0x9a4] ss:$16 sps:$4 sm:$0xff]  }
 0x402   : > { %8408 = vmatmul.mubr.bf16.vlgmr.msra.gmra.mxu0 %v14607_v39  ;;  %8416 = vmatprep.subr.bf16.mxu1 %v11815_v0  ;;  %v11873_v0 = vld [vmem:[%s16932_s7 + $0x9a0] ss:$16 sps:$4 sm:$0xff]  }
 0x403   : > { %8458 = vmatpush1.bf16.msra.mxu0 %v11810_v38  ;;  %8489 = vmatprep.mubr.bf16.mxu0 %v3485_v20  ;;  %v11876_v38 = vld [vmem:[%s16932_s7 + $0xb80] ss:$16 sps:$4 sm:$0xff]  }
 0x404   : > { %8367 = vmatmul.mubr.bf16.vlgmr.msra.gmra.mxu1 %v14618_v49  ;;  %8459 = vmatprep.subr.bf16.mxu0 %v11818_v47  ;;  %v11884_v47 = vld [vmem:[%s16932_s7 + $0xb64] ss:$16 sps:$4 sm:$0xff]  }
 0x405   : > { %8417 = vmatpush1.bf16.msra.mxu1 %v11813_v12  ;;  %8448 = vmatprep.mubr.bf16.mxu1 %v3483_v3  ;;  %v11887_v12 = vld [vmem:[%s16932_s7 + $0x964] ss:$16 sps:$4 sm:$0xff]  }
 0x406   : > { %8418 = vmatprep.subr.bf16.mxu1 %v11821_v40  ;;  %v11882_v40 = vld [vmem:[%s16932_s7 + $0xb60] ss:$16 sps:$4 sm:$0xff]  }
 0x407   : > { %8460 = vmatpush1.bf16.msra.mxu0 %v11816_v5  ;;  %v11890_v5 = vld [vmem:[%s16932_s7 + $0xb44] ss:$16 sps:$4 sm:$0xff]  }
 0x408   : > { %8461 = vmatprep.subr.bf16.mxu0 %v11824_v6  ;;  %v11885_v6 = vld [vmem:[%s16932_s7 + $0x960] ss:$16 sps:$4 sm:$0xff]  }
 0x409   : > { %8419 = vmatpush1.bf16.msra.mxu1 %v11819_v37  ;;  %v11893_v37 = vld [vmem:[%s16932_s7 + $0x944] ss:$16 sps:$4 sm:$0xff]  }
 0x40a   : > { %8420 = vmatprep.subr.bf16.mxu1 %v11827_v31  ;;  %v11888_v31 = vld [vmem:[%s16932_s7 + $0xb40] ss:$16 sps:$4 sm:$0xff]  }
 0x40b   : > { %8462 = vmatpush1.bf16.msra.mxu0 %v11822_v22  ;;  %v3364_v22 = vpop.permute.xlu1 %3363 }
 0x40c   : > { %8463 = vmatprep.subr.bf16.mxu0 %v11830_v58  ;;  %v11896_v58 = vld [vmem:[%s16932_s7 + $0xb24] ss:$16 sps:$4 sm:$0xff]  }
 0x40d   : > { %8421 = vmatpush1.bf16.msra.mxu1 %v11825_v41  ;;  %v3387_v41 = vpop.permute.xlu0 %3386 }
 0x40e   : > { %8422 = vmatprep.subr.bf16.mxu1 %v11833_v61  ;;  %v11891_v61 = vld [vmem:[%s16932_s7 + $0x940] ss:$16 sps:$4 sm:$0xff]  }
 0x40f   : > { %8464 = vmatpush1.bf16.msra.mxu0 %v11828_v53  ;;  %v11899_v53 = vld [vmem:[%s16932_s7 + $0x924] ss:$16 sps:$4 sm:$0xff]  }
 0x410   : > { %8465 = vmatprep.subr.bf16.mxu0 %v11836_v26  ;;  %v11894_v26 = vld [vmem:[%s16932_s7 + $0xb20] ss:$16 sps:$4 sm:$0xff]  }
 0x411   : > { %8423 = vmatpush1.bf16.msra.mxu1 %v11831_v13  ;;  %v11902_v13 = vld [vmem:[%s16932_s7 + $0xb04] ss:$16 sps:$4 sm:$0xff]  }
 0x412   : > { %8424 = vmatprep.subr.bf16.mxu1 %v11839_v51  ;;  %v11897_v51 = vld [vmem:[%s16932_s7 + $0x920] ss:$16 sps:$4 sm:$0xff]  }
 0x413   : > { %8466 = vmatpush1.bf16.msra.mxu0 %v11834_v21  ;;  %v3371_v21 = vpop.permute.xlu1 %3370 }
 0x414   : > { %8467 = vmatprep.subr.bf16.mxu0 %v11842_v4  ;;  %v11905_v4 = vld [vmem:[%s16932_s7 + $0x904] ss:$16 sps:$4 sm:$0xff]  }
 0x415   : > { %8425 = vmatpush1.bf16.msra.mxu1 %v11837_v25  ;;  %v3395_v25 = vpop.permute.xlu0 %3394 }
 0x416   : > { %8426 = vmatprep.subr.bf16.mxu1 %v11845_v29  ;;  %v11900_v29 = vld [vmem:[%s16932_s7 + $0xb00] ss:$16 sps:$4 sm:$0xff]  }
 0x417   : > { %8468 = vmatpush1.bf16.msra.mxu0 %v11840_v8  ;;  %v3392_v8 = vrot.slane %v14313_v15, 2 }
 0x418   : > { %8469 = vmatprep.subr.bf16.mxu0 %v11848_v36  ;;  %v11908_v36 = vld [vmem:[%s16932_s7 + $0xee4] ss:$16 sps:$4 sm:$0xff]  }
 0x419   : > { %8427 = vmatpush1.bf16.msra.mxu1 %v11843_v57  ;;  %v14804_v57 = vsel %vm3331_vm9, %v3324_v59, %v3371_v21  ;;  %v11906_v59 = vld [vmem:[%s16932_s7 + $0xee0] ss:$16 sps:$4 sm:$0xff]  }
 0x41a   : > { %8428 = vmatprep.subr.bf16.mxu1 %v11851_v10  ;;  %v11903_v10 = vld [vmem:[%s16932_s7 + $0x900] ss:$16 sps:$4 sm:$0xff]  }
 0x41b   : > { %8470 = vmatpush1.bf16.msra.mxu0 %v11846_v60  ;;  %v3384_v60 = vrot.slane %v14334_v28, 6  ;;  %v11951_v21 = vld [vmem:[%s16932_s7 + $0xc00] ss:$16 sps:$4 sm:$0xff]  }
 0x41c   : > { %8471 = vmatprep.subr.bf16.mxu0 %v11854_v2  ;;  %v14811_v2 = vsel %vm3331_vm9, %v3392_v8, %v3395_v25  ;;  %v11954_v25 = vld [vmem:[%s16932_s7 + $0xfe0] ss:$16 sps:$4 sm:$0xff]  }
 0x41d   : > { %8429 = vmatpush1.bf16.msra.mxu1 %v11849_v62  ;;  %v11911_v62 = vld [vmem:[%s16932_s7 + $0xce4] ss:$16 sps:$4 sm:$0xff]   ;;  %v11957_v8 = vld [vmem:[%s16932_s7 + $0xde0] ss:$16 sps:$4 sm:$0xff]  }
 0x41e   : > { %8430 = vmatprep.subr.bf16.mxu1 %v11857_v23  ;;  %v14818_v23 = vsel %vm3331_vm9, %v14293_v7, %v3364_v22  ;;  %v11909_v7 = vld [vmem:[%s16932_s7 + $0xce0] ss:$16 sps:$4 sm:$0xff]  }
 0x41f   : > { %8472 = vmatpush1.bf16.msra.mxu0 %v11852_v52  ;;  %v3484_v52 = vrot.slane %v14804_v57, 3  ;;  %v11939_v22 = vld [vmem:[%s16932_s7 + $0xc40] ss:$16 sps:$4 sm:$0xff]   ;;  %v12496_v57 = vld [vmem:[%s16932_s7 + $0xeac] ss:$16 sps:$4 sm:$0xff]  }
 0x420   : > { %8473 = vmatprep.subr.bf16.mxu0 %v11860_v42  ;;  %v14825_v42 = vsel %vm3331_vm9, %v3384_v60, %v3387_v41  ;;  %v11942_v41 = vld [vmem:[%s16932_s7 + $0xe20] ss:$16 sps:$4 sm:$0xff]   ;;  %v11968_v60 = vld [vmem:[%s16932_s7 + $0xfa4] ss:$16 sps:$4 sm:$0xff]  }
 0x421   : > { %8431 = vmatpush1.bf16.msra.mxu1 %v11855_v54  ;;  %v11914_v54 = vld [vmem:[%s16932_s7 + $0xec4] ss:$16 sps:$4 sm:$0xff]  }
 0x422   : > { %8432 = vmatprep.subr.bf16.mxu1 %v11863_v46  ;;  %v3489_v46 = vrot.slane %v14811_v2, 3 }
 0x423   : > { %8474 = vmatpush2.bf16.msra.mxu0 %v11858_v14  ;;  %v3482_v14 = vrot.slane %v14818_v23, 3  ;;  %v12523_v23 = vld [vmem:[%s16932_s7 + $0xcac] ss:$16 sps:$4 sm:$0xff]  }
 0x424   : > { %8475 = vmatprep.subr.bf16.mxu0 %v11866_v27  ;;  %v11917_v27 = vld [vmem:[%s16932_s7 + $0xcc4] ss:$16 sps:$4 sm:$0xff]  }
 0x425   : > { %8433 = vmatpush2.bf16.msra.mxu1 %v11861_v11  ;;  %v3487_v11 = vrot.slane %v14825_v42, 3  ;;  %v12526_v42 = vld [vmem:[%s16932_s7 + $0xe0c] ss:$16 sps:$4 sm:$0xff]  }
 0x426   : > { %8434 = vmatprep.subr.bf16.mxu1 %v11869_v33  ;;  %v11912_v33 = vld [vmem:[%s16932_s7 + $0xec0] ss:$16 sps:$4 sm:$0xff]  }
 0x427   : > { %8476 = vmatpush2.bf16.msra.mxu0 %v11864_v1  ;;  %v11920_v1 = vld [vmem:[%s16932_s7 + $0xea4] ss:$16 sps:$4 sm:$0xff]  }
 0x428   : > { %8477 = vmatprep.subr.bf16.mxu0 %v11872_v56  ;;  %v11915_v56 = vld [vmem:[%s16932_s7 + $0xcc0] ss:$16 sps:$4 sm:$0xff]  }
 0x429   : > { %8435 = vmatpush2.bf16.msra.mxu1 %v11867_v18  ;;  %v11923_v18 = vld [vmem:[%s16932_s7 + $0xca4] ss:$16 sps:$4 sm:$0xff]  }
 0x42a   : > { %8436 = vmatprep.subr.bf16.mxu1 %v11875_v32  ;;  %v11918_v32 = vld [vmem:[%s16932_s7 + $0xea0] ss:$16 sps:$4 sm:$0xff]  }
 0x42b   : > { %8478 = vmatpush2.bf16.msra.mxu0 %v11870_v43  ;;  %v11926_v43 = vld [vmem:[%s16932_s7 + $0xe84] ss:$16 sps:$4 sm:$0xff]  }
 0x42c   : > { %8479 = vmatprep.subr.bf16.mxu0 %v11878_v55  ;;  %v11921_v55 = vld [vmem:[%s16932_s7 + $0xca0] ss:$16 sps:$4 sm:$0xff]  }
 0x42d   : > { %8437 = vmatpush2.bf16.msra.mxu1 %v11873_v0  ;;  %v11929_v0 = vld [vmem:[%s16932_s7 + $0xc84] ss:$16 sps:$4 sm:$0xff]  }
 0x42e   : > { %8438 = vmatprep.subr.bf16.mxu1 %v11881_v63  ;;  %v11924_v63 = vld [vmem:[%s16932_s7 + $0xe80] ss:$16 sps:$4 sm:$0xff]  }
 0x42f   : > { %8480 = vmatpush2.bf16.msra.mxu0 %v11876_v38  ;;  %v11932_v38 = vld [vmem:[%s16932_s7 + $0xe64] ss:$16 sps:$4 sm:$0xff]  }
 0x430   : > { %8481 = vmatprep.subr.bf16.mxu0 %v11884_v47  ;;  %v11927_v47 = vld [vmem:[%s16932_s7 + $0xc80] ss:$16 sps:$4 sm:$0xff]  }
 0x431   : > { %8439 = vmatpush2.bf16.msra.mxu1 %v11879_v17  ;;  %v11935_v17 = vld [vmem:[%s16932_s7 + $0xc64] ss:$16 sps:$4 sm:$0xff]  }
 0x432   : > { %8440 = vmatprep.subr.bf16.mxu1 %v11887_v12  ;;  %v11930_v12 = vld [vmem:[%s16932_s7 + $0xe60] ss:$16 sps:$4 sm:$0xff]  }
 0x433   : > { %8482 = vmatpush2.bf16.msra.mxu0 %v11882_v40  ;;  %v11938_v40 = vld [vmem:[%s16932_s7 + $0xe44] ss:$16 sps:$4 sm:$0xff]  }
 0x434   : > { %8483 = vmatprep.subr.bf16.mxu0 %v11890_v5  ;;  %v11933_v5 = vld [vmem:[%s16932_s7 + $0xc60] ss:$16 sps:$4 sm:$0xff]  }
 0x435   : > { %8441 = vmatpush2.bf16.msra.mxu1 %v11885_v6  ;;  %v11941_v6 = vld [vmem:[%s16932_s7 + $0xc44] ss:$16 sps:$4 sm:$0xff]  }
 0x436   : > { %8442 = vmatprep.subr.bf16.mxu1 %v11893_v37  ;;  %v11936_v37 = vld [vmem:[%s16932_s7 + $0xe40] ss:$16 sps:$4 sm:$0xff]  }
 0x437   : > { %8484 = vmatpush2.bf16.msra.mxu0 %v11888_v31  ;;  %v11944_v31 = vld [vmem:[%s16932_s7 + $0xe24] ss:$16 sps:$4 sm:$0xff]  }
 0x438   : > { %8485 = vmatprep.subr.bf16.mxu0 %v11896_v58  ;;  %v11947_v58 = vld [vmem:[%s16932_s7 + $0xc24] ss:$16 sps:$4 sm:$0xff]  }
 0x439   : > { %8443 = vmatpush2.bf16.msra.mxu1 %v11891_v61  ;;  %v11950_v61 = vld [vmem:[%s16932_s7 + $0xe04] ss:$16 sps:$4 sm:$0xff]  }
 0x43a   : > { %8444 = vmatprep.subr.bf16.mxu1 %v11899_v53  ;;  %v11945_v53 = vld [vmem:[%s16932_s7 + $0xc20] ss:$16 sps:$4 sm:$0xff]  }
 0x43b   : > { %8486 = vmatpush2.bf16.msra.mxu0 %v11894_v26  ;;  %v11953_v26 = vld [vmem:[%s16932_s7 + $0xc04] ss:$16 sps:$4 sm:$0xff]  }
 0x43c   : > { %8487 = vmatprep.subr.bf16.mxu0 %v11902_v13  ;;  %v11948_v13 = vld [vmem:[%s16932_s7 + $0xe00] ss:$16 sps:$4 sm:$0xff]  }
 0x43d   : > { %8445 = vmatpush2.bf16.msra.mxu1 %v11897_v51  ;;  %v11956_v51 = vld [vmem:[%s16932_s7 + $0xfe4] ss:$16 sps:$4 sm:$0xff]  }
 0x43e   : > { %8446 = vmatprep.subr.bf16.mxu1 %v11905_v4  ;;  %v11959_v4 = vld [vmem:[%s16932_s7 + $0xde4] ss:$16 sps:$4 sm:$0xff]  }
 0x43f   : > { %8488 = vmatpush2.bf16.msra.mxu0 %v11900_v29  ;;  %v11962_v29 = vld [vmem:[%s16932_s7 + $0xfc4] ss:$16 sps:$4 sm:$0xff]  }
 0x440   : > { %8539 = vmatprep.subr.bf16.mxu0 %v11908_v36  ;;  %v11965_v36 = vld [vmem:[%s16932_s7 + $0xdc4] ss:$16 sps:$4 sm:$0xff]  }
 0x441   : > { %8447 = vmatpush2.bf16.msra.mxu1 %v11903_v10  ;;  %v11960_v10 = vld [vmem:[%s16932_s7 + $0xfc0] ss:$16 sps:$4 sm:$0xff]  }
 0x442   : > { %8490 = vmatmul.mubr.bf16.vlgmr.msra.gmra.mxu0 %v3484_v52  ;;  %8498 = vmatprep.subr.bf16.mxu1 %v11911_v62  ;;  %v11963_v62 = vld [vmem:[%s16932_s7 + $0xdc0] ss:$16 sps:$4 sm:$0xff]  }
 0x443   : > { %8540 = vmatpush1.bf16.msra.mxu0 %v11906_v59  ;;  %8571 = vmatprep.mubr.bf16.mxu0 %v3489_v46  ;;  %v11971_v59 = vld [vmem:[%s16932_s7 + $0xda4] ss:$16 sps:$4 sm:$0xff]  }
 0x444   : > { %8449 = vmatmul.mubr.bf16.vlgmr.msra.gmra.mxu1 %v3482_v14  ;;  %8541 = vmatprep.subr.bf16.mxu0 %v11914_v54  ;;  %v11966_v54 = vld [vmem:[%s16932_s7 + $0xfa0] ss:$16 sps:$4 sm:$0xff]  }
 0x445   : > { %8499 = vmatpush1.bf16.msra.mxu1 %v11909_v7  ;;  %8530 = vmatprep.mubr.bf16.mxu1 %v3487_v11  ;;  %v11974_v7 = vld [vmem:[%s16932_s7 + $0xf84] ss:$16 sps:$4 sm:$0xff]  }
 0x446   : > { %8500 = vmatprep.subr.bf16.mxu1 %v11917_v27  ;;  %v11969_v27 = vld [vmem:[%s16932_s7 + $0xda0] ss:$16 sps:$4 sm:$0xff]  }
 0x447   : > { %8542 = vmatpush1.bf16.msra.mxu0 %v11912_v33  ;;  %v11977_v33 = vld [vmem:[%s16932_s7 + $0xd84] ss:$16 sps:$4 sm:$0xff]  }
 0x448   : > { %8543 = vmatprep.subr.bf16.mxu0 %v11920_v1  ;;  %v11972_v1 = vld [vmem:[%s16932_s7 + $0xf80] ss:$16 sps:$4 sm:$0xff]  }
 0x449   : > { %8501 = vmatpush1.bf16.msra.mxu1 %v11915_v56  ;;  %v11980_v56 = vld [vmem:[%s16932_s7 + $0xf64] ss:$16 sps:$4 sm:$0xff]  }
 0x44a   : > { %8502 = vmatprep.subr.bf16.mxu1 %v11923_v18  ;;  %v11975_v18 = vld [vmem:[%s16932_s7 + $0xd80] ss:$16 sps:$4 sm:$0xff]  }
 0x44b   : > { %8544 = vmatpush1.bf16.msra.mxu0 %v11918_v32  ;;  %v11983_v32 = vld [vmem:[%s16932_s7 + $0xd64] ss:$16 sps:$4 sm:$0xff]  }
 0x44c   : > { %8545 = vmatprep.subr.bf16.mxu0 %v11926_v43  ;;  %v11978_v43 = vld [vmem:[%s16932_s7 + $0xf60] ss:$16 sps:$4 sm:$0xff]  }
 0x44d   : > { %8503 = vmatpush1.bf16.msra.mxu1 %v11921_v55  ;;  %v11986_v55 = vld [vmem:[%s16932_s7 + $0xf44] ss:$16 sps:$4 sm:$0xff]  }
 0x44e   : > { %8504 = vmatprep.subr.bf16.mxu1 %v11929_v0  ;;  %v11981_v0 = vld [vmem:[%s16932_s7 + $0xd60] ss:$16 sps:$4 sm:$0xff]  }
 0x44f   : > { %8546 = vmatpush1.bf16.msra.mxu0 %v11924_v63  ;;  %v11989_v63 = vld [vmem:[%s16932_s7 + $0xd44] ss:$16 sps:$4 sm:$0xff]  }
 0x450   : > { %8547 = vmatprep.subr.bf16.mxu0 %v11932_v38  ;;  %v11984_v38 = vld [vmem:[%s16932_s7 + $0xf40] ss:$16 sps:$4 sm:$0xff]  }
 0x451   : > { %8505 = vmatpush1.bf16.msra.mxu1 %v11927_v47  ;;  %v3383_v47 = vpop.permute.xlu1 %3382 }
 0x452   : > { %8506 = vmatprep.subr.bf16.mxu1 %v11935_v17  ;;  %v11992_v17 = vld [vmem:[%s16932_s7 + $0xf24] ss:$16 sps:$4 sm:$0xff]  }
 0x453   : > { %8548 = vmatpush1.bf16.msra.mxu0 %v11930_v12  ;;  %v3423_v12 = vpop.permute.xlu0 %3422 }
 0x454   : > { %8549 = vmatprep.subr.bf16.mxu0 %v11938_v40  ;;  %v11987_v40 = vld [vmem:[%s16932_s7 + $0xd40] ss:$16 sps:$4 sm:$0xff]  }
 0x455   : > { %8507 = vmatpush1.bf16.msra.mxu1 %v11933_v5  ;;  %v8229_v5 = vlaneseq }
 0x456   : > { %8508 = vmatprep.subr.bf16.mxu1 %v11941_v6  ;;  %v11995_v6 = vld [vmem:[%s16932_s7 + $0xd24] ss:$16 sps:$4 sm:$0xff]  }
 0x457   : > { %8550 = vmatpush1.bf16.msra.mxu0 %v11936_v37  ;;  %v11990_v37 = vld [vmem:[%s16932_s7 + $0xf20] ss:$16 sps:$4 sm:$0xff]  }
 0x458   : > { %8551 = vmatprep.subr.bf16.mxu0 %v11944_v31  ;;  %v11998_v31 = vld [vmem:[%s16932_s7 + $0xf04] ss:$16 sps:$4 sm:$0xff]  }
 0x459   : > { %8509 = vmatpush1.bf16.msra.mxu1 %v11939_v22  ;;  %v11993_v22 = vld [vmem:[%s16932_s7 + $0xd20] ss:$16 sps:$4 sm:$0xff]  }
 0x45a   : > { %8510 = vmatprep.subr.bf16.mxu1 %v11947_v58  ;;  %v15012_v58 = vshrl.u32 %v8229_v5, 7 }
 0x45b   : > { %8552 = vmatpush1.bf16.msra.mxu0 %v11942_v41  ;;  %v3391_v41 = vpop.permute.xlu1 %3390 }
 0x45c   : > { %8553 = vmatprep.subr.bf16.mxu0 %v11950_v61  ;;  %v12001_v61 = vld [vmem:[%s16932_s7 + $0xd04] ss:$16 sps:$4 sm:$0xff]  }
 0x45d   : > { %8511 = vmatpush1.bf16.msra.mxu1 %v11945_v53  ;;  %v3388_v53 = vrot.slane %v14313_v15, 1 }
 0x45e   : > { %8512 = vmatprep.subr.bf16.mxu1 %v11953_v26  ;;  %v3434_v26 = vpop.permute.xlu0 %3433 }
 0x45f   : > { %8554 = vmatpush1.bf16.msra.mxu0 %v11948_v13  ;;  %v11996_v13 = vld [vmem:[%s16932_s7 + $0xf00] ss:$16 sps:$4 sm:$0xff]  }
 0x460   : > { %8555 = vmatprep.subr.bf16.mxu0 %v11956_v51  ;;  %v3431_v51 = vrot.slane %v14357_v48, 4 }
 0x461   : > { %8513 = vmatpush1.bf16.msra.mxu1 %v11951_v21  ;;  %v12004_v21 = vld [vmem:[%s16932_s7 + $0x12e4] ss:$16 sps:$4 sm:$0xff]  }
 0x462   : > { %8514 = vmatprep.subr.bf16.mxu1 %v11959_v4  ;;  %v3380_v4 = vrot.slane %v14334_v28, 5  ;;  %v4307_v28 = vld [vmem:[%s16933_s8] sm:$0xf] }
 0x463   : > { %8556 = vmatpush2.bf16.msra.mxu0 %v11954_v25  ;;  %v15027_v25 = vsel %vm3331_vm9, %v3388_v53, %v3391_v41 }
 0x464   : > { %8557 = vmatprep.subr.bf16.mxu0 %v11962_v29  ;;  %v11999_v29 = vld [vmem:[%s16932_s7 + $0xd00] ss:$16 sps:$4 sm:$0xff]  }
 0x465   : > { %8515 = vmatpush2.bf16.msra.mxu1 %v11957_v8  ;;  %v8231_v8 = vsub.s32 0, %v15012_v58 }
 0x466   : > { %8516 = vmatprep.subr.bf16.mxu1 %v11965_v36  ;;  %v15034_v36 = vsel %vm3331_vm9, %v3431_v51, %v3434_v26  ;;  %v12022_v26 = vld [vmem:[%s16932_s7 + $0x1284] ss:$16 sps:$4 sm:$0xff]  }
 0x467   : > { %8558 = vmatpush2.bf16.msra.mxu0 %v11960_v10  ;;  %v12007_v10 = vld [vmem:[%s16932_s7 + $0x10e4] ss:$16 sps:$4 sm:$0xff]  }
 0x468   : > { %8559 = vmatprep.subr.bf16.mxu0 %v11968_v60  ;;  %v15043_v60 = vsel %vm3331_vm9, %v3380_v4, %v3383_v47  ;;  %v12025_v4 = vld [vmem:[%s16932_s7 + $0x1084] ss:$16 sps:$4 sm:$0xff]  }
 0x469   : > { %8517 = vmatpush2.bf16.msra.mxu1 %v11963_v62  ;;  %v12002_v62 = vld [vmem:[%s16932_s7 + $0x12e0] ss:$16 sps:$4 sm:$0xff]  }
 0x46a   : > { %8518 = vmatprep.subr.bf16.mxu1 %v11971_v59  ;;  %v8235_v59 = vsub.s32 1, %v15012_v58 }
 0x46b   : > { %8560 = vmatpush2.bf16.msra.mxu0 %v11966_v54  ;;  %v3488_v54 = vrot.slane %v15027_v25, 3  ;;  %v12592_v25 = vld [vmem:[%s16932_s7 + $0x12ac] ss:$16 sps:$4 sm:$0xff]  }
 0x46c   : > { %8561 = vmatprep.subr.bf16.mxu0 %v11974_v7  ;;  %v15051_v7 = vsel %vm3331_vm9, %v3388_v53, %v3423_v12 }
 0x46d   : > { %8519 = vmatpush2.bf16.msra.mxu1 %v11969_v27  ;;  %v12010_v27 = vld [vmem:[%s16932_s7 + $0x12c4] ss:$16 sps:$4 sm:$0xff]  }
 0x46e   : > { %8520 = vmatprep.subr.bf16.mxu1 %v11977_v33  ;;  %v3509_v33 = vrot.slane %v15034_v36, 6  ;;  %v12595_v36 = vld [vmem:[%s16932_s7 + $0xd2c] ss:$16 sps:$4 sm:$0xff]  }
 0x46f   : > { %8562 = vmatpush2.bf16.msra.mxu0 %v11972_v1  ;;  %v12005_v1 = vld [vmem:[%s16932_s7 + $0x10e0] ss:$16 sps:$4 sm:$0xff]  }
 0x470   : > { %8563 = vmatprep.subr.bf16.mxu0 %v11980_v56  ;;  %v8232_v56 = vrot.slane %v4307_v28, %v8231_v8  ;;  %v12028_v8 = vld [vmem:[%s16932_s7 + $0x1264] ss:$16 sps:$4 sm:$0xff]  }
 0x471   : > { %8521 = vmatpush2.bf16.msra.mxu1 %v11975_v18  ;;  %v3486_v18 = vrot.slane %v15043_v60, 3  ;;  %v12619_v60 = vld [vmem:[%s16932_s7 + $0x10ac] ss:$16 sps:$4 sm:$0xff]  }
 0x472   : > { %8522 = vmatprep.subr.bf16.mxu1 %v11983_v32 }
 0x473   : > { %8564 = vmatpush2.bf16.msra.mxu0 %v11978_v43  ;;  %v12013_v43 = vld [vmem:[%s16932_s7 + $0x10c4] ss:$16 sps:$4 sm:$0xff]  }
 0x474   : > { %8565 = vmatprep.subr.bf16.mxu0 %v11986_v55  ;;  %v3507_v55 = vrot.slane %v15051_v7, 6 }
 0x475   : > { %8523 = vmatpush2.bf16.msra.mxu1 %v11981_v0  ;;  %v12008_v0 = vld [vmem:[%s16932_s7 + $0x12c0] ss:$16 sps:$4 sm:$0xff]  }
 0x476   : > { %8524 = vmatprep.subr.bf16.mxu1 %v11989_v63  ;;  %v8236_v63 = vrot.slane %v4307_v28, %v8235_v59  ;;  %v12031_v28 = vld [vmem:[%s16932_s7 + $0x1064] ss:$16 sps:$4 sm:$0xff]  }
 0x477   : > { %8566 = vmatpush2.bf16.msra.mxu0 %v11984_v38  ;;  %v12034_v59 = vld [vmem:[%s16932_s7 + $0x1244] ss:$16 sps:$4 sm:$0xff]  }
 0x478   : > { %8567 = vmatprep.subr.bf16.mxu0 %v11992_v17  ;;  %v12016_v17 = vld [vmem:[%s16932_s7 + $0x12a4] ss:$16 sps:$4 sm:$0xff]  }
 0x479   : > { %8525 = vmatpush2.bf16.msra.mxu1 %v11987_v40  ;;  %v12011_v40 = vld [vmem:[%s16932_s7 + $0x10c0] ss:$16 sps:$4 sm:$0xff]  }
 0x47a   : > { %8526 = vmatprep.subr.bf16.mxu1 %v11995_v6 }
 0x47b   : > { %8568 = vmatpush2.bf16.msra.mxu0 %v11990_v37  ;;  %v12019_v37 = vld [vmem:[%s16932_s7 + $0x10a4] ss:$16 sps:$4 sm:$0xff]  }
 0x47c   : > { %8569 = vmatprep.subr.bf16.mxu0 %v11998_v31 }
 0x47d   : > { %8527 = vmatpush2.bf16.msra.mxu1 %v11993_v22  ;;  %v12014_v22 = vld [vmem:[%s16932_s7 + $0x12a0] ss:$16 sps:$4 sm:$0xff]  }
 0x47e   : > { %8528 = vmatprep.subr.bf16.mxu1 %v12001_v61 }
 0x47f   : > { %8570 = vmatpush2.bf16.msra.mxu0 %v11996_v13  ;;  %v12017_v13 = vld [vmem:[%s16932_s7 + $0x10a0] ss:$16 sps:$4 sm:$0xff]  }
 0x480   : > { %8621 = vmatprep.subr.bf16.mxu0 %v12004_v21 }
 0x481   : > { %8529 = vmatpush2.bf16.msra.mxu1 %v11999_v29  ;;  %v12020_v29 = vld [vmem:[%s16932_s7 + $0x1280] ss:$16 sps:$4 sm:$0xff]  }
 0x482   : > { %8572 = vmatmul.mubr.bf16.vlgmr.msra.gmra.mxu0 %v3488_v54  ;;  %v8327_v32 = vpop.f32.mrf.mxu0  ;;  %8580 = vmatprep.subr.bf16.mxu1 %v12007_v10  ;;  %v12023_v10 = vld [vmem:[%s16932_s7 + $0x1080] ss:$16 sps:$4 sm:$0xff]  }
 0x483   : > { %8622 = vmatpush1.bf16.msra.mxu0 %v12002_v62  ;;  %8653 = vmatprep.mubr.bf16.mxu0 %v3509_v33  ;;  %v12026_v62 = vld [vmem:[%s16932_s7 + $0x1260] ss:$16 sps:$4 sm:$0xff]  }
 0x484   : > { %8531 = vmatmul.mubr.bf16.vlgmr.msra.gmra.mxu1 %v3486_v18  ;;  %v8286_v38 = vpop.f32.mrf.mxu1  ;;  %v8329_v47 = vpop.f32.mrf.mxu0  ;;  %8623 = vmatprep.subr.bf16.mxu0 %v12010_v27  ;;  %v12029_v27 = vld [vmem:[%s16932_s7 + $0x1060] ss:$16 sps:$4 sm:$0xff]  }
 0x485   : > { %v8287_v12 = vadd.f32 %v8286_v38, %v8232_v56  ;;  %8581 = vmatpush1.bf16.msra.mxu1 %v12005_v1  ;;  %8612 = vmatprep.mubr.bf16.mxu1 %v3507_v55  ;;  %v12037_v1 = vld [vmem:[%s16932_s7 + $0x1044] ss:$16 sps:$4 sm:$0xff]   ;;  %v12032_v56 = vld [vmem:[%s16932_s7 + $0x1240] ss:$16 sps:$4 sm:$0xff]  }
 0x486   : > { %v8288_v5 = vpop.f32.mrf.mxu1  ;;  %v8331_v6 = vpop.f32.mrf.mxu0  ;;  %8582 = vmatprep.subr.bf16.mxu1 %v12013_v43  ;;  %v12035_v43 = vld [vmem:[%s16932_s7 + $0x1040] ss:$16 sps:$4 sm:$0xff]   ;;  %v12046_v38 = vld [vmem:[%s16932_s7 + $0x1204] ss:$16 sps:$4 sm:$0xff]  }
 0x487   : > { %v8289_v31 = vadd.f32 %v8288_v5, %v8236_v63  ;;  %8624 = vmatpush1.bf16.msra.mxu0 %v12008_v0  ;;  %v15088_v41 = vadd.f32 %v8327_v32, %v8287_v12  ;;  %v12040_v32 = vld [vmem:[%s16932_s7 + $0x1224] ss:$16 sps:$4 sm:$0xff]   ;;  %v12038_v63 = vld [vmem:[%s16932_s7 + $0x1220] ss:$16 sps:$4 sm:$0xff]  }
 0x488   : > { %v8290_v61 = vpop.f32.mrf.mxu1  ;;  %v8332_v53 = vpop.f32.mrf.mxu0  ;;  %8625 = vmatprep.subr.bf16.mxu0 %v12016_v17  ;;  %v12043_v0 = vld [vmem:[%s16932_s7 + $0x1024] ss:$16 sps:$4 sm:$0xff]   ;;  %v12044_v12 = vld [vmem:[%s16932_s7 + $0x1200] ss:$16 sps:$4 sm:$0xff]  }
 0x489   : > { %8583 = vmatpush1.bf16.msra.mxu1 %v12011_v40  ;;  %v15096_v51 = vadd.f32 %v8329_v47, %v8289_v31  ;;  %v12041_v47 = vld [vmem:[%s16932_s7 + $0x1020] ss:$16 sps:$4 sm:$0xff]   ;;  %v12049_v17 = vld [vmem:[%s16932_s7 + $0x1004] ss:$16 sps:$4 sm:$0xff]  }
 0x48a   : > { %v8291_v21 = vpop.f32.mrf.mxu1  ;;  %8584 = vmatprep.subr.bf16.mxu1 %v12019_v37  ;;  %v12052_v40 = vld [vmem:[%s16932_s7 + $0x13e4] ss:$16 sps:$4 sm:$0xff]   ;;  %v12047_v5 = vld [vmem:[%s16932_s7 + $0x1000] ss:$16 sps:$4 sm:$0xff]  }
 0x48b   : > { %8626 = vmatpush1.bf16.msra.mxu0 %v12014_v22  ;;  %v12055_v6 = vld [vmem:[%s16932_s7 + $0x11e4] ss:$16 sps:$4 sm:$0xff]   ;;  %v12050_v37 = vld [vmem:[%s16932_s7 + $0x13e0] ss:$16 sps:$4 sm:$0xff]  }
 0x48c   : > { %8627 = vmatprep.subr.bf16.mxu0 %v12022_v26  ;;  %v12058_v31 = vld [vmem:[%s16932_s7 + $0x13c4] ss:$16 sps:$4 sm:$0xff]   ;;  %v12053_v22 = vld [vmem:[%s16932_s7 + $0x11e0] ss:$16 sps:$4 sm:$0xff]  }
 0x48d   : > { %8585 = vmatpush1.bf16.msra.mxu1 %v12017_v13  ;;  %v12061_v61 = vld [vmem:[%s16932_s7 + $0x11c4] ss:$16 sps:$4 sm:$0xff]   ;;  %v12056_v53 = vld [vmem:[%s16932_s7 + $0x13c0] ss:$16 sps:$4 sm:$0xff]  }
 0x48e   : > { %8586 = vmatprep.subr.bf16.mxu1 %v12025_v4  ;;  %v12064_v26 = vld [vmem:[%s16932_s7 + $0x13a4] ss:$16 sps:$4 sm:$0xff]   ;;  %v12059_v13 = vld [vmem:[%s16932_s7 + $0x11c0] ss:$16 sps:$4 sm:$0xff]  }
 0x48f   : > { %8628 = vmatpush1.bf16.msra.mxu0 %v12020_v29  ;;  %v12067_v21 = vld [vmem:[%s16932_s7 + $0x11a4] ss:$16 sps:$4 sm:$0xff]   ;;  %v12062_v4 = vld [vmem:[%s16932_s7 + $0x13a0] ss:$16 sps:$4 sm:$0xff]  }
 0x490   : > { %8629 = vmatprep.subr.bf16.mxu0 %v12028_v8  ;;  %v12070_v29 = vld [vmem:[%s16932_s7 + $0x1384] ss:$16 sps:$4 sm:$0xff]   ;;  %v12065_v8 = vld [vmem:[%s16932_s7 + $0x11a0] ss:$16 sps:$4 sm:$0xff]  }
 0x491   : > { %8587 = vmatpush1.bf16.msra.mxu1 %v12023_v10  ;;  %v12073_v10 = vld [vmem:[%s16932_s7 + $0x1184] ss:$16 sps:$4 sm:$0xff]  }
 0x492   : > { %8588 = vmatprep.subr.bf16.mxu1 %v12031_v28  ;;  %v12068_v28 = vld [vmem:[%s16932_s7 + $0x1380] ss:$16 sps:$4 sm:$0xff]  }
 0x493   : > { %8630 = vmatpush1.bf16.msra.mxu0 %v12026_v62  ;;  %v12076_v62 = vld [vmem:[%s16932_s7 + $0x1364] ss:$16 sps:$4 sm:$0xff]  }
 0x494   : > { %8631 = vmatprep.subr.bf16.mxu0 %v12034_v59  ;;  %v12071_v59 = vld [vmem:[%s16932_s7 + $0x1180] ss:$16 sps:$4 sm:$0xff]  }
 0x495   : > { %8589 = vmatpush1.bf16.msra.mxu1 %v12029_v27  ;;  %v12079_v27 = vld [vmem:[%s16932_s7 + $0x1164] ss:$16 sps:$4 sm:$0xff]  }
 0x496   : > { %8590 = vmatprep.subr.bf16.mxu1 %v12037_v1  ;;  %v12074_v1 = vld [vmem:[%s16932_s7 + $0x1360] ss:$16 sps:$4 sm:$0xff]  }
 0x497   : > { %8632 = vmatpush1.bf16.msra.mxu0 %v12032_v56  ;;  %v12082_v56 = vld [vmem:[%s16932_s7 + $0x1344] ss:$16 sps:$4 sm:$0xff]  }
 0x498   : > { %8633 = vmatprep.subr.bf16.mxu0 %v12040_v32  ;;  %v12077_v32 = vld [vmem:[%s16932_s7 + $0x1160] ss:$16 sps:$4 sm:$0xff]  }
 0x499   : > { %8591 = vmatpush1.bf16.msra.mxu1 %v12035_v43  ;;  %v12085_v43 = vld [vmem:[%s16932_s7 + $0x1144] ss:$16 sps:$4 sm:$0xff]  }
 0x49a   : > { %8592 = vmatprep.subr.bf16.mxu1 %v12043_v0  ;;  %v12080_v0 = vld [vmem:[%s16932_s7 + $0x1340] ss:$16 sps:$4 sm:$0xff]  }
 0x49b   : > { %8634 = vmatpush1.bf16.msra.mxu0 %v12038_v63  ;;  %v3419_v63 = vpop.permute.xlu1 %3418 }
 0x49c   : > { %8635 = vmatprep.subr.bf16.mxu0 %v12046_v38  ;;  %v12088_v38 = vld [vmem:[%s16932_s7 + $0x1324] ss:$16 sps:$4 sm:$0xff]  }
 0x49d   : > { %8593 = vmatpush1.bf16.msra.mxu1 %v12041_v47  ;;  %v3440_v47 = vpop.permute.xlu0 %3439 }
 0x49e   : > { %8594 = vmatprep.subr.bf16.mxu1 %v12049_v17  ;;  %v12083_v17 = vld [vmem:[%s16932_s7 + $0x1140] ss:$16 sps:$4 sm:$0xff]  }
 0x49f   : > { %8636 = vmatpush1.bf16.msra.mxu0 %v12044_v12  ;;  %v12091_v12 = vld [vmem:[%s16932_s7 + $0x1124] ss:$16 sps:$4 sm:$0xff]  }
 0x4a0   : > { %8637 = vmatprep.subr.bf16.mxu0 %v12052_v40  ;;  %v12086_v40 = vld [vmem:[%s16932_s7 + $0x1320] ss:$16 sps:$4 sm:$0xff]  }
 0x4a1   : > { %8595 = vmatpush1.bf16.msra.mxu1 %v12047_v5  ;;  %v12094_v5 = vld [vmem:[%s16932_s7 + $0x1304] ss:$16 sps:$4 sm:$0xff]  }
 0x4a2   : > { %8596 = vmatprep.subr.bf16.mxu1 %v12055_v6  ;;  %v12089_v6 = vld [vmem:[%s16932_s7 + $0x1120] ss:$16 sps:$4 sm:$0xff]  }
 0x4a3   : > { %8638 = vmatpush2.bf16.msra.mxu0 %v12050_v37  ;;  %v3430_v37 = vpop.permute.xlu1 %3429 }
 0x4a4   : > { %8639 = vmatprep.subr.bf16.mxu0 %v12058_v31  ;;  %v12097_v31 = vld [vmem:[%s16932_s7 + $0x1104] ss:$16 sps:$4 sm:$0xff]  }
 0x4a5   : > { %8597 = vmatpush2.bf16.msra.mxu1 %v12053_v22  ;;  %v3427_v22 = vrot.slane %v14357_v48, 3 }
 0x4a6   : > { %8598 = vmatprep.subr.bf16.mxu1 %v12061_v61  ;;  %v3452_v61 = vpop.permute.xlu0 %3451 }
 0x4a7   : > { %8640 = vmatpush2.bf16.msra.mxu0 %v12056_v53  ;;  %v12092_v53 = vld [vmem:[%s16932_s7 + $0x1300] ss:$16 sps:$4 sm:$0xff]  }
 0x4a8   : > { %8641 = vmatprep.subr.bf16.mxu0 %v12064_v26  ;;  %v3446_v26 = vrot.slane %v14350_v16, 2 }
 0x4a9   : > { %8599 = vmatpush2.bf16.msra.mxu1 %v12059_v13  ;;  %v12100_v13 = vld [vmem:[%s16932_s7 + $0x16e4] ss:$16 sps:$4 sm:$0xff]  }
 0x4aa   : > { %8600 = vmatprep.subr.bf16.mxu1 %v12067_v21  ;;  %v15254_v21 = vsel %vm3331_vm9, %v3427_v22, %v3430_v37  ;;  %v12115_v37 = vld [vmem:[%s16932_s7 + $0x14a4] ss:$16 sps:$4 sm:$0xff]  }
 0x4ab   : > { %8642 = vmatpush2.bf16.msra.mxu0 %v12062_v4  ;;  %v12095_v4 = vld [vmem:[%s16932_s7 + $0x1100] ss:$16 sps:$4 sm:$0xff]  }
 0x4ac   : > { %8643 = vmatprep.subr.bf16.mxu0 %v12070_v29  ;;  %v15260_v29 = vsel %vm3331_vm9, %v3446_v26, %v3452_v61  ;;  %v12118_v26 = vld [vmem:[%s16932_s7 + $0x1684] ss:$16 sps:$4 sm:$0xff]  }
 0x4ad   : > { %8601 = vmatpush2.bf16.msra.mxu1 %v12065_v8  ;;  %v12103_v8 = vld [vmem:[%s16932_s7 + $0x14e4] ss:$16 sps:$4 sm:$0xff]  }
 0x4ae   : > { %8602 = vmatprep.subr.bf16.mxu1 %v12073_v10  ;;  %v15267_v10 = vsel %vm3331_vm9, %v14313_v15, %v3419_v63  ;;  %v12101_v15 = vld [vmem:[%s16932_s7 + $0x14e0] ss:$16 sps:$4 sm:$0xff]  }
 0x4af   : > { %8644 = vmatpush2.bf16.msra.mxu0 %v12068_v28  ;;  %v12098_v28 = vld [vmem:[%s16932_s7 + $0x16e0] ss:$16 sps:$4 sm:$0xff]  }
 0x4b0   : > { %8645 = vmatprep.subr.bf16.mxu0 %v12076_v62  ;;  %v3508_v62 = vrot.slane %v15254_v21, 6  ;;  %v12104_v63 = vld [vmem:[%s16932_s7 + $0x16c0] ss:$16 sps:$4 sm:$0xff]   ;;  %v12688_v21 = vld [vmem:[%s16932_s7 + $0x16ac] ss:$16 sps:$4 sm:$0xff]  }
 0x4b1   : > { %8603 = vmatpush2.bf16.msra.mxu1 %v12071_v59  ;;  %v15275_v59 = vsel %vm3331_vm9, %v14326_v45, %v3440_v47 }
 0x4b2   : > { %8604 = vmatprep.subr.bf16.mxu1 %v12079_v27  ;;  %v12106_v27 = vld [vmem:[%s16932_s7 + $0x16c4] ss:$16 sps:$4 sm:$0xff]  }
 0x4b3   : > { %8646 = vmatpush2.bf16.msra.mxu0 %v12074_v1  ;;  %v3513_v1 = vrot.slane %v15260_v29, 6  ;;  %v12691_v29 = vld [vmem:[%s16932_s7 + $0x112c] ss:$16 sps:$4 sm:$0xff]  }
 0x4b4   : > { %8647 = vmatprep.subr.bf16.mxu0 %v12082_v56  ;;  %v3506_v56 = vrot.slane %v15267_v10, 6  ;;  %v12715_v10 = vld [vmem:[%s16932_s7 + $0x14ac] ss:$16 sps:$4 sm:$0xff]  }
 0x4b5   : > { %8605 = vmatpush2.bf16.msra.mxu1 %v12077_v32 }
 0x4b6   : > { %8606 = vmatprep.subr.bf16.mxu1 %v12085_v43  ;;  %v12109_v43 = vld [vmem:[%s16932_s7 + $0x14c4] ss:$16 sps:$4 sm:$0xff]  }
 0x4b7   : > { %8648 = vmatpush2.bf16.msra.mxu0 %v12080_v0  ;;  %v3511_v0 = vrot.slane %v15275_v59, 6 }
 0x4b8   : > { %8649 = vmatprep.subr.bf16.mxu0 %v12088_v38 }
 0x4b9   : > { %8607 = vmatpush2.bf16.msra.mxu1 %v12083_v17  ;;  %v12112_v17 = vld [vmem:[%s16932_s7 + $0x16a4] ss:$16 sps:$4 sm:$0xff]  }
 0x4ba   : > { %8608 = vmatprep.subr.bf16.mxu1 %v12091_v12 }
 0x4bb   : > { %8650 = vmatpush2.bf16.msra.mxu0 %v12086_v40  ;;  %v12107_v40 = vld [vmem:[%s16932_s7 + $0x14c0] ss:$16 sps:$4 sm:$0xff]  }
 0x4bc   : > { %8651 = vmatprep.subr.bf16.mxu0 %v12094_v5 }
 0x4bd   : > { %8609 = vmatpush2.bf16.msra.mxu1 %v12089_v6 }
 0x4be   : > { %8610 = vmatprep.subr.bf16.mxu1 %v12097_v31 }
 0x4bf   : > { %8652 = vmatpush2.bf16.msra.mxu0 %v12092_v53 }
 0x4c0   : > { %8703 = vmatprep.subr.bf16.mxu0 %v12100_v13  ;;  %v12113_v13 = vld [vmem:[%s16932_s7 + $0x14a0] ss:$16 sps:$4 sm:$0xff]  }
 0x4c1   : > { %8611 = vmatpush2.bf16.msra.mxu1 %v12095_v4 }
 0x4c2   : > { %v8409_v32 = vpop.f32.mrf.mxu0  ;;  %8654 = vmatmul.mubr.bf16.vlgmr.msra.gmra.mxu0 %v3508_v62  ;;  %8662 = vmatprep.subr.bf16.mxu1 %v12103_v8  ;;  %v12121_v8 = vld [vmem:[%s16932_s7 + $0x1484] ss:$16 sps:$4 sm:$0xff]  }
 0x4c3   : > { %8704 = vmatpush1.bf16.msra.mxu0 %v12098_v28  ;;  %8735 = vmatprep.mubr.bf16.mxu0 %v3513_v1  ;;  %v12116_v28 = vld [vmem:[%s16932_s7 + $0x1680] ss:$16 sps:$4 sm:$0xff]  }
 0x4c4   : > { %v8368_v38 = vpop.f32.mrf.mxu1  ;;  %v8411_v47 = vpop.f32.mrf.mxu0  ;;  %8613 = vmatmul.mubr.bf16.vlgmr.msra.gmra.mxu1 %v3506_v56  ;;  %8705 = vmatprep.subr.bf16.mxu0 %v12106_v27  ;;  %v12124_v27 = vld [vmem:[%s16932_s7 + $0x1664] ss:$16 sps:$4 sm:$0xff]  }
 0x4c5   : > { %v8369_v12 = vadd.f32 %v8368_v38, %v15088_v41  ;;  %8663 = vmatpush1.bf16.msra.mxu1 %v12101_v15  ;;  %8694 = vmatprep.mubr.bf16.mxu1 %v3511_v0  ;;  %v12110_v41 = vld [vmem:[%s16932_s7 + $0x16a0] ss:$16 sps:$4 sm:$0xff]  }
 0x4c6   : > { %v8370_v5 = vpop.f32.mrf.mxu1  ;;  %v8413_v6 = vpop.f32.mrf.mxu0  ;;  %8664 = vmatprep.subr.bf16.mxu1 %v12109_v43  ;;  %v12119_v15 = vld [vmem:[%s16932_s7 + $0x1480] ss:$16 sps:$4 sm:$0xff]  }
 0x4c7   : > { %v8371_v31 = vadd.f32 %v8370_v5, %v15096_v51  ;;  %8706 = vmatpush1.bf16.msra.mxu0 %v12104_v63  ;;  %v15314_v22 = vadd.f32 %v8409_v32, %v8369_v12  ;;  %v12127_v32 = vld [vmem:[%s16932_s7 + $0x1464] ss:$16 sps:$4 sm:$0xff]   ;;  %v12122_v43 = vld [vmem:[%s16932_s7 + $0x1660] ss:$16 sps:$4 sm:$0xff]  }
 0x4c8   : > { %v8372_v61 = vpop.f32.mrf.mxu1  ;;  %v8414_v53 = vpop.f32.mrf.mxu0  ;;  %8707 = vmatprep.subr.bf16.mxu0 %v12112_v17  ;;  %v12130_v63 = vld [vmem:[%s16932_s7 + $0x1644] ss:$16 sps:$4 sm:$0xff]   ;;  %v12125_v38 = vld [vmem:[%s16932_s7 + $0x1460] ss:$16 sps:$4 sm:$0xff]  }
 0x4c9   : > { %8665 = vmatpush1.bf16.msra.mxu1 %v12107_v40  ;;  %v15322_v51 = vadd.f32 %v8411_v47, %v8371_v31  ;;  %v12133_v47 = vld [vmem:[%s16932_s7 + $0x1444] ss:$16 sps:$4 sm:$0xff]   ;;  %v12128_v17 = vld [vmem:[%s16932_s7 + $0x1640] ss:$16 sps:$4 sm:$0xff]  }
 0x4ca   : > { %v8373_v4 = vpop.f32.mrf.mxu1  ;;  %8666 = vmatprep.subr.bf16.mxu1 %v12115_v37  ;;  %v12136_v12 = vld [vmem:[%s16932_s7 + $0x1624] ss:$16 sps:$4 sm:$0xff]   ;;  %v12131_v40 = vld [vmem:[%s16932_s7 + $0x1440] ss:$16 sps:$4 sm:$0xff]  }
 0x4cb   : > { %8708 = vmatpush1.bf16.msra.mxu0 %v12110_v41  ;;  %v12139_v5 = vld [vmem:[%s16932_s7 + $0x1424] ss:$16 sps:$4 sm:$0xff]   ;;  %v12134_v6 = vld [vmem:[%s16932_s7 + $0x1620] ss:$16 sps:$4 sm:$0xff]  }
 0x4cc   : > { %8709 = vmatprep.subr.bf16.mxu0 %v12118_v26  ;;  %v12142_v37 = vld [vmem:[%s16932_s7 + $0x1604] ss:$16 sps:$4 sm:$0xff]   ;;  %v12137_v31 = vld [vmem:[%s16932_s7 + $0x1420] ss:$16 sps:$4 sm:$0xff]  }
 0x4cd   : > { %8667 = vmatpush1.bf16.msra.mxu1 %v12113_v13  ;;  %v12145_v41 = vld [vmem:[%s16932_s7 + $0x1404] ss:$16 sps:$4 sm:$0xff]   ;;  %v12140_v61 = vld [vmem:[%s16932_s7 + $0x1600] ss:$16 sps:$4 sm:$0xff]  }
 0x4ce   : > { %8668 = vmatprep.subr.bf16.mxu1 %v12121_v8  ;;  %v12148_v53 = vld [vmem:[%s16932_s7 + $0x17e4] ss:$16 sps:$4 sm:$0xff]   ;;  %v12143_v26 = vld [vmem:[%s16932_s7 + $0x1400] ss:$16 sps:$4 sm:$0xff]  }
 0x4cf   : > { %8710 = vmatpush1.bf16.msra.mxu0 %v12116_v28  ;;  %v12151_v13 = vld [vmem:[%s16932_s7 + $0x15e4] ss:$16 sps:$4 sm:$0xff]   ;;  %v12146_v4 = vld [vmem:[%s16932_s7 + $0x17e0] ss:$16 sps:$4 sm:$0xff]  }
 0x4d0   : > { %8711 = vmatprep.subr.bf16.mxu0 %v12124_v27  ;;  %v12154_v8 = vld [vmem:[%s16932_s7 + $0x17c4] ss:$16 sps:$4 sm:$0xff]   ;;  %v12149_v28 = vld [vmem:[%s16932_s7 + $0x15e0] ss:$16 sps:$4 sm:$0xff]  }
 0x4d1   : > { %8669 = vmatpush1.bf16.msra.mxu1 %v12119_v15  ;;  %v12157_v27 = vld [vmem:[%s16932_s7 + $0x15c4] ss:$16 sps:$4 sm:$0xff]   ;;  %v12152_v15 = vld [vmem:[%s16932_s7 + $0x17c0] ss:$16 sps:$4 sm:$0xff]  }
 0x4d2   : > { %8670 = vmatprep.subr.bf16.mxu1 %v12127_v32  ;;  %v12160_v32 = vld [vmem:[%s16932_s7 + $0x17a4] ss:$16 sps:$4 sm:$0xff]  }
 0x4d3   : > { %8712 = vmatpush1.bf16.msra.mxu0 %v12122_v43  ;;  %v12155_v43 = vld [vmem:[%s16932_s7 + $0x15c0] ss:$16 sps:$4 sm:$0xff]  }
 0x4d4   : > { %8713 = vmatprep.subr.bf16.mxu0 %v12130_v63  ;;  %v12163_v63 = vld [vmem:[%s16932_s7 + $0x15a4] ss:$16 sps:$4 sm:$0xff]  }
 0x4d5   : > { %8671 = vmatpush1.bf16.msra.mxu1 %v12125_v38  ;;  %v12158_v38 = vld [vmem:[%s16932_s7 + $0x17a0] ss:$16 sps:$4 sm:$0xff]  }
 0x4d6   : > { %8672 = vmatprep.subr.bf16.mxu1 %v12133_v47  ;;  %v12166_v47 = vld [vmem:[%s16932_s7 + $0x1784] ss:$16 sps:$4 sm:$0xff]  }
 0x4d7   : > { %8714 = vmatpush1.bf16.msra.mxu0 %v12128_v17  ;;  %v12161_v17 = vld [vmem:[%s16932_s7 + $0x15a0] ss:$16 sps:$4 sm:$0xff]  }
 0x4d8   : > { %8715 = vmatprep.subr.bf16.mxu0 %v12136_v12  ;;  %v12169_v12 = vld [vmem:[%s16932_s7 + $0x1584] ss:$16 sps:$4 sm:$0xff]  }
 0x4d9   : > { %8673 = vmatpush1.bf16.msra.mxu1 %v12131_v40  ;;  %v12164_v40 = vld [vmem:[%s16932_s7 + $0x1780] ss:$16 sps:$4 sm:$0xff]  }
 0x4da   : > { %8674 = vmatprep.subr.bf16.mxu1 %v12139_v5  ;;  %v12172_v5 = vld [vmem:[%s16932_s7 + $0x1764] ss:$16 sps:$4 sm:$0xff]  }
 0x4db   : > { %8716 = vmatpush1.bf16.msra.mxu0 %v12134_v6  ;;  %v12167_v6 = vld [vmem:[%s16932_s7 + $0x1580] ss:$16 sps:$4 sm:$0xff]  }
 0x4dc   : > { %8717 = vmatprep.subr.bf16.mxu0 %v12142_v37  ;;  %v12175_v37 = vld [vmem:[%s16932_s7 + $0x1564] ss:$16 sps:$4 sm:$0xff]  }
 0x4dd   : > { %8675 = vmatpush1.bf16.msra.mxu1 %v12137_v31  ;;  %v12170_v31 = vld [vmem:[%s16932_s7 + $0x1760] ss:$16 sps:$4 sm:$0xff]  }
 0x4de   : > { %8676 = vmatprep.subr.bf16.mxu1 %v12145_v41  ;;  %v12178_v41 = vld [vmem:[%s16932_s7 + $0x1744] ss:$16 sps:$4 sm:$0xff]  }
 0x4df   : > { %8718 = vmatpush1.bf16.msra.mxu0 %v12140_v61  ;;  %v12173_v61 = vld [vmem:[%s16932_s7 + $0x1560] ss:$16 sps:$4 sm:$0xff]  }
 0x4e0   : > { %8719 = vmatprep.subr.bf16.mxu0 %v12148_v53  ;;  %v12181_v53 = vld [vmem:[%s16932_s7 + $0x1544] ss:$16 sps:$4 sm:$0xff]  }
 0x4e1   : > { %8677 = vmatpush1.bf16.msra.mxu1 %v12143_v26  ;;  %v12176_v26 = vld [vmem:[%s16932_s7 + $0x1740] ss:$16 sps:$4 sm:$0xff]  }
 0x4e2   : > { %8678 = vmatprep.subr.bf16.mxu1 %v12151_v13  ;;  %v3438_v13 = vpop.permute.xlu1 %3437 }
 0x4e3   : > { %8720 = vmatpush2.bf16.msra.mxu0 %v12146_v4  ;;  %v12184_v4 = vld [vmem:[%s16932_s7 + $0x1724] ss:$16 sps:$4 sm:$0xff]  }
 0x4e4   : > { %8721 = vmatprep.subr.bf16.mxu0 %v12154_v8  ;;  %v12179_v8 = vld [vmem:[%s16932_s7 + $0x1540] ss:$16 sps:$4 sm:$0xff]  }
 0x4e5   : > { %8679 = vmatpush2.bf16.msra.mxu1 %v12149_v28  ;;  %v12187_v28 = vld [vmem:[%s16932_s7 + $0x1524] ss:$16 sps:$4 sm:$0xff]  }
 0x4e6   : > { %8680 = vmatprep.subr.bf16.mxu1 %v12157_v27  ;;  %v12182_v27 = vld [vmem:[%s16932_s7 + $0x1720] ss:$16 sps:$4 sm:$0xff]  }
 0x4e7   : > { %8722 = vmatpush2.bf16.msra.mxu0 %v12152_v15  ;;  %v12190_v15 = vld [vmem:[%s16932_s7 + $0x1704] ss:$16 sps:$4 sm:$0xff]  }
 0x4e8   : > { %8723 = vmatprep.subr.bf16.mxu0 %v12160_v32  ;;  %v12185_v32 = vld [vmem:[%s16932_s7 + $0x1520] ss:$16 sps:$4 sm:$0xff]  }
 0x4e9   : > { %8681 = vmatpush2.bf16.msra.mxu1 %v12155_v43  ;;  %v3444_v43 = vpop.permute.xlu1 %3443 }
 0x4ea   : > { %8682 = vmatprep.subr.bf16.mxu1 %v12163_v63  ;;  %v12193_v63 = vld [vmem:[%s16932_s7 + $0x1504] ss:$16 sps:$4 sm:$0xff]  }
 0x4eb   : > { %8724 = vmatpush2.bf16.msra.mxu0 %v12158_v38  ;;  %v3441_v38 = vrot.slane %v14326_v45, 1  ;;  %v12191_v45 = vld [vmem:[%s16932_s7 + $0x1500] ss:$16 sps:$4 sm:$0xff]  }
 0x4ec   : > { %8725 = vmatprep.subr.bf16.mxu0 %v12166_v47  ;;  %v12188_v47 = vld [vmem:[%s16932_s7 + $0x1700] ss:$16 sps:$4 sm:$0xff]  }
 0x4ed   : > { %8683 = vmatpush2.bf16.msra.mxu1 %v12161_v17  ;;  %v12196_v17 = vld [vmem:[%s16932_s7 + $0x2ec] ss:$16 sps:$4 sm:$0xff]  }
 0x4ee   : > { %8684 = vmatprep.subr.bf16.mxu1 %v12169_v12  ;;  %v3435_v12 = vrot.slane %v14357_v48, 5  ;;  %v12194_v48 = vld [vmem:[%s16932_s7 + $0x2e8] ss:$16 sps:$4 sm:$0xff]  }
 0x4ef   : > { %8726 = vmatpush2.bf16.msra.mxu0 %v12164_v40  ;;  %v15480_v40 = vsel %vm3331_vm9, %v3441_v38, %v3444_v43 }
 0x4f0   : > { %8727 = vmatprep.subr.bf16.mxu0 %v12172_v5  ;;  %v12199_v5 = vld [vmem:[%s16932_s7 + $0x1864] ss:$16 sps:$4 sm:$0xff]  }
 0x4f1   : > { %8685 = vmatpush2.bf16.msra.mxu1 %v12167_v6  ;;  %v15489_v6 = vsel %vm3331_vm9, %v3435_v12, %v3438_v13  ;;  %v12200_v13 = vld [vmem:[%s16932_s7 + $0x2c8] ss:$16 sps:$4 sm:$0xff]  }
 0x4f2   : > { %8686 = vmatprep.subr.bf16.mxu1 %v12175_v37  ;;  %v3512_v37 = vrot.slane %v15480_v40, 6  ;;  %v12776_v40 = vld [vmem:[%s16932_s7 + $0x1528] ss:$16 sps:$4 sm:$0xff]  }
 0x4f3   : > { %8728 = vmatpush2.bf16.msra.mxu0 %v12170_v31  ;;  %v12202_v31 = vld [vmem:[%s16932_s7 + $0x2cc] ss:$16 sps:$4 sm:$0xff]  }
 0x4f4   : > { %8729 = vmatprep.subr.bf16.mxu0 %v12178_v41  ;;  %v12197_v41 = vld [vmem:[%s16932_s7 + $0x1860] ss:$16 sps:$4 sm:$0xff]  }
 0x4f5   : > { %8687 = vmatpush2.bf16.msra.mxu1 %v12173_v61  ;;  %v3510_v61 = vrot.slane %v15489_v6, 6 }
 0x4f6   : > { %8688 = vmatprep.subr.bf16.mxu1 %v12181_v53 }
 0x4f7   : > { %8730 = vmatpush2.bf16.msra.mxu0 %v12176_v26  ;;  %v12205_v26 = vld [vmem:[%s16932_s7 + $0x1844] ss:$16 sps:$4 sm:$0xff]  }
 0x4f8   : > { %8731 = vmatprep.subr.bf16.mxu0 %v12184_v4 }
 0x4f9   : > { %8689 = vmatpush2.bf16.msra.mxu1 %v12179_v8 }
 0x4fa   : > { %8690 = vmatprep.subr.bf16.mxu1 %v12187_v28  ;;  %v12208_v28 = vld [vmem:[%s16932_s7 + $0x2ac] ss:$16 sps:$4 sm:$0xff]  }
 0x4fb   : > { %8732 = vmatpush2.bf16.msra.mxu0 %v12182_v27 }
 0x4fc   : > { %8733 = vmatprep.subr.bf16.mxu0 %v12190_v15  ;;  %v12893_v15 = vmov 0  }
 0x4fd   : > { %8691 = vmatpush2.bf16.msra.mxu1 %v12185_v32 }
 0x4fe   : > { %8692 = vmatprep.subr.bf16.mxu1 %v12193_v63  ;;  %v12211_v63 = vld [vmem:[%s16932_s7 + $0x1824] ss:$16 sps:$4 sm:$0xff]  }
 0x4ff   : > { %8734 = vmatpush2.bf16.msra.mxu0 %v12188_v47 }
 0x500   : > { %8826 = vmatprep.subr.bf16.mxu0 %v12196_v17 }
 0x501   : > { %8693 = vmatpush2.bf16.msra.mxu1 %v12191_v45  ;;  %v12214_v45 = vld [vmem:[%s16932_s7 + $0x28c] ss:$16 sps:$4 sm:$0xff]  }
 0x502   : > { %v8491_v53 = vpop.f32.mrf.mxu0  ;;  %8736 = vmatmul.mubr.bf16.vlgmr.msra.gmra.mxu0 %v3512_v37  ;;  %8752 = vmatprep.subr.bf16.mxu1 %v12199_v5  ;;  %v12209_v5 = vld [vmem:[%s16932_s7 + $0x1820] ss:$16 sps:$4 sm:$0xff]  }
 0x503   : > { %8827 = vmatpush1.bf16.msra.mxu0 %v12194_v48  ;;  %8858 = vmatprep.mubr.bf16.mxu0 %v14368_v44  ;;  %v12203_v44 = vld [vmem:[%s16932_s7 + $0x1840] ss:$16 sps:$4 sm:$0xff]  }
 0x504   : > { %v8450_v4 = vpop.f32.mrf.mxu1  ;;  %v8493_v8 = vpop.f32.mrf.mxu0  ;;  %8695 = vmatmul.mubr.bf16.vlgmr.msra.gmra.mxu1 %v3510_v61  ;;  %8828 = vmatprep.subr.bf16.mxu0 %v12202_v31  ;;  %v12217_v31 = vld [vmem:[%s16932_s7 + $0x1804] ss:$16 sps:$4 sm:$0xff]  }
 0x505   : > { %v8451_v27 = vadd.f32 %v8450_v4, %v15314_v22  ;;  %8753 = vmatpush1.bf16.msra.mxu1 %v12197_v41  ;;  %8776 = vmatprep.mubr.bf16.mxu1 %v12893_v15  ;;  %v12206_v22 = vld [vmem:[%s16932_s7 + $0x2a8] ss:$16 sps:$4 sm:$0xff]  }
 0x506   : > { %v8452_v32 = vpop.f32.mrf.mxu1  ;;  %v8495_v43 = vpop.f32.mrf.mxu0  ;;  %8754 = vmatprep.subr.bf16.mxu1 %v12205_v26  ;;  %v12212_v41 = vld [vmem:[%s16932_s7 + $0x288] ss:$16 sps:$4 sm:$0xff]   ;;  %v12215_v26 = vld [vmem:[%s16932_s7 + $0x1800] ss:$16 sps:$4 sm:$0xff]  }
 0x507   : > { %v8453_v38 = vadd.f32 %v8452_v32, %v15322_v51  ;;  %8829 = vmatpush1.bf16.msra.mxu0 %v12200_v13  ;;  %v15528_v47 = vadd.f32 %v8491_v53, %v8451_v27  ;;  %v12220_v53 = vld [vmem:[%s16932_s7 + $0x26c] ss:$16 sps:$4 sm:$0xff]   ;;  %v12218_v4 = vld [vmem:[%s16932_s7 + $0x268] ss:$16 sps:$4 sm:$0xff]   ;;  %v3522_v27 = vrot.slane %v14350_v16, 1  ;;  %v12800_v16 = vld [vmem:[%s16934_s9 + $0x60] sm:$0xff]  }
 0x508   : > { %v8454_v17 = vpop.f32.mrf.mxu1  ;;  %v8496_v12 = vpop.f32.mrf.mxu0  ;;  %8830 = vmatprep.subr.bf16.mxu0 %v12208_v28  ;;  %v12223_v13 = vld [vmem:[%s16932_s7 + $0xec] ss:$16 sps:$4 sm:$0xff]   ;;  %v12221_v28 = vld [vmem:[%s16932_s7 + $0xe8] ss:$16 sps:$4 sm:$0xff]  }
 0x509   : > { %8755 = vmatpush1.bf16.msra.mxu1 %v12203_v44  ;;  %v15536_v51 = vadd.f32 %v8493_v8, %v8453_v38  ;;  %v12226_v8 = vld [vmem:[%s16932_s7 + $0x24c] ss:$16 sps:$4 sm:$0xff]   ;;  %v12224_v32 = vld [vmem:[%s16932_s7 + $0x248] ss:$16 sps:$4 sm:$0xff]  }
 0x50a   : > { %v8455_v48 = vpop.f32.mrf.mxu1  ;;  %8756 = vmatprep.subr.bf16.mxu1 %v12211_v63  ;;  %v12229_v44 = vld [vmem:[%s16932_s7 + $0xcc] ss:$16 sps:$4 sm:$0xff]   ;;  %v12227_v63 = vld [vmem:[%s16932_s7 + $0xc8] ss:$16 sps:$4 sm:$0xff]  }
 0x50b   : > { %8831 = vmatpush1.bf16.msra.mxu0 %v12206_v22  ;;  %v12232_v43 = vld [vmem:[%s16932_s7 + $0x22c] ss:$16 sps:$4 sm:$0xff]   ;;  %v12230_v22 = vld [vmem:[%s16932_s7 + $0x228] ss:$16 sps:$4 sm:$0xff]  }
 0x50c   : > { %8832 = vmatprep.subr.bf16.mxu0 %v12214_v45  ;;  %v12235_v38 = vld [vmem:[%s16932_s7 + $0xac] ss:$16 sps:$4 sm:$0xff]   ;;  %v12236_v45 = vld [vmem:[%s16932_s7 + $0x208] ss:$16 sps:$4 sm:$0xff]  }
 0x50d   : > { %8757 = vmatpush1.bf16.msra.mxu1 %v12209_v5  ;;  %v12238_v17 = vld [vmem:[%s16932_s7 + $0x20c] ss:$16 sps:$4 sm:$0xff]   ;;  %v12239_v48 = vld [vmem:[%s16932_s7 + $0x88] ss:$16 sps:$4 sm:$0xff]  }
 0x50e   : > { %8758 = vmatprep.subr.bf16.mxu1 %v12217_v31  ;;  %v12241_v12 = vld [vmem:[%s16932_s7 + $0x8c] ss:$16 sps:$4 sm:$0xff]  }
 0x50f   : > { %8833 = vmatpush1.bf16.msra.mxu0 %v12212_v41  ;;  %v12244_v5 = vld [vmem:[%s16932_s7 + $0x3ec] ss:$16 sps:$4 sm:$0xff]   ;;  %v12242_v41 = vld [vmem:[%s16932_s7 + $0x3e8] ss:$16 sps:$4 sm:$0xff]  }
 0x510   : > { %8834 = vmatprep.subr.bf16.mxu0 %v12220_v53  ;;  %v12247_v31 = vld [vmem:[%s16932_s7 + $0x6c] ss:$16 sps:$4 sm:$0xff]  }
 0x511   : > { %8759 = vmatpush1.bf16.msra.mxu1 %v12215_v26  ;;  %v12250_v53 = vld [vmem:[%s16932_s7 + $0x3cc] ss:$16 sps:$4 sm:$0xff]   ;;  %v12245_v26 = vld [vmem:[%s16932_s7 + $0x68] ss:$16 sps:$4 sm:$0xff]  }
 0x512   : > { %8785 = vmatprep.subr.bf16.mxu1 %v12223_v13  ;;  %v12253_v13 = vld [vmem:[%s16932_s7 + $0x4c] ss:$16 sps:$4 sm:$0xff]  }
 0x513   : > { %8835 = vmatpush1.bf16.msra.mxu0 %v12218_v4  ;;  %v12248_v4 = vld [vmem:[%s16932_s7 + $0x3c8] ss:$16 sps:$4 sm:$0xff]  }
 0x514   : > { %10748 = vmatmul.mubr.msk.bf16.vlgmr.msra.gmra.mxu1 %vm3331_vm9, %v3522_v27  ;;  %8836 = vmatprep.subr.bf16.mxu0 %v12226_v8  ;;  %v12256_v8 = vld [vmem:[%s16932_s7 + $0x3ac] ss:$16 sps:$4 sm:$0xff]  }
 0x515   : > { %8786 = vmatpush1.bf16.msra.mxu1 %v12221_v28  ;;  %8817 = vmatprep.mubr.bf16.mxu1 %v14374_v35  ;;  %v12233_v35 = vld [vmem:[%s16932_s7 + $0xa8] ss:$16 sps:$4 sm:$0xff]  }
 0x516   : > { %8787 = vmatprep.subr.bf16.mxu1 %v12229_v44  ;;  %v12251_v28 = vld [vmem:[%s16932_s7 + $0x48] ss:$16 sps:$4 sm:$0xff]   ;;  %v12259_v44 = vld [vmem:[%s16932_s7 + $0x2c] ss:$16 sps:$4 sm:$0xff]  }
 0x517   : > { %8837 = vmatpush1.bf16.msra.mxu0 %v12224_v32  ;;  %v12254_v32 = vld [vmem:[%s16932_s7 + $0x3a8] ss:$16 sps:$4 sm:$0xff]  }
 0x518   : > { %8838 = vmatprep.subr.bf16.mxu0 %v12232_v43  ;;  %v12262_v43 = vld [vmem:[%s16932_s7 + $0x38c] ss:$16 sps:$4 sm:$0xff]  }
 0x519   : > { %8788 = vmatpush1.bf16.msra.mxu1 %v12227_v63  ;;  %v12257_v63 = vld [vmem:[%s16932_s7 + $0x28] ss:$16 sps:$4 sm:$0xff]  }
 0x51a   : > { %8789 = vmatprep.subr.bf16.mxu1 %v12235_v38  ;;  %v12265_v38 = vld [vmem:[%s16932_s7 + $0xc] ss:$16 sps:$4 sm:$0xff]  }
 0x51b   : > { %8839 = vmatpush1.bf16.msra.mxu0 %v12230_v22  ;;  %v12260_v22 = vld [vmem:[%s16932_s7 + $0x388] ss:$16 sps:$4 sm:$0xff]  }
 0x51c   : > { %8840 = vmatprep.subr.bf16.mxu0 %v12238_v17  ;;  %v12268_v17 = vld [vmem:[%s16932_s7 + $0x36c] ss:$16 sps:$4 sm:$0xff]  }
 0x51d   : > { %8790 = vmatpush1.bf16.msra.mxu1 %v12233_v35  ;;  %v12263_v35 = vld [vmem:[%s16932_s7 + $0x8] ss:$16 sps:$4 sm:$0xff]  }
 0x51e   : > { %8791 = vmatprep.subr.bf16.mxu1 %v12241_v12  ;;  %v12271_v12 = vld [vmem:[%s16932_s7 + $0x1ec] ss:$16 sps:$4 sm:$0xff]  }
 0x51f   : > { %8841 = vmatpush1.bf16.msra.mxu0 %v12236_v45  ;;  %v12266_v45 = vld [vmem:[%s16932_s7 + $0x368] ss:$16 sps:$4 sm:$0xff]  }
 0x520   : > { %8842 = vmatprep.subr.bf16.mxu0 %v12244_v5  ;;  %v12274_v5 = vld [vmem:[%s16932_s7 + $0x34c] ss:$16 sps:$4 sm:$0xff]  }
 0x521   : > { %8792 = vmatpush1.bf16.msra.mxu1 %v12239_v48  ;;  %v12269_v48 = vld [vmem:[%s16932_s7 + $0x1e8] ss:$16 sps:$4 sm:$0xff]  }
 0x522   : > { %8793 = vmatprep.subr.bf16.mxu1 %v12247_v31  ;;  %v12277_v31 = vld [vmem:[%s16932_s7 + $0x1cc] ss:$16 sps:$4 sm:$0xff]  }
 0x523   : > { %8843 = vmatpush2.bf16.msra.mxu0 %v12242_v41  ;;  %v12272_v41 = vld [vmem:[%s16932_s7 + $0x348] ss:$16 sps:$4 sm:$0xff]  }
 0x524   : > { %8844 = vmatprep.subr.bf16.mxu0 %v12250_v53  ;;  %v12280_v53 = vld [vmem:[%s16932_s7 + $0x32c] ss:$16 sps:$4 sm:$0xff]  }
 0x525   : > { %8794 = vmatpush1.bf16.msra.mxu1 %v12245_v26  ;;  %v12275_v26 = vld [vmem:[%s16932_s7 + $0x1c8] ss:$16 sps:$4 sm:$0xff]  }
 0x526   : > { %8795 = vmatprep.subr.bf16.mxu1 %v12253_v13  ;;  %v12283_v13 = vld [vmem:[%s16932_s7 + $0x1ac] ss:$16 sps:$4 sm:$0xff]  }
 0x527   : > { %8845 = vmatpush2.bf16.msra.mxu0 %v12248_v4  ;;  %v12278_v4 = vld [vmem:[%s16932_s7 + $0x328] ss:$16 sps:$4 sm:$0xff]  }
 0x528   : > { %8846 = vmatprep.subr.bf16.mxu0 %v12256_v8  ;;  %v12286_v8 = vld [vmem:[%s16932_s7 + $0x30c] ss:$16 sps:$4 sm:$0xff]  }
 0x529   : > { %8796 = vmatpush1.bf16.msra.mxu1 %v12251_v28  ;;  %v12281_v28 = vld [vmem:[%s16932_s7 + $0x1a8] ss:$16 sps:$4 sm:$0xff]  }
 0x52a   : > { %8797 = vmatprep.subr.bf16.mxu1 %v12259_v44  ;;  %v12289_v44 = vld [vmem:[%s16932_s7 + $0x18c] ss:$16 sps:$4 sm:$0xff]  }
 0x52b   : > { %8847 = vmatpush2.bf16.msra.mxu0 %v12254_v32  ;;  %v12284_v32 = vld [vmem:[%s16932_s7 + $0x308] ss:$16 sps:$4 sm:$0xff]  }
 0x52c   : > { %8848 = vmatprep.subr.bf16.mxu0 %v12262_v43  ;;  %v12292_v43 = vld [vmem:[%s16932_s7 + $0x6ec] ss:$16 sps:$4 sm:$0xff]  }
 0x52d   : > { %8798 = vmatpush1.bf16.msra.mxu1 %v12257_v63  ;;  %v12287_v63 = vld [vmem:[%s16932_s7 + $0x188] ss:$16 sps:$4 sm:$0xff]  }
 0x52e   : > { %8799 = vmatprep.subr.bf16.mxu1 %v12265_v38  ;;  %v12295_v38 = vld [vmem:[%s16932_s7 + $0x16c] ss:$16 sps:$4 sm:$0xff]  }
 0x52f   : > { %8849 = vmatpush2.bf16.msra.mxu0 %v12260_v22  ;;  %v12290_v22 = vld [vmem:[%s16932_s7 + $0x6e8] ss:$16 sps:$4 sm:$0xff]  }
 0x530   : > { %8850 = vmatprep.subr.bf16.mxu0 %v12268_v17  ;;  %v12298_v17 = vld [vmem:[%s16932_s7 + $0x6cc] ss:$16 sps:$4 sm:$0xff]  }
 0x531   : > { %8800 = vmatpush1.bf16.msra.mxu1 %v12263_v35  ;;  %v12293_v35 = vld [vmem:[%s16932_s7 + $0x168] ss:$16 sps:$4 sm:$0xff]  }
 0x532   : > { %8801 = vmatprep.subr.bf16.mxu1 %v12271_v12 }
 0x533   : > { %8851 = vmatpush2.bf16.msra.mxu0 %v12266_v45  ;;  %v12301_v45 = vld [vmem:[%s16932_s7 + $0x14c] ss:$16 sps:$4 sm:$0xff]  }
 0x534   : > { %8852 = vmatprep.subr.bf16.mxu0 %v12274_v5  ;;  %v12296_v5 = vld [vmem:[%s16932_s7 + $0x6c8] ss:$16 sps:$4 sm:$0xff]  }
 0x535   : > { %8802 = vmatpush2.bf16.msra.mxu1 %v12269_v48 }
 0x536   : > { %8803 = vmatprep.subr.bf16.mxu1 %v12277_v31 }
 0x537   : > { %8853 = vmatpush2.bf16.msra.mxu0 %v12272_v41  ;;  %v12304_v41 = vld [vmem:[%s16932_s7 + $0x6ac] ss:$16 sps:$4 sm:$0xff]  }
 0x538   : > { %8854 = vmatprep.subr.bf16.mxu0 %v12280_v53  ;;  %v12299_v53 = vld [vmem:[%s16932_s7 + $0x148] ss:$16 sps:$4 sm:$0xff]  }
 0x539   : > { %8804 = vmatpush2.bf16.msra.mxu1 %v12275_v26 }
 0x53a   : > { %8805 = vmatprep.subr.bf16.mxu1 %v12283_v13  ;;  %v12307_v13 = vld [vmem:[%s16932_s7 + $0x12c] ss:$16 sps:$4 sm:$0xff]  }
 0x53b   : > { %8855 = vmatpush2.bf16.msra.mxu0 %v12278_v4 }
 0x53c   : > { %8856 = vmatprep.subr.bf16.mxu0 %v12286_v8  ;;  %v12302_v8 = vld [vmem:[%s16932_s7 + $0x6a8] ss:$16 sps:$4 sm:$0xff]  }
 0x53d   : > { %8806 = vmatpush2.bf16.msra.mxu1 %v12281_v28 }
 0x53e   : > { %8807 = vmatprep.subr.bf16.mxu1 %v12289_v44 }
 0x53f   : > { %8857 = vmatpush2.bf16.msra.mxu0 %v12284_v32  ;;  %v12310_v32 = vld [vmem:[%s16932_s7 + $0x68c] ss:$16 sps:$4 sm:$0xff]  }
 0x540   : > { %8908 = vmatprep.subr.bf16.mxu0 %v12292_v43  ;;  %v12305_v43 = vld [vmem:[%s16932_s7 + $0x128] ss:$16 sps:$4 sm:$0xff]  }
 0x541   : > { %8808 = vmatpush2.bf16.msra.mxu1 %v12287_v63 }
 0x542   : > { %v8573_v12 = vpop.f32.mrf.mxu0  ;;  %8859 = vmatmul.mubr.bf16.vlgmr.msra.gmra.mxu0 %v14384_v34  ;;  %8809 = vmatprep.subr.bf16.mxu1 %v12295_v38  ;;  %v12313_v38 = vld [vmem:[%s16932_s7 + $0x10c] ss:$16 sps:$4 sm:$0xff]  }
 0x543   : > { %8909 = vmatpush1.bf16.msra.mxu0 %v12290_v22  ;;  %8940 = vmatprep.mubr.bf16.mxu0 %v14431_v24  ;;  %v12308_v22 = vld [vmem:[%s16932_s7 + $0x688] ss:$16 sps:$4 sm:$0xff]  }
 0x544   : > { %v8532_v48 = vpop.f32.mrf.mxu1  ;;  %v8575_v31 = vpop.f32.mrf.mxu0  ;;  %8910 = vmatprep.subr.bf16.mxu0 %v12298_v17  ;;  %v12316_v17 = vld [vmem:[%s16932_s7 + $0x66c] ss:$16 sps:$4 sm:$0xff]  }
 0x545   : > { %v8533_v34 = vadd.f32 %v8532_v48, %v15528_v47  ;;  %8810 = vmatpush2.bf16.msra.mxu1 %v12293_v35  ;;  %v12311_v35 = vld [vmem:[%s16932_s7 + $0x108] ss:$16 sps:$4 sm:$0xff]  }
 0x546   : > { %v8534_v26 = vpop.f32.mrf.mxu1  ;;  %v8577_v24 = vpop.f32.mrf.mxu0  ;;  %8811 = vmatprep.subr.bf16.mxu1 %v12301_v45  ;;  %v12314_v45 = vld [vmem:[%s16932_s7 + $0x668] ss:$16 sps:$4 sm:$0xff]  }
 0x547   : > { %v8535_v4 = vadd.f32 %v8534_v26, %v15536_v51  ;;  %8911 = vmatpush1.bf16.msra.mxu0 %v12296_v5  ;;  %v15733_v47 = vadd.f32 %v8573_v12, %v8533_v34  ;;  %v12319_v12 = vld [vmem:[%s16932_s7 + $0x4ec] ss:$16 sps:$4 sm:$0xff]   ;;  %v12317_v48 = vld [vmem:[%s16932_s7 + $0x4e8] ss:$16 sps:$4 sm:$0xff]  }
 0x548   : > { %v8536_v28 = vpop.f32.mrf.mxu1  ;;  %v8578_v44 = vpop.f32.mrf.mxu0  ;;  %8912 = vmatprep.subr.bf16.mxu0 %v12304_v41  ;;  %v12322_v5 = vld [vmem:[%s16932_s7 + $0x64c] ss:$16 sps:$4 sm:$0xff]   ;;  %v12320_v41 = vld [vmem:[%s16932_s7 + $0x648] ss:$16 sps:$4 sm:$0xff]  }
 0x549   : > { %8812 = vmatpush2.bf16.msra.mxu1 %v12299_v53  ;;  %v15741_v51 = vadd.f32 %v8575_v31, %v8535_v4  ;;  %v12325_v31 = vld [vmem:[%s16932_s7 + $0x4cc] ss:$16 sps:$4 sm:$0xff]   ;;  %v12323_v53 = vld [vmem:[%s16932_s7 + $0x4c8] ss:$16 sps:$4 sm:$0xff]  }
 0x54a   : > { %v8537_v63 = vpop.f32.mrf.mxu1  ;;  %8813 = vmatprep.subr.bf16.mxu1 %v12307_v13  ;;  %v12328_v34 = vld [vmem:[%s16932_s7 + $0x62c] ss:$16 sps:$4 sm:$0xff]   ;;  %v12332_v4 = vld [vmem:[%s16932_s7 + $0x608] ss:$16 sps:$4 sm:$0xff]  }
 0x54b   : > { %8913 = vmatpush1.bf16.msra.mxu0 %v12302_v8  ;;  %v12331_v26 = vld [vmem:[%s16932_s7 + $0x4ac] ss:$16 sps:$4 sm:$0xff]   ;;  %v12335_v28 = vld [vmem:[%s16932_s7 + $0x488] ss:$16 sps:$4 sm:$0xff]  }
 0x54c   : > { %8914 = vmatprep.subr.bf16.mxu0 %v12310_v32  ;;  %v12334_v24 = vld [vmem:[%s16932_s7 + $0x60c] ss:$16 sps:$4 sm:$0xff]   ;;  %v12338_v32 = vld [vmem:[%s16932_s7 + $0x7e8] ss:$16 sps:$4 sm:$0xff]  }
 0x54d   : > { %8814 = vmatpush2.bf16.msra.mxu1 %v12305_v43  ;;  %v12337_v13 = vld [vmem:[%s16932_s7 + $0x48c] ss:$16 sps:$4 sm:$0xff]   ;;  %v12341_v63 = vld [vmem:[%s16932_s7 + $0x468] ss:$16 sps:$4 sm:$0xff]  }
 0x54e   : > { %8815 = vmatprep.subr.bf16.mxu1 %v12313_v38  ;;  %v12340_v8 = vld [vmem:[%s16932_s7 + $0x7ec] ss:$16 sps:$4 sm:$0xff]  }
 0x54f   : > { %8915 = vmatpush1.bf16.msra.mxu0 %v12308_v22  ;;  %v12343_v44 = vld [vmem:[%s16932_s7 + $0x46c] ss:$16 sps:$4 sm:$0xff]   ;;  %v12344_v22 = vld [vmem:[%s16932_s7 + $0x7c8] ss:$16 sps:$4 sm:$0xff]  }
 0x550   : > { %8916 = vmatprep.subr.bf16.mxu0 %v12316_v17  ;;  %v12346_v43 = vld [vmem:[%s16932_s7 + $0x7cc] ss:$16 sps:$4 sm:$0xff]  }
 0x551   : > { %8816 = vmatpush2.bf16.msra.mxu1 %v12311_v35  ;;  %v12349_v38 = vld [vmem:[%s16932_s7 + $0x44c] ss:$16 sps:$4 sm:$0xff]   ;;  %v12347_v35 = vld [vmem:[%s16932_s7 + $0x448] ss:$16 sps:$4 sm:$0xff]  }
 0x552   : > { %8867 = vmatprep.subr.bf16.mxu1 %v12319_v12  ;;  %v12352_v17 = vld [vmem:[%s16932_s7 + $0x7ac] ss:$16 sps:$4 sm:$0xff]  }
 0x553   : > { %8917 = vmatpush1.bf16.msra.mxu0 %v12314_v45  ;;  %v12355_v12 = vld [vmem:[%s16932_s7 + $0x42c] ss:$16 sps:$4 sm:$0xff]   ;;  %v12350_v45 = vld [vmem:[%s16932_s7 + $0x7a8] ss:$16 sps:$4 sm:$0xff]  }
 0x554   : > { %8818 = vmatmul.mubr.bf16.vlgmr.msra.gmra.mxu1 %v14395_v9  ;;  %8918 = vmatprep.subr.bf16.mxu0 %v12322_v5  ;;  %v12326_v9 = vld [vmem:[%s16932_s7 + $0x628] ss:$16 sps:$4 sm:$0xff]   ;;  %v12358_v5 = vld [vmem:[%s16932_s7 + $0x78c] ss:$16 sps:$4 sm:$0xff]  }
 0x555   : > { %8868 = vmatpush1.bf16.msra.mxu1 %v12317_v48  ;;  %8899 = vmatprep.mubr.bf16.mxu1 %v14412_v50  ;;  %v12329_v50 = vld [vmem:[%s16932_s7 + $0x4a8] ss:$16 sps:$4 sm:$0xff]  }
 0x556   : > { %8869 = vmatprep.subr.bf16.mxu1 %v12325_v31  ;;  %v12353_v48 = vld [vmem:[%s16932_s7 + $0x428] ss:$16 sps:$4 sm:$0xff]   ;;  %v12361_v31 = vld [vmem:[%s16932_s7 + $0x40c] ss:$16 sps:$4 sm:$0xff]  }
 0x557   : > { %8919 = vmatpush1.bf16.msra.mxu0 %v12320_v41  ;;  %v12356_v41 = vld [vmem:[%s16932_s7 + $0x788] ss:$16 sps:$4 sm:$0xff]  }
 0x558   : > { %8920 = vmatprep.subr.bf16.mxu0 %v12328_v34  ;;  %v12364_v34 = vld [vmem:[%s16932_s7 + $0x76c] ss:$16 sps:$4 sm:$0xff]  }
 0x559   : > { %8870 = vmatpush1.bf16.msra.mxu1 %v12323_v53  ;;  %v12359_v53 = vld [vmem:[%s16932_s7 + $0x408] ss:$16 sps:$4 sm:$0xff]  }
 0x55a   : > { %8871 = vmatprep.subr.bf16.mxu1 %v12331_v26  ;;  %v12367_v26 = vld [vmem:[%s16932_s7 + $0x5ec] ss:$16 sps:$4 sm:$0xff]  }
 0x55b   : > { %8921 = vmatpush1.bf16.msra.mxu0 %v12326_v9  ;;  %v12362_v9 = vld [vmem:[%s16932_s7 + $0x768] ss:$16 sps:$4 sm:$0xff]  }
 0x55c   : > { %8922 = vmatprep.subr.bf16.mxu0 %v12334_v24  ;;  %v12370_v24 = vld [vmem:[%s16932_s7 + $0x74c] ss:$16 sps:$4 sm:$0xff]  }
 0x55d   : > { %8872 = vmatpush1.bf16.msra.mxu1 %v12329_v50  ;;  %v12365_v50 = vld [vmem:[%s16932_s7 + $0x5e8] ss:$16 sps:$4 sm:$0xff]  }
 0x55e   : > { %8873 = vmatprep.subr.bf16.mxu1 %v12337_v13  ;;  %v12373_v13 = vld [vmem:[%s16932_s7 + $0x5cc] ss:$16 sps:$4 sm:$0xff]  }
 0x55f   : > { %8923 = vmatpush1.bf16.msra.mxu0 %v12332_v4  ;;  %v12368_v4 = vld [vmem:[%s16932_s7 + $0x748] ss:$16 sps:$4 sm:$0xff]  }
 0x560   : > { %8924 = vmatprep.subr.bf16.mxu0 %v12340_v8  ;;  %v12376_v8 = vld [vmem:[%s16932_s7 + $0x72c] ss:$16 sps:$4 sm:$0xff]  }
 0x561   : > { %8874 = vmatpush1.bf16.msra.mxu1 %v12335_v28  ;;  %v12371_v28 = vld [vmem:[%s16932_s7 + $0x5c8] ss:$16 sps:$4 sm:$0xff]  }
 0x562   : > { %8875 = vmatprep.subr.bf16.mxu1 %v12343_v44  ;;  %v12379_v44 = vld [vmem:[%s16932_s7 + $0x5ac] ss:$16 sps:$4 sm:$0xff]  }
 0x563   : > { %8925 = vmatpush2.bf16.msra.mxu0 %v12338_v32  ;;  %v12374_v32 = vld [vmem:[%s16932_s7 + $0x728] ss:$16 sps:$4 sm:$0xff]  }
 0x564   : > { %8926 = vmatprep.subr.bf16.mxu0 %v12346_v43  ;;  %v12382_v43 = vld [vmem:[%s16932_s7 + $0x70c] ss:$16 sps:$4 sm:$0xff]  }
 0x565   : > { %8876 = vmatpush1.bf16.msra.mxu1 %v12341_v63  ;;  %v12377_v63 = vld [vmem:[%s16932_s7 + $0x5a8] ss:$16 sps:$4 sm:$0xff]  }
 0x566   : > { %8877 = vmatprep.subr.bf16.mxu1 %v12349_v38  ;;  %v12385_v38 = vld [vmem:[%s16932_s7 + $0x58c] ss:$16 sps:$4 sm:$0xff]  }
 0x567   : > { %8927 = vmatpush2.bf16.msra.mxu0 %v12344_v22  ;;  %v12380_v22 = vld [vmem:[%s16932_s7 + $0x708] ss:$16 sps:$4 sm:$0xff]  }
 0x568   : > { %8928 = vmatprep.subr.bf16.mxu0 %v12352_v17  ;;  %v12388_v17 = vld [vmem:[%s16932_s7 + $0xaec] ss:$16 sps:$4 sm:$0xff]  }
 0x569   : > { %8878 = vmatpush1.bf16.msra.mxu1 %v12347_v35  ;;  %v12383_v35 = vld [vmem:[%s16932_s7 + $0x588] ss:$16 sps:$4 sm:$0xff]  }
 0x56a   : > { %8879 = vmatprep.subr.bf16.mxu1 %v12355_v12  ;;  %v12391_v12 = vld [vmem:[%s16932_s7 + $0x56c] ss:$16 sps:$4 sm:$0xff]  }
 0x56b   : > { %8929 = vmatpush2.bf16.msra.mxu0 %v12350_v45  ;;  %v12386_v45 = vld [vmem:[%s16932_s7 + $0xae8] ss:$16 sps:$4 sm:$0xff]  }
 0x56c   : > { %8930 = vmatprep.subr.bf16.mxu0 %v12358_v5  ;;  %v12394_v5 = vld [vmem:[%s16932_s7 + $0xacc] ss:$16 sps:$4 sm:$0xff]  }
 0x56d   : > { %8880 = vmatpush1.bf16.msra.mxu1 %v12353_v48  ;;  %v12389_v48 = vld [vmem:[%s16932_s7 + $0x568] ss:$16 sps:$4 sm:$0xff]  }
 0x56e   : > { %8881 = vmatprep.subr.bf16.mxu1 %v12361_v31 }
 0x56f   : > { %8931 = vmatpush2.bf16.msra.mxu0 %v12356_v41  ;;  %v12397_v41 = vld [vmem:[%s16932_s7 + $0x54c] ss:$16 sps:$4 sm:$0xff]  }
 0x570   : > { %8932 = vmatprep.subr.bf16.mxu0 %v12364_v34  ;;  %v12392_v34 = vld [vmem:[%s16932_s7 + $0xac8] ss:$16 sps:$4 sm:$0xff]  }
 0x571   : > { %8882 = vmatpush1.bf16.msra.mxu1 %v12359_v53 }
 0x572   : > { %8883 = vmatprep.subr.bf16.mxu1 %v12367_v26 }
 0x573   : > { %8933 = vmatpush2.bf16.msra.mxu0 %v12362_v9 }
 0x574   : > { %8934 = vmatprep.subr.bf16.mxu0 %v12370_v24  ;;  %v12395_v24 = vld [vmem:[%s16932_s7 + $0x548] ss:$16 sps:$4 sm:$0xff]  }
 0x575   : > { %8884 = vmatpush2.bf16.msra.mxu1 %v12365_v50  ;;  %v12403_v50 = vld [vmem:[%s16932_s7 + $0x52c] ss:$16 sps:$4 sm:$0xff]  }
 0x576   : > { %8885 = vmatprep.subr.bf16.mxu1 %v12373_v13 }
 0x577   : > { %8935 = vmatpush2.bf16.msra.mxu0 %v12368_v4  ;;  %v12398_v4 = vld [vmem:[%s16932_s7 + $0xaa8] ss:$16 sps:$4 sm:$0xff]  }
 0x578   : > { %8936 = vmatprep.subr.bf16.mxu0 %v12376_v8 }
 0x579   : > { %8886 = vmatpush2.bf16.msra.mxu1 %v12371_v28 }
 0x57a   : > { %8887 = vmatprep.subr.bf16.mxu1 %v12379_v44  ;;  %v12406_v44 = vld [vmem:[%s16932_s7 + $0xa8c] ss:$16 sps:$4 sm:$0xff]  }
 0x57b   : > { %8937 = vmatpush2.bf16.msra.mxu0 %v12374_v32  ;;  %v12401_v32 = vld [vmem:[%s16932_s7 + $0x528] ss:$16 sps:$4 sm:$0xff]  }
 0x57c   : > { %8938 = vmatprep.subr.bf16.mxu0 %v12382_v43 }
 0x57d   : > { %8888 = vmatpush2.bf16.msra.mxu1 %v12377_v63  ;;  %v12409_v63 = vld [vmem:[%s16932_s7 + $0x50c] ss:$16 sps:$4 sm:$0xff]  }
 0x57e   : > { %8889 = vmatprep.subr.bf16.mxu1 %v12385_v38  ;;  %v12404_v38 = vld [vmem:[%s16932_s7 + $0xa88] ss:$16 sps:$4 sm:$0xff]  }
 0x57f   : > { %8939 = vmatpush2.bf16.msra.mxu0 %v12380_v22  ;;  %v12412_v22 = vld [vmem:[%s16932_s7 + $0xa6c] ss:$16 sps:$4 sm:$0xff]  }
 0x580   : > { %8990 = vmatprep.subr.bf16.mxu0 %v12388_v17  ;;  %v12407_v17 = vld [vmem:[%s16932_s7 + $0x508] ss:$16 sps:$4 sm:$0xff]  }
 0x581   : > { %8890 = vmatpush2.bf16.msra.mxu1 %v12383_v35  ;;  %v12415_v35 = vld [vmem:[%s16932_s7 + $0x8ec] ss:$16 sps:$4 sm:$0xff]  }
 0x582   : > { %v8655_v31 = vpop.f32.mrf.mxu0  ;;  %8941 = vmatmul.mubr.bf16.vlgmr.msra.gmra.mxu0 %v14607_v39  ;;  %8891 = vmatprep.subr.bf16.mxu1 %v12391_v12  ;;  %v12400_v39 = vld [vmem:[%s16932_s7 + $0xaac] ss:$16 sps:$4 sm:$0xff]   ;;  %v12410_v12 = vld [vmem:[%s16932_s7 + $0xa68] ss:$16 sps:$4 sm:$0xff]  }
 0x583   : > { %8991 = vmatpush1.bf16.msra.mxu0 %v12386_v45  ;;  %9022 = vmatprep.mubr.bf16.mxu0 %v3485_v20  ;;  %v12418_v45 = vld [vmem:[%s16932_s7 + $0xa4c] ss:$16 sps:$4 sm:$0xff]  }
 0x584   : > { %v8614_v53 = vpop.f32.mrf.mxu1  ;;  %v8657_v26 = vpop.f32.mrf.mxu0  ;;  %8992 = vmatprep.subr.bf16.mxu0 %v12394_v5  ;;  %v12413_v5 = vld [vmem:[%s16932_s7 + $0x8e8] ss:$16 sps:$4 sm:$0xff]  }
 0x585   : > { %v8615_v9 = vadd.f32 %v8614_v53, %v15733_v47  ;;  %8892 = vmatpush2.bf16.msra.mxu1 %v12389_v48  ;;  %v12421_v48 = vld [vmem:[%s16932_s7 + $0x8cc] ss:$16 sps:$4 sm:$0xff]  }
 0x586   : > { %v8616_v19 = vpop.f32.mrf.mxu1  ;;  %v8659_v20 = vpop.f32.mrf.mxu0  ;;  %8893 = vmatprep.subr.bf16.mxu1 %v12397_v41  ;;  %v12424_v41 = vld [vmem:[%s16932_s7 + $0xa2c] ss:$16 sps:$4 sm:$0xff]  }
 0x587   : > { %v8617_v13 = vadd.f32 %v8616_v19, %v15741_v51  ;;  %8993 = vmatpush1.bf16.msra.mxu0 %v12392_v34  ;;  %v15936_v47 = vadd.f32 %v8655_v31, %v8615_v9  ;;  %v12416_v31 = vld [vmem:[%s16932_s7 + $0xa48] ss:$16 sps:$4 sm:$0xff]   ;;  %v12427_v53 = vld [vmem:[%s16932_s7 + $0x8ac] ss:$16 sps:$4 sm:$0xff]  }
 0x588   : > { %v8618_v8 = vpop.f32.mrf.mxu1  ;;  %v8660_v28 = vpop.f32.mrf.mxu0  ;;  %8994 = vmatprep.subr.bf16.mxu0 %v12400_v39  ;;  %v12419_v34 = vld [vmem:[%s16932_s7 + $0x8c8] ss:$16 sps:$4 sm:$0xff]   ;;  %v12436_v9 = vld [vmem:[%s16932_s7 + $0xbec] ss:$16 sps:$4 sm:$0xff]  }
 0x589   : > { %8894 = vmatpush2.bf16.msra.mxu1 %v12395_v24  ;;  %v15944_v51 = vadd.f32 %v8657_v26, %v8617_v13  ;;  %v12433_v26 = vld [vmem:[%s16932_s7 + $0x88c] ss:$16 sps:$4 sm:$0xff]   ;;  %v12428_v39 = vld [vmem:[%s16932_s7 + $0xa08] ss:$16 sps:$4 sm:$0xff]  }
 0x58a   : > { %v8619_v43 = vpop.f32.mrf.mxu1  ;;  %8895 = vmatprep.subr.bf16.mxu1 %v12403_v50  ;;  %v12431_v24 = vld [vmem:[%s16932_s7 + $0x888] ss:$16 sps:$4 sm:$0xff]   ;;  %v12439_v19 = vld [vmem:[%s16932_s7 + $0x86c] ss:$16 sps:$4 sm:$0xff]  }
 0x58b   : > { %8995 = vmatpush1.bf16.msra.mxu0 %v12398_v4  ;;  %v12434_v20 = vld [vmem:[%s16932_s7 + $0xbe8] ss:$16 sps:$4 sm:$0xff]   ;;  %v12442_v50 = vld [vmem:[%s16932_s7 + $0xbcc] ss:$16 sps:$4 sm:$0xff]  }
 0x58c   : > { %8996 = vmatprep.subr.bf16.mxu0 %v12406_v44  ;;  %v12437_v13 = vld [vmem:[%s16932_s7 + $0x868] ss:$16 sps:$4 sm:$0xff]   ;;  %v12445_v4 = vld [vmem:[%s16932_s7 + $0x84c] ss:$16 sps:$4 sm:$0xff]  }
 0x58d   : > { %8896 = vmatpush2.bf16.msra.mxu1 %v12401_v32  ;;  %v12440_v8 = vld [vmem:[%s16932_s7 + $0xbc8] ss:$16 sps:$4 sm:$0xff]   ;;  %v12448_v28 = vld [vmem:[%s16932_s7 + $0xbac] ss:$16 sps:$4 sm:$0xff]  }
 0x58e   : > { %8897 = vmatprep.subr.bf16.mxu1 %v12409_v63  ;;  %v12443_v44 = vld [vmem:[%s16932_s7 + $0x848] ss:$16 sps:$4 sm:$0xff]   ;;  %v12451_v32 = vld [vmem:[%s16932_s7 + $0x82c] ss:$16 sps:$4 sm:$0xff]  }
 0x58f   : > { %8997 = vmatpush1.bf16.msra.mxu0 %v12404_v38  ;;  %v12446_v43 = vld [vmem:[%s16932_s7 + $0xba8] ss:$16 sps:$4 sm:$0xff]   ;;  %v12454_v63 = vld [vmem:[%s16932_s7 + $0xb8c] ss:$16 sps:$4 sm:$0xff]  }
 0x590   : > { %8998 = vmatprep.subr.bf16.mxu0 %v12412_v22  ;;  %v12449_v38 = vld [vmem:[%s16932_s7 + $0x828] ss:$16 sps:$4 sm:$0xff]   ;;  %v12457_v22 = vld [vmem:[%s16932_s7 + $0x80c] ss:$16 sps:$4 sm:$0xff]  }
 0x591   : > { %8898 = vmatpush2.bf16.msra.mxu1 %v12407_v17  ;;  %v12452_v17 = vld [vmem:[%s16932_s7 + $0xb88] ss:$16 sps:$4 sm:$0xff]  }
 0x592   : > { %8949 = vmatprep.subr.bf16.mxu1 %v12415_v35  ;;  %v12460_v35 = vld [vmem:[%s16932_s7 + $0xb6c] ss:$16 sps:$4 sm:$0xff]  }
 0x593   : > { %8999 = vmatpush1.bf16.msra.mxu0 %v12410_v12  ;;  %v12455_v12 = vld [vmem:[%s16932_s7 + $0x808] ss:$16 sps:$4 sm:$0xff]  }
 0x594   : > { %8900 = vmatmul.mubr.bf16.vlgmr.msra.gmra.mxu1 %v14618_v49  ;;  %9000 = vmatprep.subr.bf16.mxu0 %v12418_v45  ;;  %v12422_v49 = vld [vmem:[%s16932_s7 + $0xa28] ss:$16 sps:$4 sm:$0xff]   ;;  %v12463_v45 = vld [vmem:[%s16932_s7 + $0x9ec] ss:$16 sps:$4 sm:$0xff]  }
 0x595   : > { %8950 = vmatpush1.bf16.msra.mxu1 %v12413_v5  ;;  %8981 = vmatprep.mubr.bf16.mxu1 %v3483_v3  ;;  %v12425_v3 = vld [vmem:[%s16932_s7 + $0x8a8] ss:$16 sps:$4 sm:$0xff]  }
 0x596   : > { %8951 = vmatprep.subr.bf16.mxu1 %v12421_v48  ;;  %v12458_v5 = vld [vmem:[%s16932_s7 + $0xb68] ss:$16 sps:$4 sm:$0xff]   ;;  %v12466_v48 = vld [vmem:[%s16932_s7 + $0xb4c] ss:$16 sps:$4 sm:$0xff]  }
 0x597   : > { %9001 = vmatpush1.bf16.msra.mxu0 %v12416_v31  ;;  %v12461_v31 = vld [vmem:[%s16932_s7 + $0x9e8] ss:$16 sps:$4 sm:$0xff]  }
 0x598   : > { %9002 = vmatprep.subr.bf16.mxu0 %v12424_v41  ;;  %v12469_v41 = vld [vmem:[%s16932_s7 + $0x9cc] ss:$16 sps:$4 sm:$0xff]  }
 0x599   : > { %8952 = vmatpush1.bf16.msra.mxu1 %v12419_v34  ;;  %v12464_v34 = vld [vmem:[%s16932_s7 + $0xb48] ss:$16 sps:$4 sm:$0xff]  }
 0x59a   : > { %8953 = vmatprep.subr.bf16.mxu1 %v12427_v53  ;;  %v12472_v53 = vld [vmem:[%s16932_s7 + $0xb2c] ss:$16 sps:$4 sm:$0xff]  }
 0x59b   : > { %9003 = vmatpush1.bf16.msra.mxu0 %v12422_v49  ;;  %v12467_v49 = vld [vmem:[%s16932_s7 + $0x9c8] ss:$16 sps:$4 sm:$0xff]  }
 0x59c   : > { %9004 = vmatprep.subr.bf16.mxu0 %v12430_v30  ;;  %v12475_v30 = vld [vmem:[%s16932_s7 + $0x9ac] ss:$16 sps:$4 sm:$0xff]  }
 0x59d   : > { %8954 = vmatpush1.bf16.msra.mxu1 %v12425_v3  ;;  %v12470_v3 = vld [vmem:[%s16932_s7 + $0xb28] ss:$16 sps:$4 sm:$0xff]  }
 0x59e   : > { %8955 = vmatprep.subr.bf16.mxu1 %v12433_v26  ;;  %v12478_v26 = vld [vmem:[%s16932_s7 + $0xb0c] ss:$16 sps:$4 sm:$0xff]  }
 0x59f   : > { %9005 = vmatpush1.bf16.msra.mxu0 %v12428_v39  ;;  %v12473_v39 = vld [vmem:[%s16932_s7 + $0x9a8] ss:$16 sps:$4 sm:$0xff]  }
 0x5a0   : > { %9006 = vmatprep.subr.bf16.mxu0 %v12436_v9  ;;  %v12481_v9 = vld [vmem:[%s16932_s7 + $0x98c] ss:$16 sps:$4 sm:$0xff]  }
 0x5a1   : > { %8956 = vmatpush1.bf16.msra.mxu1 %v12431_v24  ;;  %v12476_v24 = vld [vmem:[%s16932_s7 + $0xb08] ss:$16 sps:$4 sm:$0xff]  }
 0x5a2   : > { %8957 = vmatprep.subr.bf16.mxu1 %v12439_v19  ;;  %v12484_v19 = vld [vmem:[%s16932_s7 + $0xeec] ss:$16 sps:$4 sm:$0xff]  }
 0x5a3   : > { %9007 = vmatpush2.bf16.msra.mxu0 %v12434_v20  ;;  %v12479_v20 = vld [vmem:[%s16932_s7 + $0x988] ss:$16 sps:$4 sm:$0xff]  }
 0x5a4   : > { %9008 = vmatprep.subr.bf16.mxu0 %v12442_v50  ;;  %v12487_v50 = vld [vmem:[%s16932_s7 + $0x96c] ss:$16 sps:$4 sm:$0xff]  }
 0x5a5   : > { %8958 = vmatpush1.bf16.msra.mxu1 %v12437_v13  ;;  %v12482_v13 = vld [vmem:[%s16932_s7 + $0xee8] ss:$16 sps:$4 sm:$0xff]  }
 0x5a6   : > { %8959 = vmatprep.subr.bf16.mxu1 %v12445_v4  ;;  %v12490_v4 = vld [vmem:[%s16932_s7 + $0xecc] ss:$16 sps:$4 sm:$0xff]  }
 0x5a7   : > { %9009 = vmatpush2.bf16.msra.mxu0 %v12440_v8  ;;  %v12485_v8 = vld [vmem:[%s16932_s7 + $0x968] ss:$16 sps:$4 sm:$0xff]  }
 0x5a8   : > { %9010 = vmatprep.subr.bf16.mxu0 %v12448_v28 }
 0x5a9   : > { %8960 = vmatpush1.bf16.msra.mxu1 %v12443_v44  ;;  %v12493_v44 = vld [vmem:[%s16932_s7 + $0x94c] ss:$16 sps:$4 sm:$0xff]  }
 0x5aa   : > { %8961 = vmatprep.subr.bf16.mxu1 %v12451_v32  ;;  %v12488_v32 = vld [vmem:[%s16932_s7 + $0xec8] ss:$16 sps:$4 sm:$0xff]  }
 0x5ab   : > { %9011 = vmatpush2.bf16.msra.mxu0 %v12446_v43 }
 0x5ac   : > { %9012 = vmatprep.subr.bf16.mxu0 %v12454_v63 }
 0x5ad   : > { %8962 = vmatpush1.bf16.msra.mxu1 %v12449_v38  ;;  %v12491_v38 = vld [vmem:[%s16932_s7 + $0x948] ss:$16 sps:$4 sm:$0xff]  }
 0x5ae   : > { %8963 = vmatprep.subr.bf16.mxu1 %v12457_v22  ;;  %v12499_v22 = vld [vmem:[%s16932_s7 + $0x92c] ss:$16 sps:$4 sm:$0xff]  }
 0x5af   : > { %9013 = vmatpush2.bf16.msra.mxu0 %v12452_v17 }
 0x5b0   : > { %9014 = vmatprep.subr.bf16.mxu0 %v12460_v35  ;;  %v12494_v35 = vld [vmem:[%s16932_s7 + $0xea8] ss:$16 sps:$4 sm:$0xff]  }
 0x5b1   : > { %8964 = vmatpush1.bf16.msra.mxu1 %v12455_v12 }
 0x5b2   : > { %8965 = vmatprep.subr.bf16.mxu1 %v12463_v45 }
 0x5b3   : > { %9015 = vmatpush2.bf16.msra.mxu0 %v12458_v5  ;;  %v12502_v5 = vld [vmem:[%s16932_s7 + $0xe8c] ss:$16 sps:$4 sm:$0xff]  }
 0x5b4   : > { %9016 = vmatprep.subr.bf16.mxu0 %v12466_v48  ;;  %v12497_v48 = vld [vmem:[%s16932_s7 + $0x928] ss:$16 sps:$4 sm:$0xff]  }
 0x5b5   : > { %8966 = vmatpush2.bf16.msra.mxu1 %v12461_v31 }
 0x5b6   : > { %8967 = vmatprep.subr.bf16.mxu1 %v12469_v41  ;;  %v12505_v41 = vld [vmem:[%s16932_s7 + $0x90c] ss:$16 sps:$4 sm:$0xff]  }
 0x5b7   : > { %9017 = vmatpush2.bf16.msra.mxu0 %v12464_v34  ;;  %v12500_v34 = vld [vmem:[%s16932_s7 + $0xe88] ss:$16 sps:$4 sm:$0xff]  }
 0x5b8   : > { %9018 = vmatprep.subr.bf16.mxu0 %v12472_v53  ;;  %v12508_v53 = vld [vmem:[%s16932_s7 + $0xe6c] ss:$16 sps:$4 sm:$0xff]  }
 0x5b9   : > { %8968 = vmatpush2.bf16.msra.mxu1 %v12467_v49  ;;  %v12503_v49 = vld [vmem:[%s16932_s7 + $0x908] ss:$16 sps:$4 sm:$0xff]  }
 0x5ba   : > { %8969 = vmatprep.subr.bf16.mxu1 %v12475_v30  ;;  %v12511_v30 = vld [vmem:[%s16932_s7 + $0xcec] ss:$16 sps:$4 sm:$0xff]  }
 0x5bb   : > { %9019 = vmatpush2.bf16.msra.mxu0 %v12470_v3  ;;  %v12506_v3 = vld [vmem:[%s16932_s7 + $0xe68] ss:$16 sps:$4 sm:$0xff]  }
 0x5bc   : > { %9020 = vmatprep.subr.bf16.mxu0 %v12478_v26  ;;  %v12514_v26 = vld [vmem:[%s16932_s7 + $0xe4c] ss:$16 sps:$4 sm:$0xff]  }
 0x5bd   : > { %8970 = vmatpush2.bf16.msra.mxu1 %v12473_v39  ;;  %v12509_v39 = vld [vmem:[%s16932_s7 + $0xce8] ss:$16 sps:$4 sm:$0xff]  }
 0x5be   : > { %8971 = vmatprep.subr.bf16.mxu1 %v12481_v9  ;;  %v12517_v9 = vld [vmem:[%s16932_s7 + $0xccc] ss:$16 sps:$4 sm:$0xff]  }
 0x5bf   : > { %9021 = vmatpush2.bf16.msra.mxu0 %v12476_v24  ;;  %v12512_v24 = vld [vmem:[%s16932_s7 + $0xe48] ss:$16 sps:$4 sm:$0xff]  }
 0x5c0   : > { %9072 = vmatprep.subr.bf16.mxu0 %v12484_v19 }
 0x5c1   : > { %8972 = vmatpush2.bf16.msra.mxu1 %v12479_v20  ;;  %v12520_v20 = vld [vmem:[%s16932_s7 + $0xe2c] ss:$16 sps:$4 sm:$0xff]  }
 0x5c2   : > { %v8737_v28 = vpop.f32.mrf.mxu0  ;;  %9023 = vmatmul.mubr.bf16.vlgmr.msra.gmra.mxu0 %v3484_v52  ;;  %8973 = vmatprep.subr.bf16.mxu1 %v12487_v50 }
 0x5c3   : > { %9073 = vmatpush1.bf16.msra.mxu0 %v12482_v13  ;;  %9104 = vmatprep.mubr.bf16.mxu0 %v3489_v46  ;;  %v12515_v13 = vld [vmem:[%s16932_s7 + $0xcc8] ss:$16 sps:$4 sm:$0xff]  }
 0x5c4   : > { %v8696_v43 = vpop.f32.mrf.mxu1  ;;  %v8739_v63 = vpop.f32.mrf.mxu0  ;;  %9074 = vmatprep.subr.bf16.mxu0 %v12490_v4 }
 0x5c5   : > { %v8697_v52 = vadd.f32 %v8696_v43, %v15936_v47  ;;  %8974 = vmatpush2.bf16.msra.mxu1 %v12485_v8  ;;  %v12518_v8 = vld [vmem:[%s16932_s7 + $0xe28] ss:$16 sps:$4 sm:$0xff]  }
 0x5c6   : > { %v8698_v2 = vpop.f32.mrf.mxu1  ;;  %v8741_v46 = vpop.f32.mrf.mxu0  ;;  %8975 = vmatprep.subr.bf16.mxu1 %v12493_v44  ;;  %v12524_v43 = vld [vmem:[%s16932_s7 + $0xe08] ss:$16 sps:$4 sm:$0xff]  }
 0x5c7   : > { %v8699_v17 = vadd.f32 %v8698_v2, %v15944_v51  ;;  %9075 = vmatpush1.bf16.msra.mxu0 %v12488_v32  ;;  %v8738_v47 = vadd.f32 %v8737_v28, %v8697_v52  ;;  %v12529_v32 = vld [vmem:[%s16932_s7 + $0xc8c] ss:$16 sps:$4 sm:$0xff]   ;;  %v12533_v46 = vld [vmem:[%s16932_s7 + $0xc68] ss:$16 sps:$4 sm:$0xff]  }
 0x5c8   : > { %v8700_v12 = vpop.f32.mrf.mxu1  ;;  %v8742_v45 = vpop.f32.mrf.mxu0  ;;  %9076 = vmatprep.subr.bf16.mxu0 %v12496_v57  ;;  %v12527_v57 = vld [vmem:[%s16932_s7 + $0xc88] ss:$16 sps:$4 sm:$0xff]   ;;  %v12535_v52 = vld [vmem:[%s16932_s7 + $0xc6c] ss:$16 sps:$4 sm:$0xff]  }
 0x5c9   : > { %8976 = vmatpush2.bf16.msra.mxu1 %v12491_v38  ;;  %v8740_v31 = vadd.f32 %v8739_v63, %v8699_v17  ;;  %v12532_v63 = vld [vmem:[%s16932_s7 + $0xfec] ss:$16 sps:$4 sm:$0xff]   ;;  %v12530_v38 = vld [vmem:[%s16932_s7 + $0xfe8] ss:$16 sps:$4 sm:$0xff]  }
 0x5ca   : > { %v8701_v51 = vpop.f32.mrf.mxu1  ;;  %8977 = vmatprep.subr.bf16.mxu1 %v12499_v22  ;;  %v12538_v2 = vld [vmem:[%s16932_s7 + $0xfcc] ss:$16 sps:$4 sm:$0xff]   ;;  %v12536_v17 = vld [vmem:[%s16932_s7 + $0xfc8] ss:$16 sps:$4 sm:$0xff]  }
 0x5cb   : > { %9077 = vmatpush1.bf16.msra.mxu0 %v12494_v35  ;;  %v12541_v22 = vld [vmem:[%s16932_s7 + $0xc4c] ss:$16 sps:$4 sm:$0xff]   ;;  %v12542_v45 = vld [vmem:[%s16932_s7 + $0xfa8] ss:$16 sps:$4 sm:$0xff]  }
 0x5cc   : > { %9078 = vmatprep.subr.bf16.mxu0 %v12502_v5  ;;  %v12544_v35 = vld [vmem:[%s16932_s7 + $0xfac] ss:$16 sps:$4 sm:$0xff]   ;;  %v12548_v51 = vld [vmem:[%s16932_s7 + $0xf88] ss:$16 sps:$4 sm:$0xff]  }
 0x5cd   : > { %8978 = vmatpush2.bf16.msra.mxu1 %v12497_v48  ;;  %v12547_v12 = vld [vmem:[%s16932_s7 + $0xc2c] ss:$16 sps:$4 sm:$0xff]   ;;  %v12545_v48 = vld [vmem:[%s16932_s7 + $0xc28] ss:$16 sps:$4 sm:$0xff]  }
 0x5ce   : > { %8979 = vmatprep.subr.bf16.mxu1 %v12505_v41  ;;  %v12550_v5 = vld [vmem:[%s16932_s7 + $0xf8c] ss:$16 sps:$4 sm:$0xff]  }
 0x5cf   : > { %9079 = vmatpush1.bf16.msra.mxu0 %v12500_v34  ;;  %v12556_v41 = vld [vmem:[%s16932_s7 + $0xf6c] ss:$16 sps:$4 sm:$0xff]   ;;  %v12551_v34 = vld [vmem:[%s16932_s7 + $0xc08] ss:$16 sps:$4 sm:$0xff]  }
 0x5d0   : > { %9080 = vmatprep.subr.bf16.mxu0 %v12508_v53  ;;  %v12559_v53 = vld [vmem:[%s16932_s7 + $0xdec] ss:$16 sps:$4 sm:$0xff]  }
 0x5d1   : > { %8980 = vmatpush2.bf16.msra.mxu1 %v12503_v49  ;;  %v12554_v49 = vld [vmem:[%s16932_s7 + $0xf68] ss:$16 sps:$4 sm:$0xff]  }
 0x5d2   : > { %9031 = vmatprep.subr.bf16.mxu1 %v12511_v30  ;;  %v12562_v30 = vld [vmem:[%s16932_s7 + $0xf4c] ss:$16 sps:$4 sm:$0xff]  }
 0x5d3   : > { %9081 = vmatpush1.bf16.msra.mxu0 %v12506_v3  ;;  %v12557_v3 = vld [vmem:[%s16932_s7 + $0xde8] ss:$16 sps:$4 sm:$0xff]  }
 0x5d4   : > { %v8778_v19 = vpop.f32.mrf.mxu1  ;;  %8982 = vmatmul.mubr.bf16.vlgmr.msra.gmra.mxu1 %v3482_v14  ;;  %9082 = vmatprep.subr.bf16.mxu0 %v12514_v26  ;;  %v12565_v26 = vld [vmem:[%s16932_s7 + $0xdcc] ss:$16 sps:$4 sm:$0xff]  }
 0x5d5   : > { %v16182_v50 = vadd.f32 %v8778_v19, %v8738_v47  ;;  %9032 = vmatpush1.bf16.msra.mxu1 %v12509_v39  ;;  %9063 = vmatprep.mubr.bf16.mxu1 %v3487_v11  ;;  %v12521_v11 = vld [vmem:[%s16932_s7 + $0xca8] ss:$16 sps:$4 sm:$0xff]   ;;  %v12571_v19 = vld [vmem:[%s16932_s7 + $0xdac] ss:$16 sps:$4 sm:$0xff]  }
 0x5d6   : > { %v8780_v4 = vpop.f32.mrf.mxu1  ;;  %9033 = vmatprep.subr.bf16.mxu1 %v12517_v9  ;;  %v12539_v47 = vld [vmem:[%s16932_s7 + $0xc48] ss:$16 sps:$4 sm:$0xff]   ;;  %v12568_v9 = vld [vmem:[%s16932_s7 + $0xf2c] ss:$16 sps:$4 sm:$0xff]  }
 0x5d7   : > { %v16192_v14 = vadd.f32 %v8780_v4, %v8740_v31  ;;  %9083 = vmatpush1.bf16.msra.mxu0 %v12512_v24  ;;  %v12553_v31 = vld [vmem:[%s16932_s7 + $0xc0c] ss:$16 sps:$4 sm:$0xff]   ;;  %v12560_v39 = vld [vmem:[%s16932_s7 + $0xf48] ss:$16 sps:$4 sm:$0xff]  }
 0x5d8   : > { %v8782_v28 = vpop.f32.mrf.mxu1  ;;  %9084 = vmatprep.subr.bf16.mxu0 %v12520_v20  ;;  %v12563_v24 = vld [vmem:[%s16932_s7 + $0xdc8] ss:$16 sps:$4 sm:$0xff]  }
 0x5d9   : > { %9034 = vmatpush1.bf16.msra.mxu1 %v12515_v13  ;;  %v12566_v20 = vld [vmem:[%s16932_s7 + $0xf28] ss:$16 sps:$4 sm:$0xff]   ;;  %v12574_v13 = vld [vmem:[%s16932_s7 + $0xf0c] ss:$16 sps:$4 sm:$0xff]  }
 0x5da   : > { %v8783_v44 = vpop.f32.mrf.mxu1  ;;  %9035 = vmatprep.subr.bf16.mxu1 %v12523_v23  ;;  %v12569_v4 = vld [vmem:[%s16932_s7 + $0xda8] ss:$16 sps:$4 sm:$0xff]   ;;  %v12577_v23 = vld [vmem:[%s16932_s7 + $0xd8c] ss:$16 sps:$4 sm:$0xff]  }
 0x5db   : > { %9085 = vmatpush1.bf16.msra.mxu0 %v12518_v8  ;;  %v12572_v8 = vld [vmem:[%s16932_s7 + $0xf08] ss:$16 sps:$4 sm:$0xff]   ;;  %v12580_v28 = vld [vmem:[%s16932_s7 + $0x12ec] ss:$16 sps:$4 sm:$0xff]  }
 0x5dc   : > { %9086 = vmatprep.subr.bf16.mxu0 %v12526_v42  ;;  %v12575_v42 = vld [vmem:[%s16932_s7 + $0xd88] ss:$16 sps:$4 sm:$0xff]  }
 0x5dd   : > { %9036 = vmatpush1.bf16.msra.mxu1 %v12521_v11  ;;  %v12583_v11 = vld [vmem:[%s16932_s7 + $0xd6c] ss:$16 sps:$4 sm:$0xff]   ;;  %v12578_v44 = vld [vmem:[%s16932_s7 + $0x12e8] ss:$16 sps:$4 sm:$0xff]  }
 0x5de   : > { %9037 = vmatprep.subr.bf16.mxu1 %v12529_v32  ;;  %v12586_v32 = vld [vmem:[%s16932_s7 + $0x12cc] ss:$16 sps:$4 sm:$0xff]  }
 0x5df   : > { %9087 = vmatpush1.bf16.msra.mxu0 %v12524_v43  ;;  %v12581_v43 = vld [vmem:[%s16932_s7 + $0xd68] ss:$16 sps:$4 sm:$0xff]  }
 0x5e0   : > { %9088 = vmatprep.subr.bf16.mxu0 %v12532_v63 }
 0x5e1   : > { %9038 = vmatpush1.bf16.msra.mxu1 %v12527_v57  ;;  %v12589_v57 = vld [vmem:[%s16932_s7 + $0xd4c] ss:$16 sps:$4 sm:$0xff]  }
 0x5e2   : > { %9039 = vmatprep.subr.bf16.mxu1 %v12535_v52  ;;  %v12584_v52 = vld [vmem:[%s16932_s7 + $0x12c8] ss:$16 sps:$4 sm:$0xff]  }
 0x5e3   : > { %9089 = vmatpush2.bf16.msra.mxu0 %v12530_v38 }
 0x5e4   : > { %9090 = vmatprep.subr.bf16.mxu0 %v12538_v2 }
 0x5e5   : > { %9040 = vmatpush1.bf16.msra.mxu1 %v12533_v46 }
 0x5e6   : > { %9041 = vmatprep.subr.bf16.mxu1 %v12541_v22  ;;  %v12598_v22 = vld [vmem:[%s16932_s7 + $0x128c] ss:$16 sps:$4 sm:$0xff]  }
 0x5e7   : > { %9091 = vmatpush2.bf16.msra.mxu0 %v12536_v17  ;;  %v12593_v17 = vld [vmem:[%s16932_s7 + $0xd28] ss:$16 sps:$4 sm:$0xff]  }
 0x5e8   : > { %9092 = vmatprep.subr.bf16.mxu0 %v12544_v35  ;;  %v12601_v35 = vld [vmem:[%s16932_s7 + $0xd0c] ss:$16 sps:$4 sm:$0xff]  }
 0x5e9   : > { %9042 = vmatpush1.bf16.msra.mxu1 %v12539_v47  ;;  %v12596_v47 = vld [vmem:[%s16932_s7 + $0x1288] ss:$16 sps:$4 sm:$0xff]  }
 0x5ea   : > { %9043 = vmatprep.subr.bf16.mxu1 %v12547_v12  ;;  %v12604_v12 = vld [vmem:[%s16932_s7 + $0x126c] ss:$16 sps:$4 sm:$0xff]  }
 0x5eb   : > { %9093 = vmatpush2.bf16.msra.mxu0 %v12542_v45  ;;  %v12599_v45 = vld [vmem:[%s16932_s7 + $0xd08] ss:$16 sps:$4 sm:$0xff]  }
 0x5ec   : > { %9094 = vmatprep.subr.bf16.mxu0 %v12550_v5  ;;  %v8239_v5 = vsub.s32 2, %v15012_v58 }
 0x5ed   : > { %9044 = vmatpush1.bf16.msra.mxu1 %v12545_v48  ;;  %v12607_v48 = vld [vmem:[%s16932_s7 + $0x10ec] ss:$16 sps:$4 sm:$0xff]  }
 0x5ee   : > { %9045 = vmatprep.subr.bf16.mxu1 %v12553_v31  ;;  %v12602_v31 = vld [vmem:[%s16932_s7 + $0x1268] ss:$16 sps:$4 sm:$0xff]  }
 0x5ef   : > { %9095 = vmatpush2.bf16.msra.mxu0 %v12548_v51  ;;  %v8243_v51 = vsub.s32 3, %v15012_v58  ;;  %v12613_v58 = vld [vmem:[%s16932_s7 + $0x10cc] ss:$16 sps:$4 sm:$0xff]  }
 0x5f0   : > { %9096 = vmatprep.subr.bf16.mxu0 %v12556_v41  ;;  %v12610_v41 = vld [vmem:[%s16932_s7 + $0x124c] ss:$16 sps:$4 sm:$0xff]  }
 0x5f1   : > { %9046 = vmatpush1.bf16.msra.mxu1 %v12551_v34  ;;  %v12827_v34 = vld [vmem:[%s16933_s8] sm:$0xf] }
 0x5f2   : > { %9047 = vmatprep.subr.bf16.mxu1 %v12559_v53  ;;  %v8240_v53 = vrot.slane %v12827_v34, %v8239_v5  ;;  %v12658_v5 = vld [vmem:[%s16932_s7 + $0x134c] ss:$16 sps:$4 sm:$0xff]  }
 0x5f3   : > { %9097 = vmatpush2.bf16.msra.mxu0 %v12554_v49  ;;  %v12605_v49 = vld [vmem:[%s16932_s7 + $0x10e8] ss:$16 sps:$4 sm:$0xff]  }
 0x5f4   : > { %9098 = vmatprep.subr.bf16.mxu0 %v12562_v30  ;;  %v8244_v30 = vrot.slane %v12827_v34, %v8243_v51  ;;  %v12656_v51 = vld [vmem:[%s16932_s7 + $0x1348] ss:$16 sps:$4 sm:$0xff]  }
 0x5f5   : > { %9048 = vmatpush2.bf16.msra.mxu1 %v12557_v3  ;;  %v12608_v3 = vld [vmem:[%s16932_s7 + $0x1248] ss:$16 sps:$4 sm:$0xff]  }
 0x5f6   : > { %9049 = vmatprep.subr.bf16.mxu1 %v12565_v26  ;;  %v12659_v34 = vld [vmem:[%s16932_s7 + $0x11c8] ss:$16 sps:$4 sm:$0xff]  }
 0x5f7   : > { %9099 = vmatpush2.bf16.msra.mxu0 %v12560_v39  ;;  %v12616_v39 = vld [vmem:[%s16932_s7 + $0x122c] ss:$16 sps:$4 sm:$0xff]  }
 0x5f8   : > { %9100 = vmatprep.subr.bf16.mxu0 %v12568_v9 }
 0x5f9   : > { %9050 = vmatpush2.bf16.msra.mxu1 %v12563_v24  ;;  %v12611_v24 = vld [vmem:[%s16932_s7 + $0x10c8] ss:$16 sps:$4 sm:$0xff]  }
 0x5fa   : > { %9051 = vmatprep.subr.bf16.mxu1 %v12571_v19 }
 0x5fb   : > { %9101 = vmatpush2.bf16.msra.mxu0 %v12566_v20  ;;  %v12614_v20 = vld [vmem:[%s16932_s7 + $0x1228] ss:$16 sps:$4 sm:$0xff]  }
 0x5fc   : > { %9102 = vmatprep.subr.bf16.mxu0 %v12574_v13 }
 0x5fd   : > { %9052 = vmatpush2.bf16.msra.mxu1 %v12569_v4  ;;  %v12617_v4 = vld [vmem:[%s16932_s7 + $0x10a8] ss:$16 sps:$4 sm:$0xff]  }
 0x5fe   : > { %9053 = vmatprep.subr.bf16.mxu1 %v12577_v23 }
 0x5ff   : > { %9103 = vmatpush2.bf16.msra.mxu0 %v12572_v8 }
 0x600   : > { %9154 = vmatprep.subr.bf16.mxu0 %v12580_v28  ;;  %v12625_v28 = vld [vmem:[%s16932_s7 + $0x108c] ss:$16 sps:$4 sm:$0xff]  }
 0x601   : > { %9054 = vmatpush2.bf16.msra.mxu1 %v12575_v42  ;;  %v12620_v42 = vld [vmem:[%s16932_s7 + $0x1208] ss:$16 sps:$4 sm:$0xff]  }
 0x602   : > { %v8860_v63 = vpop.f32.mrf.mxu0  ;;  %9105 = vmatmul.mubr.bf16.vlgmr.msra.gmra.mxu0 %v3488_v54  ;;  %9055 = vmatprep.subr.bf16.mxu1 %v12583_v11  ;;  %v12587_v54 = vld [vmem:[%s16932_s7 + $0xd48] ss:$16 sps:$4 sm:$0xff]   ;;  %v12628_v11 = vld [vmem:[%s16932_s7 + $0x13ec] ss:$16 sps:$4 sm:$0xff]  }
 0x603   : > { %9155 = vmatpush1.bf16.msra.mxu0 %v12578_v44  ;;  %9186 = vmatprep.mubr.bf16.mxu0 %v3509_v33  ;;  %v12590_v33 = vld [vmem:[%s16932_s7 + $0x12a8] ss:$16 sps:$4 sm:$0xff]  }
 0x604   : > { %v8862_v38 = vpop.f32.mrf.mxu0  ;;  %9156 = vmatprep.subr.bf16.mxu0 %v12586_v32  ;;  %v12623_v44 = vld [vmem:[%s16932_s7 + $0x1088] ss:$16 sps:$4 sm:$0xff]   ;;  %v12631_v32 = vld [vmem:[%s16932_s7 + $0x106c] ss:$16 sps:$4 sm:$0xff]  }
 0x605   : > { %9056 = vmatpush2.bf16.msra.mxu1 %v12581_v43  ;;  %v12626_v43 = vld [vmem:[%s16932_s7 + $0x13e8] ss:$16 sps:$4 sm:$0xff]  }
 0x606   : > { %v8864_v2 = vpop.f32.mrf.mxu0  ;;  %9057 = vmatprep.subr.bf16.mxu1 %v12589_v57  ;;  %v12629_v57 = vld [vmem:[%s16932_s7 + $0x1068] ss:$16 sps:$4 sm:$0xff]  }
 0x607   : > { %9157 = vmatpush1.bf16.msra.mxu0 %v12584_v52  ;;  %v12637_v52 = vld [vmem:[%s16932_s7 + $0x104c] ss:$16 sps:$4 sm:$0xff]  }
 0x608   : > { %v8865_v46 = vpop.f32.mrf.mxu0  ;;  %9158 = vmatprep.subr.bf16.mxu0 %v12592_v25  ;;  %v12640_v25 = vld [vmem:[%s16932_s7 + $0x13ac] ss:$16 sps:$4 sm:$0xff]  }
 0x609   : > { %9058 = vmatpush2.bf16.msra.mxu1 %v12587_v54  ;;  %v12635_v54 = vld [vmem:[%s16932_s7 + $0x1048] ss:$16 sps:$4 sm:$0xff]   ;;  %v12643_v2 = vld [vmem:[%s16932_s7 + $0x102c] ss:$16 sps:$4 sm:$0xff]  }
 0x60a   : > { %9059 = vmatprep.subr.bf16.mxu1 %v12595_v36  ;;  %v12638_v36 = vld [vmem:[%s16932_s7 + $0x13a8] ss:$16 sps:$4 sm:$0xff]  }
 0x60b   : > { %9159 = vmatpush1.bf16.msra.mxu0 %v12590_v33  ;;  %v12646_v33 = vld [vmem:[%s16932_s7 + $0x138c] ss:$16 sps:$4 sm:$0xff]   ;;  %v12641_v46 = vld [vmem:[%s16932_s7 + $0x1028] ss:$16 sps:$4 sm:$0xff]  }
 0x60c   : > { %9160 = vmatprep.subr.bf16.mxu0 %v12598_v22  ;;  %v12649_v22 = vld [vmem:[%s16932_s7 + $0x100c] ss:$16 sps:$4 sm:$0xff]  }
 0x60d   : > { %9060 = vmatpush2.bf16.msra.mxu1 %v12593_v17  ;;  %v12644_v17 = vld [vmem:[%s16932_s7 + $0x1388] ss:$16 sps:$4 sm:$0xff]  }
 0x60e   : > { %9061 = vmatprep.subr.bf16.mxu1 %v12601_v35  ;;  %v12652_v35 = vld [vmem:[%s16932_s7 + $0x136c] ss:$16 sps:$4 sm:$0xff]  }
 0x60f   : > { %9161 = vmatpush1.bf16.msra.mxu0 %v12596_v47  ;;  %v12647_v47 = vld [vmem:[%s16932_s7 + $0x1008] ss:$16 sps:$4 sm:$0xff]  }
 0x610   : > { %9162 = vmatprep.subr.bf16.mxu0 %v12604_v12  ;;  %v12655_v12 = vld [vmem:[%s16932_s7 + $0x11ec] ss:$16 sps:$4 sm:$0xff]  }
 0x611   : > { %9062 = vmatpush2.bf16.msra.mxu1 %v12599_v45  ;;  %v12650_v45 = vld [vmem:[%s16932_s7 + $0x1368] ss:$16 sps:$4 sm:$0xff]  }
 0x612   : > { %9113 = vmatprep.subr.bf16.mxu1 %v12607_v48  ;;  %v12653_v48 = vld [vmem:[%s16932_s7 + $0x11e8] ss:$16 sps:$4 sm:$0xff]  }
 0x613   : > { %9163 = vmatpush1.bf16.msra.mxu0 %v12602_v31  ;;  %v12661_v31 = vld [vmem:[%s16932_s7 + $0x11cc] ss:$16 sps:$4 sm:$0xff]  }
 0x614   : > { %v8819_v26 = vpop.f32.mrf.mxu1  ;;  %9064 = vmatmul.mubr.bf16.vlgmr.msra.gmra.mxu1 %v3486_v18  ;;  %9164 = vmatprep.subr.bf16.mxu0 %v12610_v41  ;;  %v12664_v41 = vld [vmem:[%s16932_s7 + $0x132c] ss:$16 sps:$4 sm:$0xff]  }
 0x615   : > { %v8820_v9 = vadd.f32 %v8819_v26, %v8240_v53  ;;  %9114 = vmatpush1.bf16.msra.mxu1 %v12605_v49  ;;  %9145 = vmatprep.mubr.bf16.mxu1 %v3507_v55  ;;  %v12622_v55 = vld [vmem:[%s16932_s7 + $0x120c] ss:$16 sps:$4 sm:$0xff]   ;;  %v12662_v49 = vld [vmem:[%s16932_s7 + $0x1328] ss:$16 sps:$4 sm:$0xff]  }
 0x616   : > { %v8821_v19 = vpop.f32.mrf.mxu1  ;;  %9115 = vmatprep.subr.bf16.mxu1 %v12613_v58  ;;  %v12667_v53 = vld [vmem:[%s16932_s7 + $0x11ac] ss:$16 sps:$4 sm:$0xff]   ;;  %v12668_v26 = vld [vmem:[%s16932_s7 + $0x1308] ss:$16 sps:$4 sm:$0xff]  }
 0x617   : > { %v8822_v18 = vadd.f32 %v8821_v19, %v8244_v30  ;;  %9165 = vmatpush1.bf16.msra.mxu0 %v12608_v3  ;;  %v16402_v13 = vadd.f32 %v8860_v63, %v8820_v9  ;;  %v12634_v63 = vld [vmem:[%s16932_s7 + $0x13cc] ss:$16 sps:$4 sm:$0xff]   ;;  %v12665_v30 = vld [vmem:[%s16932_s7 + $0x11a8] ss:$16 sps:$4 sm:$0xff]  }
 0x618   : > { %v8823_v7 = vpop.f32.mrf.mxu1  ;;  %9166 = vmatprep.subr.bf16.mxu0 %v12616_v39  ;;  %v12670_v58 = vld [vmem:[%s16932_s7 + $0x130c] ss:$16 sps:$4 sm:$0xff]   ;;  %v12671_v9 = vld [vmem:[%s16932_s7 + $0x1188] ss:$16 sps:$4 sm:$0xff]  }
 0x619   : > { %9116 = vmatpush1.bf16.msra.mxu1 %v12611_v24  ;;  %v16410_v23 = vadd.f32 %v8862_v38, %v8822_v18  ;;  %v12632_v38 = vld [vmem:[%s16932_s7 + $0x13c8] ss:$16 sps:$4 sm:$0xff]   ;;  %v12673_v3 = vld [vmem:[%s16932_s7 + $0x118c] ss:$16 sps:$4 sm:$0xff]  }
 0x61a   : > { %v8824_v8 = vpop.f32.mrf.mxu1  ;;  %9117 = vmatprep.subr.bf16.mxu1 %v12619_v60  ;;  %v12676_v39 = vld [vmem:[%s16932_s7 + $0x16ec] ss:$16 sps:$4 sm:$0xff]   ;;  %v12674_v19 = vld [vmem:[%s16932_s7 + $0x16e8] ss:$16 sps:$4 sm:$0xff]  }
 0x61b   : > { %9167 = vmatpush1.bf16.msra.mxu0 %v12614_v20  ;;  %v12679_v24 = vld [vmem:[%s16932_s7 + $0x116c] ss:$16 sps:$4 sm:$0xff]   ;;  %v12677_v18 = vld [vmem:[%s16932_s7 + $0x1168] ss:$16 sps:$4 sm:$0xff]  }
 0x61c   : > { %9168 = vmatprep.subr.bf16.mxu0 %v12622_v55  ;;  %v12682_v60 = vld [vmem:[%s16932_s7 + $0x16cc] ss:$16 sps:$4 sm:$0xff]   ;;  %v12680_v55 = vld [vmem:[%s16932_s7 + $0x16c8] ss:$16 sps:$4 sm:$0xff]  }
 0x61d   : > { %9118 = vmatpush1.bf16.msra.mxu1 %v12617_v4  ;;  %v12685_v7 = vld [vmem:[%s16932_s7 + $0x114c] ss:$16 sps:$4 sm:$0xff]  }
 0x61e   : > { %9119 = vmatprep.subr.bf16.mxu1 %v12625_v28 }
 0x61f   : > { %9169 = vmatpush1.bf16.msra.mxu0 %v12620_v42  ;;  %v12694_v42 = vld [vmem:[%s16932_s7 + $0x168c] ss:$16 sps:$4 sm:$0xff]  }
 0x620   : > { %9170 = vmatprep.subr.bf16.mxu0 %v12628_v11  ;;  %v12689_v11 = vld [vmem:[%s16932_s7 + $0x1128] ss:$16 sps:$4 sm:$0xff]  }
 0x621   : > { %9120 = vmatpush1.bf16.msra.mxu1 %v12623_v44  ;;  %v12697_v44 = vld [vmem:[%s16932_s7 + $0x110c] ss:$16 sps:$4 sm:$0xff]  }
 0x622   : > { %9121 = vmatprep.subr.bf16.mxu1 %v12631_v32  ;;  %v12692_v32 = vld [vmem:[%s16932_s7 + $0x1688] ss:$16 sps:$4 sm:$0xff]  }
 0x623   : > { %9171 = vmatpush2.bf16.msra.mxu0 %v12626_v43  ;;  %v12700_v43 = vld [vmem:[%s16932_s7 + $0x166c] ss:$16 sps:$4 sm:$0xff]  }
 0x624   : > { %9172 = vmatprep.subr.bf16.mxu0 %v12634_v63  ;;  %v12695_v63 = vld [vmem:[%s16932_s7 + $0x1108] ss:$16 sps:$4 sm:$0xff]  }
 0x625   : > { %9122 = vmatpush1.bf16.msra.mxu1 %v12629_v57  ;;  %v12703_v57 = vld [vmem:[%s16932_s7 + $0x14ec] ss:$16 sps:$4 sm:$0xff]  }
 0x626   : > { %9123 = vmatprep.subr.bf16.mxu1 %v12637_v52  ;;  %v12698_v52 = vld [vmem:[%s16932_s7 + $0x1668] ss:$16 sps:$4 sm:$0xff]  }
 0x627   : > { %9173 = vmatpush2.bf16.msra.mxu0 %v12632_v38  ;;  %v12706_v38 = vld [vmem:[%s16932_s7 + $0x164c] ss:$16 sps:$4 sm:$0xff]  }
 0x628   : > { %9174 = vmatprep.subr.bf16.mxu0 %v12640_v25  ;;  %v12701_v25 = vld [vmem:[%s16932_s7 + $0x14e8] ss:$16 sps:$4 sm:$0xff]  }
 0x629   : > { %9124 = vmatpush1.bf16.msra.mxu1 %v12635_v54  ;;  %v12709_v54 = vld [vmem:[%s16932_s7 + $0x14cc] ss:$16 sps:$4 sm:$0xff]  }
 0x62a   : > { %9125 = vmatprep.subr.bf16.mxu1 %v12643_v2  ;;  %v12704_v2 = vld [vmem:[%s16932_s7 + $0x1648] ss:$16 sps:$4 sm:$0xff]  }
 0x62b   : > { %9175 = vmatpush2.bf16.msra.mxu0 %v12638_v36 }
 0x62c   : > { %9176 = vmatprep.subr.bf16.mxu0 %v12646_v33  ;;  %v12712_v33 = vld [vmem:[%s16932_s7 + $0x162c] ss:$16 sps:$4 sm:$0xff]  }
 0x62d   : > { %9126 = vmatpush1.bf16.msra.mxu1 %v12641_v46 }
 0x62e   : > { %9127 = vmatprep.subr.bf16.mxu1 %v12649_v22  ;;  %v12707_v22 = vld [vmem:[%s16932_s7 + $0x14c8] ss:$16 sps:$4 sm:$0xff]  }
 0x62f   : > { %9177 = vmatpush2.bf16.msra.mxu0 %v12644_v17 }
 0x630   : > { %9178 = vmatprep.subr.bf16.mxu0 %v12652_v35 }
 0x631   : > { %9128 = vmatpush1.bf16.msra.mxu1 %v12647_v47  ;;  %v12713_v47 = vld [vmem:[%s16932_s7 + $0x14a8] ss:$16 sps:$4 sm:$0xff]  }
 0x632   : > { %9129 = vmatprep.subr.bf16.mxu1 %v12655_v12 }
 0x633   : > { %9179 = vmatpush2.bf16.msra.mxu0 %v12650_v45  ;;  %v12721_v45 = vld [vmem:[%s16932_s7 + $0x148c] ss:$16 sps:$4 sm:$0xff]  }
 0x634   : > { %9180 = vmatprep.subr.bf16.mxu0 %v12658_v5  ;;  %v12716_v5 = vld [vmem:[%s16932_s7 + $0x1608] ss:$16 sps:$4 sm:$0xff]  }
 0x635   : > { %9130 = vmatpush2.bf16.msra.mxu1 %v12653_v48  ;;  %v12724_v48 = vld [vmem:[%s16932_s7 + $0x17ec] ss:$16 sps:$4 sm:$0xff]  }
 0x636   : > { %9131 = vmatprep.subr.bf16.mxu1 %v12661_v31  ;;  %v12719_v31 = vld [vmem:[%s16932_s7 + $0x1488] ss:$16 sps:$4 sm:$0xff]  }
 0x637   : > { %9181 = vmatpush2.bf16.msra.mxu0 %v12656_v51  ;;  %v12727_v51 = vld [vmem:[%s16932_s7 + $0x146c] ss:$16 sps:$4 sm:$0xff]  }
 0x638   : > { %9182 = vmatprep.subr.bf16.mxu0 %v12664_v41  ;;  %v12722_v41 = vld [vmem:[%s16932_s7 + $0x17e8] ss:$16 sps:$4 sm:$0xff]  }
 0x639   : > { %9132 = vmatpush2.bf16.msra.mxu1 %v12659_v34  ;;  %v12730_v34 = vld [vmem:[%s16932_s7 + $0x17cc] ss:$16 sps:$4 sm:$0xff]  }
 0x63a   : > { %9133 = vmatprep.subr.bf16.mxu1 %v12667_v53  ;;  %v12725_v53 = vld [vmem:[%s16932_s7 + $0x1468] ss:$16 sps:$4 sm:$0xff]  }
 0x63b   : > { %9183 = vmatpush2.bf16.msra.mxu0 %v12662_v49  ;;  %v12733_v49 = vld [vmem:[%s16932_s7 + $0x144c] ss:$16 sps:$4 sm:$0xff]  }
 0x63c   : > { %9184 = vmatprep.subr.bf16.mxu0 %v12670_v58  ;;  %v12728_v58 = vld [vmem:[%s16932_s7 + $0x17c8] ss:$16 sps:$4 sm:$0xff]  }
 0x63d   : > { %9134 = vmatpush2.bf16.msra.mxu1 %v12665_v30  ;;  %v12736_v30 = vld [vmem:[%s16932_s7 + $0x17ac] ss:$16 sps:$4 sm:$0xff]  }
 0x63e   : > { %9135 = vmatprep.subr.bf16.mxu1 %v12673_v3  ;;  %v12731_v3 = vld [vmem:[%s16932_s7 + $0x1448] ss:$16 sps:$4 sm:$0xff]  }
 0x63f   : > { %9185 = vmatpush2.bf16.msra.mxu0 %v12668_v26  ;;  %v12739_v26 = vld [vmem:[%s16932_s7 + $0x142c] ss:$16 sps:$4 sm:$0xff]  }
 0x640   : > { %9236 = vmatprep.subr.bf16.mxu0 %v12676_v39  ;;  %v12734_v39 = vld [vmem:[%s16932_s7 + $0x17a8] ss:$16 sps:$4 sm:$0xff]  }
 0x641   : > { %9136 = vmatpush2.bf16.msra.mxu1 %v12671_v9  ;;  %v12742_v9 = vld [vmem:[%s16932_s7 + $0x178c] ss:$16 sps:$4 sm:$0xff]  }
 0x642   : > { %v8942_v20 = vpop.f32.mrf.mxu0  ;;  %9187 = vmatmul.mubr.bf16.vlgmr.msra.gmra.mxu0 %v3508_v62  ;;  %9137 = vmatprep.subr.bf16.mxu1 %v12679_v24  ;;  %v12683_v62 = vld [vmem:[%s16932_s7 + $0x1148] ss:$16 sps:$4 sm:$0xff]  }
 0x643   : > { %9237 = vmatpush1.bf16.msra.mxu0 %v12674_v19  ;;  %9268 = vmatprep.mubr.bf16.mxu0 %v3513_v1  ;;  %v12686_v1 = vld [vmem:[%s16932_s7 + $0x16a8] ss:$16 sps:$4 sm:$0xff]   ;;  %v12745_v19 = vld [vmem:[%s16932_s7 + $0x140c] ss:$16 sps:$4 sm:$0xff]  }
 0x644   : > { %v8944_v4 = vpop.f32.mrf.mxu0  ;;  %9238 = vmatprep.subr.bf16.mxu0 %v12682_v60  ;;  %v12737_v24 = vld [vmem:[%s16932_s7 + $0x1428] ss:$16 sps:$4 sm:$0xff]  }
 0x645   : > { %9138 = vmatpush2.bf16.msra.mxu1 %v12677_v18  ;;  %v12740_v60 = vld [vmem:[%s16932_s7 + $0x1788] ss:$16 sps:$4 sm:$0xff]   ;;  %v12748_v18 = vld [vmem:[%s16932_s7 + $0x176c] ss:$16 sps:$4 sm:$0xff]  }
 0x646   : > { %v8946_v8 = vpop.f32.mrf.mxu0  ;;  %9139 = vmatprep.subr.bf16.mxu1 %v12685_v7  ;;  %v12751_v7 = vld [vmem:[%s16932_s7 + $0x15ec] ss:$16 sps:$4 sm:$0xff]  }
 0x647   : > { %9239 = vmatpush1.bf16.msra.mxu0 %v12680_v55  ;;  %v12746_v55 = vld [vmem:[%s16932_s7 + $0x1768] ss:$16 sps:$4 sm:$0xff]  }
 0x648   : > { %v8947_v28 = vpop.f32.mrf.mxu0  ;;  %9240 = vmatprep.subr.bf16.mxu0 %v12688_v21  ;;  %v12749_v21 = vld [vmem:[%s16932_s7 + $0x15e8] ss:$16 sps:$4 sm:$0xff]  }
 0x649   : > { %9140 = vmatpush2.bf16.msra.mxu1 %v12683_v62  ;;  %v12757_v62 = vld [vmem:[%s16932_s7 + $0x15cc] ss:$16 sps:$4 sm:$0xff]   ;;  %v12752_v8 = vld [vmem:[%s16932_s7 + $0x1748] ss:$16 sps:$4 sm:$0xff]  }
 0x64a   : > { %9141 = vmatprep.subr.bf16.mxu1 %v12691_v29  ;;  %v12760_v29 = vld [vmem:[%s16932_s7 + $0x172c] ss:$16 sps:$4 sm:$0xff]  }
 0x64b   : > { %9241 = vmatpush1.bf16.msra.mxu0 %v12686_v1  ;;  %v12755_v1 = vld [vmem:[%s16932_s7 + $0x15c8] ss:$16 sps:$4 sm:$0xff]   ;;  %v12763_v28 = vld [vmem:[%s16932_s7 + $0x15ac] ss:$16 sps:$4 sm:$0xff]  }
 0x64c   : > { %9242 = vmatprep.subr.bf16.mxu0 %v12694_v42  ;;  %v12758_v42 = vld [vmem:[%s16932_s7 + $0x1728] ss:$16 sps:$4 sm:$0xff]  }
 0x64d   : > { %9142 = vmatpush2.bf16.msra.mxu1 %v12689_v11  ;;  %v12766_v11 = vld [vmem:[%s16932_s7 + $0x170c] ss:$16 sps:$4 sm:$0xff]  }
 0x64e   : > { %9143 = vmatprep.subr.bf16.mxu1 %v12697_v44  ;;  %v12761_v44 = vld [vmem:[%s16932_s7 + $0x15a8] ss:$16 sps:$4 sm:$0xff]  }
 0x64f   : > { %9243 = vmatpush1.bf16.msra.mxu0 %v12692_v32  ;;  %v12769_v32 = vld [vmem:[%s16932_s7 + $0x158c] ss:$16 sps:$4 sm:$0xff]  }
 0x650   : > { %9244 = vmatprep.subr.bf16.mxu0 %v12700_v43  ;;  %v12764_v43 = vld [vmem:[%s16932_s7 + $0x1708] ss:$16 sps:$4 sm:$0xff]  }
 0x651   : > { %9144 = vmatpush2.bf16.msra.mxu1 %v12695_v63  ;;  %v12767_v63 = vld [vmem:[%s16932_s7 + $0x1588] ss:$16 sps:$4 sm:$0xff]  }
 0x652   : > { %9195 = vmatprep.subr.bf16.mxu1 %v12703_v57  ;;  %v12772_v57 = vld [vmem:[%s16932_s7 + $0x156c] ss:$16 sps:$4 sm:$0xff]  }
 0x653   : > { %9245 = vmatpush1.bf16.msra.mxu0 %v12698_v52  ;;  %v12770_v52 = vld [vmem:[%s16932_s7 + $0x1568] ss:$16 sps:$4 sm:$0xff]  }
 0x654   : > { %v8901_v36 = vpop.f32.mrf.mxu1  ;;  %9146 = vmatmul.mubr.bf16.vlgmr.msra.gmra.mxu1 %v3506_v56  ;;  %9246 = vmatprep.subr.bf16.mxu0 %v12706_v38 }
 0x655   : > { %v8902_v46 = vadd.f32 %v8901_v36, %v16402_v13  ;;  %9196 = vmatpush1.bf16.msra.mxu1 %v12701_v25  ;;  %9227 = vmatprep.mubr.bf16.mxu1 %v3511_v0  ;;  %v12710_v13 = vld [vmem:[%s16932_s7 + $0x1628] ss:$16 sps:$4 sm:$0xff]   ;;  %v12718_v0 = vld [vmem:[%s16932_s7 + $0x160c] ss:$16 sps:$4 sm:$0xff]  }
 0x656   : > { %v8903_v17 = vpop.f32.mrf.mxu1  ;;  %9197 = vmatprep.subr.bf16.mxu1 %v12709_v54  ;;  %v12775_v25 = vld [vmem:[%s16932_s7 + $0x154c] ss:$16 sps:$4 sm:$0xff]  }
 0x657   : > { %v8904_v56 = vadd.f32 %v8903_v17, %v16410_v23  ;;  %9247 = vmatpush1.bf16.msra.mxu0 %v12704_v2  ;;  %v16608_v35 = vadd.f32 %v8942_v20, %v8902_v46  ;;  %v12743_v20 = vld [vmem:[%s16932_s7 + $0x1408] ss:$16 sps:$4 sm:$0xff]   ;;  %v12784_v17 = vld [vmem:[%s16932_s7 + $0x186c] ss:$16 sps:$4 sm:$0xff]  }
 0x658   : > { %v8905_v59 = vpop.f32.mrf.mxu1  ;;  %9248 = vmatprep.subr.bf16.mxu0 %v12712_v33  ;;  %v12773_v2 = vld [vmem:[%s16932_s7 + $0x1548] ss:$16 sps:$4 sm:$0xff]   ;;  %v12778_v33 = vld [vmem:[%s16932_s7 + $0x152c] ss:$16 sps:$4 sm:$0xff]  }
 0x659   : > { %9198 = vmatpush1.bf16.msra.mxu1 %v12707_v22  ;;  %v16616_v12 = vadd.f32 %v8944_v4, %v8904_v56  ;;  %v12754_v4 = vld [vmem:[%s16932_s7 + $0x174c] ss:$16 sps:$4 sm:$0xff]   ;;  %v12779_v22 = vld [vmem:[%s16932_s7 + $0x1508] ss:$16 sps:$4 sm:$0xff]  }
 0x65a   : > { %v8906_v23 = vpop.f32.mrf.mxu1  ;;  %9199 = vmatprep.subr.bf16.mxu1 %v12715_v10  ;;  %v12782_v10 = vld [vmem:[%s16932_s7 + $0x1868] ss:$16 sps:$4 sm:$0xff]   ;;  %v12787_v56 = vld [vmem:[%s16932_s7 + $0x184c] ss:$16 sps:$4 sm:$0xff]  }
 0x65b   : > { %9249 = vmatpush1.bf16.msra.mxu0 %v12710_v13  ;;  %v12790_v23 = vld [vmem:[%s16932_s7 + $0x182c] ss:$16 sps:$4 sm:$0xff]  }
 0x65c   : > { %9250 = vmatprep.subr.bf16.mxu0 %v12718_v0  ;;  %v12785_v0 = vld [vmem:[%s16932_s7 + $0x1848] ss:$16 sps:$4 sm:$0xff]  }
 0x65d   : > { %9200 = vmatpush1.bf16.msra.mxu1 %v12713_v47 }
 0x65e   : > { %9201 = vmatprep.subr.bf16.mxu1 %v12721_v45 }
 0x65f   : > { %9251 = vmatpush1.bf16.msra.mxu0 %v12716_v5 }
 0x660   : > { %9252 = vmatprep.subr.bf16.mxu0 %v12724_v48 }
 0x661   : > { %9202 = vmatpush1.bf16.msra.mxu1 %v12719_v31  ;;  %v12794_v31 = vld [vmem:[%s16934_s9 + $0x78] sm:$0xff]  }
 0x662   : > { %9203 = vmatprep.subr.bf16.mxu1 %v12727_v51  ;;  %v9319_v51 = vmax.f32 %v16192_v14, 0.0  ;;  %v12797_v14 = vld [vmem:[%s16934_s9 + $0x30] sm:$0xff]  }
 0x663   : > { %9253 = vmatpush2.bf16.msra.mxu0 %v12722_v41  ;;  %v12795_v41 = vld [vmem:[%s16934_s9 + $0x38] sm:$0xff]  }
 0x664   : > { %9254 = vmatprep.subr.bf16.mxu0 %v12730_v34  ;;  %v12796_v34 = vld [vmem:[%s16934_s9 + $0x70] sm:$0xff]  }
 0x665   : > { %9204 = vmatpush1.bf16.msra.mxu1 %v12725_v53  ;;  %v9323_v53 = vpack.c.bf16 %v9319_v51, %v9319_v51 }
 0x666   : > { %9205 = vmatprep.subr.bf16.mxu1 %v12733_v49  ;;  %v12798_v49 = vld [vmem:[%s16934_s9 + $0x68] sm:$0xff]  }
 0x667   : > { %9255 = vmatpush2.bf16.msra.mxu0 %v12728_v58  ;;  %v12799_v58 = vld [vmem:[%s16934_s9 + $0x28] sm:$0xff]  }
 0x668   : > { %9256 = vmatprep.subr.bf16.mxu0 %v12736_v30  ;;  %v12802_v30 = vld [vmem:[%s16934_s9 + $0x58] sm:$0xff]  }
 0x669   : > { %9206 = vmatpush1.bf16.msra.mxu1 %v12731_v3  ;;  %v12803_v3 = vld [vmem:[%s16934_s9 + $0x18] sm:$0xff]  }
 0x66a   : > { %9207 = vmatprep.subr.bf16.mxu1 %v12739_v26  ;;  %v12804_v26 = vld [vmem:[%s16934_s9 + $0x50] sm:$0xff]  }
 0x66b   : > { %9257 = vmatpush2.bf16.msra.mxu0 %v12734_v39  ;;  %v12805_v39 = vld [vmem:[%s16934_s9 + $0x10] sm:$0xff]  }
 0x66c   : > { %9258 = vmatprep.subr.bf16.mxu0 %v12742_v9  ;;  %v12806_v9 = vld [vmem:[%s16934_s9 + $0x48] sm:$0xff]  }
 0x66d   : > { %9208 = vmatpush1.bf16.msra.mxu1 %v12737_v24  ;;  %v12807_v24 = vld [vmem:[%s16934_s9 + $0x8] sm:$0xff]  }
 0x66e   : > { %9209 = vmatprep.subr.bf16.mxu1 %v12745_v19  ;;  %v12808_v19 = vld [vmem:[%s16934_s9 + $0x40] sm:$0xff]  }
 0x66f   : > { %9259 = vmatpush2.bf16.msra.mxu0 %v12740_v60  ;;  %v12809_v60 = vld [vmem:[%s16934_s9] sm:$0xff]  }
 0x670   : > { %9260 = vmatprep.subr.bf16.mxu0 %v12748_v18  ;;  %v9318_v18 = vmax.f32 %v16182_v50, 0.0  ;;  %v12812_v50 = vld [vmem:[%s16934_s9 + $0xf0] sm:$0xff]  }
 0x671   : > { %9210 = vmatpush1.bf16.msra.mxu1 %v12743_v20 }
 0x672   : > { %9211 = vmatprep.subr.bf16.mxu1 %v12751_v7  ;;  %v9322_v20 = vpack.c.bf16 %v9318_v18, %v9318_v18 }
 0x673   : > { %9261 = vmatpush2.bf16.msra.mxu0 %v12746_v55 }
 0x674   : > { %9262 = vmatprep.subr.bf16.mxu0 %v12754_v4 }
 0x675   : > { %9212 = vmatpush2.bf16.msra.mxu1 %v12749_v21 }
 0x676   : > { %9213 = vmatprep.subr.bf16.mxu1 %v12757_v62  ;;  %v12810_v62 = vld [vmem:[%s16934_s9 + $0xf8] sm:$0xff]  }
 0x677   : > { %9263 = vmatpush2.bf16.msra.mxu0 %v12752_v8  ;;  %v12811_v8 = vld [vmem:[%s16934_s9 + $0xb8] sm:$0xff]  }
 0x678   : > { %9264 = vmatprep.subr.bf16.mxu0 %v12760_v29  ;;  %v12813_v29 = vld [vmem:[%s16934_s9 + $0xb0] sm:$0xff]  }
 0x679   : > { %9214 = vmatpush2.bf16.msra.mxu1 %v12755_v1 }
 0x67a   : > { %9215 = vmatprep.subr.bf16.mxu1 %v12763_v28 }
 0x67b   : > { %9265 = vmatpush2.bf16.msra.mxu0 %v12758_v42 }
 0x67c   : > { %9266 = vmatprep.subr.bf16.mxu0 %v12766_v11 }
 0x67d   : > { %9216 = vmatpush2.bf16.msra.mxu1 %v12761_v44 }
 0x67e   : > { %9217 = vmatprep.subr.bf16.mxu1 %v12769_v32  ;;  %v12814_v32 = vld [vmem:[%s16934_s9 + $0xe8] sm:$0xff]  }
 0x67f   : > { %9267 = vmatpush2.bf16.msra.mxu0 %v12764_v43  ;;  %v12815_v43 = vld [vmem:[%s16934_s9 + $0xa8] sm:$0xff]  }
 0x680   : > { %11340 = vmatprep.subr.bf16.mxu0 %v12810_v62 }
 0x681   : > { %9218 = vmatpush2.bf16.msra.mxu1 %v12767_v63 }
 0x682   : > { %v9024_v38 = vpop.f32.mrf.mxu0  ;;  %9269 = vmatmul.mubr.bf16.vlgmr.msra.gmra.mxu0 %v3512_v37  ;;  %9219 = vmatprep.subr.bf16.mxu1 %v12772_v57  ;;  %v12781_v37 = vld [vmem:[%s16932_s7 + $0x150c] ss:$16 sps:$4 sm:$0xff]  }
 0x683   : > { %11341 = vmatpush3.bf16.msra.mxu0 %v12811_v8 }
 0x684   : > { %v9026_v54 = vpop.f32.mrf.mxu0  ;;  %11342 = vmatprep.subr.bf16.mxu0 %v12812_v50 }
 0x685   : > { %9220 = vmatpush2.bf16.msra.mxu1 %v12770_v52 }
 0x686   : > { %v9028_v36 = vpop.f32.mrf.mxu0  ;;  %9221 = vmatprep.subr.bf16.mxu1 %v12775_v25  ;;  %v12817_v25 = vld [vmem:[%s16934_s9 + $0xa0] sm:$0xff]  }
 0x687   : > { %11343 = vmatpush3.bf16.msra.mxu0 %v12813_v29  ;;  %v12820_v36 = vld [vmem:[%s16934_s9 + $0xd0] sm:$0xff]  }
 0x688   : > { %v9029_v46 = vpop.f32.mrf.mxu0  ;;  %11344 = vmatprep.subr.bf16.mxu0 %v12814_v32 }
 0x689   : > { %9222 = vmatpush2.bf16.msra.mxu1 %v12773_v2  ;;  %v12819_v2 = vld [vmem:[%s16934_s9 + $0x98] sm:$0xff]   ;;  %v12822_v46 = vld [vmem:[%s16934_s9 + $0xc8] sm:$0xff]  }
 0x68a   : > { %9223 = vmatprep.subr.bf16.mxu1 %v12778_v33  ;;  %v12821_v33 = vld [vmem:[%s16934_s9 + $0x90] sm:$0xff]  }
 0x68b   : > { %11345 = vmatpush3.bf16.msra.mxu0 %v12815_v43 }
 0x68d   : > { %9224 = vmatpush2.bf16.msra.mxu1 %v12776_v40  ;;  %v12823_v40 = vld [vmem:[%s16934_s9 + $0x88] sm:$0xff]  }
 0x68e   : > { %9225 = vmatprep.subr.bf16.mxu1 %v12781_v37  ;;  %v12824_v37 = vld [vmem:[%s16934_s9 + $0xc0] sm:$0xff]  }
 0x691   : > { %9226 = vmatpush2.bf16.msra.mxu1 %v12779_v22  ;;  %v12825_v22 = vld [vmem:[%s16934_s9 + $0x80] sm:$0xff]  }
 0x692   : > { %9285 = vmatprep.subr.bf16.mxu1 %v12784_v17 }
 0x694   : > { %v8983_v13 = vpop.f32.mrf.mxu1  ;;  %9228 = vmatmul.mubr.bf16.vlgmr.msra.gmra.mxu1 %v3510_v61  ;;  %v12788_v61 = vld [vmem:[%s16932_s7 + $0x1828] ss:$16 sps:$4 sm:$0xff]  }
 0x695   : > { %v8984_v59 = vadd.f32 %v8983_v13, %v16608_v35  ;;  %9286 = vmatpush1.bf16.msra.mxu1 %v12782_v10  ;;  %9309 = vmatprep.mubr.bf16.mxu1 %v12893_v15  ;;  %v12793_v15 = vld [vmem:[%s16932_s7 + $0x180c] ss:$16 sps:$4 sm:$0xff]  }
 0x696   : > { %v8985_v47 = vpop.f32.mrf.mxu1  ;;  %9287 = vmatprep.subr.bf16.mxu1 %v12787_v56 }
 0x697   : > { %v8986_v45 = vadd.f32 %v8985_v47, %v16616_v12  ;;  %v16769_v5 = vadd.f32 %v9024_v38, %v8984_v59  ;;  %v12791_v12 = vld [vmem:[%s16932_s7 + $0x1808] ss:$16 sps:$4 sm:$0xff]   ;;  %v12816_v38 = vld [vmem:[%s16934_s9 + $0xe0] sm:$0xff]  }
 0x698   : > { %v8987_v6 = vpop.f32.mrf.mxu1  ;;  %11346 = vmatprep.subr.bf16.mxu0 %v12816_v38 }
 0x699   : > { %9288 = vmatpush1.bf16.msra.mxu1 %v12785_v0  ;;  %v9027_v35 = vadd.f32 %v9026_v54, %v8986_v45  ;;  %v12818_v54 = vld [vmem:[%s16934_s9 + $0xd8] sm:$0xff]   ;;  %11347 = vmatpush3.bf16.msra.mxu0 %v12817_v25 }
 0x69a   : > { %v8988_v48 = vpop.f32.mrf.mxu1  ;;  %9289 = vmatprep.subr.bf16.mxu1 %v12790_v23  ;;  %11348 = vmatprep.subr.bf16.mxu0 %v12818_v54 }
 0x69d   : > { %9290 = vmatpush1.bf16.msra.mxu1 %v12788_v61  ;;  %11349 = vmatpush3.bf16.msra.mxu0 %v12819_v2 }
 0x69e   : > { %9291 = vmatprep.subr.bf16.mxu1 %v12793_v15  ;;  %11350 = vmatprep.subr.bf16.mxu0 %v12820_v36 }
 0x6a1   : > { %9292 = vmatpush1.bf16.msra.mxu1 %v12791_v12  ;;  %11351 = vmatpush3.bf16.msra.mxu0 %v12821_v33 }
 0x6a2   : > { %11318 = vmatprep.subr.bf16.mxu1 %v12794_v31  ;;  %11352 = vmatprep.subr.bf16.mxu0 %v12822_v46 }
 0x6a4   : > { %10749 = vmatmul.mubr.msk.bf16.vlgmr.msra.gmra.mxu1 %vm3331_vm9, %v3522_v27  ;;  %v12801_v27 = vld [vmem:[%s16934_s9 + $0x20] sm:$0xff]  }
 0x6a5   : > { %11319 = vmatpush3.bf16.msra.mxu1 %v12795_v41  ;;  %9615 = vmatprep.mubr.bf16.mxu1 %v9323_v53 }
 0x6a6   : > { %11320 = vmatprep.subr.bf16.mxu1 %v12796_v34  ;;  %11353 = vmatpush3.bf16.msra.mxu0 %v12823_v40 }
 0x6a7   : > { %11354 = vmatprep.subr.bf16.mxu0 %v12824_v37 }
 0x6a9   : > { %11321 = vmatpush3.bf16.msra.mxu1 %v12797_v14 }
 0x6aa   : > { %11322 = vmatprep.subr.bf16.mxu1 %v12798_v49  ;;  %11355 = vmatpush3.bf16.msra.mxu0 %v12825_v22 }
 0x6ad   : > { %11323 = vmatpush3.bf16.msra.mxu1 %v12799_v58 }
 0x6ae   : > { %11324 = vmatprep.subr.bf16.mxu1 %v12800_v16 }
 0x6b1   : > { %11325 = vmatpush3.bf16.msra.mxu1 %v12801_v27 }
 0x6b2   : > { %11326 = vmatprep.subr.bf16.mxu1 %v12802_v30 }
 0x6b5   : > { %11327 = vmatpush3.bf16.msra.mxu1 %v12803_v3 }
 0x6b6   : > { %11328 = vmatprep.subr.bf16.mxu1 %v12804_v26 }
 0x6b9   : > { %11329 = vmatpush3.bf16.msra.mxu1 %v12805_v39 }
 0x6ba   : > { %11330 = vmatprep.subr.bf16.mxu1 %v12806_v9 }
 0x6bd   : > { %11331 = vmatpush3.bf16.msra.mxu1 %v12807_v24 }
 0x6be   : > { %11332 = vmatprep.subr.bf16.mxu1 %v12808_v19 }
 0x6c1   : > { %11333 = vmatpush3.bf16.msra.mxu1 %v12809_v60 }
 0x6c2   : > { %v9106_v7 = vpop.f32.mrf.mxu0 }
 0x6c4   : > { %v9108_v55 = vpop.f32.mrf.mxu0  ;;  %9616 = vmatmul.mubr.bf16.vlgmr.msra.gmra.mxu1 %v9322_v20 }
 0x6c6   : > { %v9110_v4 = vpop.f32.mrf.mxu0 }
 0x6c8   : > { %v9111_v21 = vpop.f32.mrf.mxu0 }
 0x6c9   : > { %v9390_v21 = vld [vmem:[%s16935_s10] sm:$0x1] }
 0x6d4   : > { %v9065_v1 = vpop.f32.mrf.mxu1 }
 0x6d5   : > { %v9066_v28 = vadd.f32 %v9065_v1, %v16769_v5 }
 0x6d6   : > { %v9067_v42 = vpop.f32.mrf.mxu1 }
 0x6d7   : > { %v9068_v11 = vadd.f32 %v9067_v42, %v9027_v35  ;;  %v9107_v44 = vadd.f32 %v9106_v7, %v9066_v28 }
 0x6d8   : > { %v9069_v63 = vpop.f32.mrf.mxu1 }
 0x6d9   : > { %v9109_v57 = vadd.f32 %v9108_v55, %v9068_v11 }
 0x6da   : > { %v9070_v52 = vpop.f32.mrf.mxu1 }
 0x702   : > { %v9188_v17 = vpop.f32.mrf.mxu0 }
 0x704   : > { %v9190_v10 = vpop.f32.mrf.mxu0 }
 0x706   : > { %v9192_v56 = vpop.f32.mrf.mxu0 }
 0x708   : > { %v9193_v13 = vpop.f32.mrf.mxu0 }
 0x714   : > { %v9147_v59 = vpop.f32.mrf.mxu1 }
 0x715   : > { %v9148_v0 = vadd.f32 %v9147_v59, %v9107_v44 }
 0x716   : > { %v9149_v47 = vpop.f32.mrf.mxu1 }
 0x717   : > { %v9150_v23 = vadd.f32 %v9149_v47, %v9109_v57  ;;  %v9189_v45 = vadd.f32 %v9188_v17, %v9148_v0 }
 0x718   : > { %v9151_v5 = vpop.f32.mrf.mxu1 }
 0x719   : > { %v9191_v6 = vadd.f32 %v9190_v10, %v9150_v23 }
 0x71a   : > { %v9152_v61 = vpop.f32.mrf.mxu1 }
 0x742   : > { %v9270_v35 = vpop.f32.mrf.mxu0 }
 0x744   : > { %v9272_v48 = vpop.f32.mrf.mxu0 }
 0x746   : > { %v9274_v15 = vpop.f32.mrf.mxu0 }
 0x748   : > { %v9275_v12 = vpop.f32.mrf.mxu0 }
 0x754   : > { %v9229_v31 = vpop.f32.mrf.mxu1 }
 0x755   : > { %v9230_v53 = vadd.f32 %v9229_v31, %v9189_v45 }
 0x756   : > { %v9231_v51 = vpop.f32.mrf.mxu1 }
 0x757   : > { %v9232_v14 = vadd.f32 %v9231_v51, %v9191_v6  ;;  %v9271_v49 = vadd.f32 %v9270_v35, %v9230_v53 }
 0x758   : > { %v9233_v41 = vpop.f32.mrf.mxu1 }
 0x759   : > { %v9273_v27 = vadd.f32 %v9272_v48, %v9232_v14 }
 0x75a   : > { %v9234_v34 = vpop.f32.mrf.mxu1 }
 0x764   : > { %v9311_v58 = vpop.f32.mrf.mxu1 }
 0x765   : > { %v9312_v16 = vadd.f32 %v9311_v58, %v9271_v49 }
 0x766   : > { %v9313_v30 = vpop.f32.mrf.mxu1 }
 0x767   : > { %v9314_v3 = vadd.f32 %v9313_v30, %v9273_v27  ;;  %v9320_v26 = vmax.f32 %v9312_v16, 0.0 }
 0x768   : > { %v9315_v39 = vpop.f32.mrf.mxu1 }
 0x769   : > { %v9321_v9 = vmax.f32 %v9314_v3, 0.0  ;;  %v9324_v60 = vpack.c.bf16 %v9320_v26, %v9320_v26 }
 0x76a   : > { %v9316_v24 = vpop.f32.mrf.mxu1 }
 0x76b   : > { %v9325_v19 = vpack.c.bf16 %v9321_v9, %v9321_v9 }
 0x76d   : > { %9655 = vmatprep.mubr.bf16.mxu0 %v9325_v19 }
 0x76e   : > { %9656 = vmatmul.mubr.bf16.vlgmr.msra.gmra.mxu0 %v9324_v60 }
 0x784   : > { %v11334_v18 = vpop.f32.mrf.mxu1 }
 0x786   : > { %v11335_v20 = vpop.f32.mrf.mxu1 }
 0x787   : > { %v11336_v7 = vadd.f32 %v11335_v20, %v11334_v18 }
 0x788   : > { %v11337_v55 = vpop.f32.mrf.mxu1 }
 0x789   : > { %v9618_v50 = vadd.f32 %v11336_v7, %v9390_v21 }
 0x78a   : > { %v11338_v4 = vpop.f32.mrf.mxu1 }
 0x82e   : > { %v11356_v62 = vpop.f32.mrf.mxu0 }
 0x830   : > { %v11357_v8 = vpop.f32.mrf.mxu0 }
 0x831   : > { %v11358_v29 = vadd.f32 %v11357_v8, %v11356_v62 }
 0x832   : > { %v11359_v1 = vpop.f32.mrf.mxu0 }
 0x833   : > { %v9658_v28 = vadd.f32 %v11358_v29, %v9618_v50 }
 0x834   : > { %v11360_v42 = vpop.f32.mrf.mxu0 }
 0x835   : > { %9663 = vst [vmem:[%s378_s29] sm:$0x1] %v9658_v28 }
 0x836   : > { %12841 = shalt.err (!%p12838_p3)
}
 0x837   : > { %s12842_s25 = scalar_lea.hbm %s16890_s15, 16  ;;  %s12846_s14 = scalar_lea.hbm %s16936_s11, 32 }
 0x838   : > { %p12843_p4 = scmp.ne.s32.totalorder %s16890_s15, %s12842_s25  ;;  %p12847_p9 = scmp.lt.s32.totalorder %s16890_s15, %s16936_s11 }
 0x839   : > { %p12848_p10 = scmp.lt.s32.totalorder %s12846_s14, %s12842_s25 }
 0x83a   : > { %p12844_p7 = pnand %p12843_p4, %p12993_p5 }
 0x83b   : > { %p12849_p11 = por %p12848_p10, %p12847_p9 }
 0x83c   : > { %p12845_p8 = pneg %p12844_p7 }
 0x83e   : > { %p12850_p12 = pnand %p12849_p11, %p12845_p8 }
 0x840   : > { %12853 = shalt.err (!%p12850_p12)
}
 0x841   : > { %11399 = dma.vmem_to_hbm [thread:$0]  (%p12993_p5), %s9678_s30, 16, %s16890_s15, %s9665_s16  }
 0x842 PF: > { %p11405_p13 = scmp.ge.s32.totalorder %s12888_s20, 2  ;;  %s9689_s22 = sand.u32 1, %s12876_s17  }
 0x843   : > { %s9690_s26 = scalar_lea.sflag [#allocation3], %s9689_s22 }
 0x844   : > { %p11402_p0 = pnand %p11405_p13, %p12997_p6 }
 0x846   : > { %p11403_p1 = pneg %p11402_p0 }
 0x848   : > { %12871 = dma.done.wait (%p11403_p1), %s9690_s26, 16  }
 0x849   : > { %12873 = vsyncadd (%p11403_p1), %s9690_s26, 4294967280  ;;  %s16950_s13 = sld [smem:[#allocation5_spill]]  ;;  %p21_p2 = scmp.ge.s32.totalorder %s12980_s23, 4  }
 0x84a   : > { %s16951_s17 = smov %s12880_s18  ;;  %s16952_s18 = smov %s12884_s19 }
 0x84b   : > { %s16954_s20 = smov %s12980_s23  ;;  %23 = sbr.rel (!%p21_p2) target bundleno = 3 (0x3), region = 99 }
 0x84f   : > { %s16953_s19 = smov %s16950_s13 }
 0x850   :  { %9694 = vsyncpa [#allocation3], 1 }
 0x851   :  { %9696 = vsyncpa [#allocation3 + $0x1], 1 }

</bundles_post_ra>
